<compile_context>
chip_gen: v7x
topology: tpu7x:2x2x1
jax: 0.10.0
libtpu: 0.0.40
codegen_flags: <defaults>
</compile_context>

<pallas_src>
import numpy as np
import jax
import jax.numpy as jnp
from jax import lax
from jax.experimental import pallas as pl
from jax.experimental.pallas import tpu as pltpu

NEG_SLOPE = 0.3
BN_EPS = 1e-5
OUT_ALIGN = 8   # f32 sublane group for the final store


def _round_up(n, m):
    return ((n + m - 1) // m) * m


def _default_chan_align():
    """16 (= bf16 sublane group) on v6e/v7x; 8 on v5-and-older (128-deep MXU,
    9*16=144 would force two contraction passes)."""
    try:
        kind = jax.devices()[0].device_kind.lower()
        if any(v in kind for v in ("v2", "v3", "v4", "v5")):
            return 8
    except Exception:
        pass
    return 16


def _dilate_matrix_np(H, W):
    """(H*(W+2), (2H+2)*(2W+2)+2) 0/1: Wp-form act -> x2 zero-stuffed + pad(1,2)
    flat buffer.  A VALID 3x3 conv over it equals ConvTranspose2d(k=3, s=2,
    p=1, op=1) with the flipped / in-out-swapped kernel.  Rows for the 2
    don't-care columns per Wp-form row are zero (no mask needed on this path).
    """
    wp_in = W + 2
    wp_out = 2 * W + 2
    S = np.zeros((H * wp_in, (2 * H + 2) * wp_out + 2), np.float32)
    for i in range(H):
        for j in range(W):
            S[i * wp_in + j, (1 + 2 * i) * wp_out + (1 + 2 * j)] = 1.0
    return S


# ----------------------------------------------------------------------------
# Parameter init (deterministic synthetic weights; static transforms at init)
# ----------------------------------------------------------------------------
def _bn_fold(key, c):
    k1, k2, k3, k4 = jax.random.split(key, 4)
    gamma = 1.0 + 0.1 * jax.random.normal(k1, (c,))
    beta = 0.1 * jax.random.normal(k2, (c,))
    rmean = 0.1 * jax.random.normal(k3, (c,))
    rvar = 1.0 + 0.1 * jnp.abs(jax.random.normal(k4, (c,)))
    scale = gamma / jnp.sqrt(rvar + BN_EPS)
    bias = beta - rmean * scale
    return scale, bias


def _conv_entry(w_oihw, scale, bias):
    return {"w_oihw": jnp.asarray(w_oihw, jnp.float32),
            "scale": jnp.asarray(scale, jnp.float32),
            "bias": jnp.asarray(bias, jnp.float32)}


def init_decoder_params(key, n_channels, layer_channels, n_residual_blocks):
    stages = []
    in_c = layer_channels[0]
    extended = list(layer_channels) + [layer_channels[-1]]
    for out_c in extended[1:]:
        resblocks = []
        for _ in range(n_residual_blocks):
            key, k1, k2, kb1, kb2 = jax.random.split(key, 5)
            s1, b1 = _bn_fold(kb1, in_c)
            s2, b2 = _bn_fold(kb2, in_c)
            w1 = 0.1 * jax.random.normal(k1, (in_c, in_c, 3, 3))
            w2 = 0.1 * jax.random.normal(k2, (in_c, in_c, 3, 3))
            resblocks.append({"conv1": _conv_entry(w1, s1, b1),
                              "conv2": _conv_entry(w2, s2, b2)})
        key, kt, kbn = jax.random.split(key, 3)
        s, b = _bn_fold(kbn, out_c)
        # PyTorch ConvTranspose2d weight layout: (Ci, Co, kh, kw).
        wt = 0.1 * jax.random.normal(kt, (in_c, out_c, 3, 3))
        # Equivalent regular conv weight: flip spatial, swap in/out channels.
        w_eq = jnp.flip(wt, axis=(2, 3)).transpose(1, 0, 2, 3)
        stages.append({"resblocks": resblocks, "ct": _conv_entry(w_eq, s, b)})
        in_c = out_c
    key, kf, kfb = jax.random.split(key, 3)
    wf = 0.1 * jax.random.normal(kf, (n_channels, layer_channels[-1], 3, 3))
    bf = 0.1 * jax.random.normal(kfb, (n_channels,))
    final = _conv_entry(wf, jnp.ones((n_channels,)), bf)   # Conv2d bias, no BN
    return {"stages": stages, "final": final}


# ----------------------------------------------------------------------------
# Fused whole-decoder Pallas kernel builder
# ----------------------------------------------------------------------------
def build_decoder_forward(params, n_channels, layer_channels, unflat_size,
                          batch_tile=2, chan_align=None):
    C0, H0, W0 = unflat_size
    assert C0 == layer_channels[0], "unflat_size channels must match layer_channels[0]"
    CA = int(chan_align) if chan_align is not None else _default_chan_align()
    Bt = int(batch_tile)
    C0p = _round_up(C0, CA)
    Wp0 = W0 + 2
    M0 = H0 * Wp0

    # ------------------- static per-conv schedule -------------------
    conv_entries = []   # (param entry, ci_pad, co_pad)
    dil_mats = []       # bf16 dilate matrices (one per upsampling stage)
    sizes = []          # distinct (H, W) where a plain 3x3 conv runs
    plan = []

    def size_id(h, w):
        if (h, w) not in sizes:
            sizes.append((h, w))
        return sizes.index((h, w))

    H, W = H0, W0
    cin = C0
    for stage in params["stages"]:
        ci_pad = _round_up(cin, CA)
        for rb in stage["resblocks"]:
            for name, save_id, add_id in (("conv1", True, False),
                                          ("conv2", False, True)):
                plan.append(dict(kind="conv", idx=len(conv_entries),
                                 ci_pad=ci_pad, co_pad=ci_pad,
                                 Wp=W + 2, M=H * (W + 2), mask=size_id(H, W),
                                 save_id=save_id, add_id=add_id, leaky=True))
                conv_entries.append((rb[name], ci_pad, ci_pad))
        ct = stage["ct"]
        cout = int(ct["w_oihw"].shape[0])
        co_pad = _round_up(cout, CA)
        plan.append(dict(kind="convt", idx=len(conv_entries),
                         ci_pad=ci_pad, co_pad=co_pad,
                         Wp=2 * W + 2, M=2 * H * (2 * W + 2),
                         dil=len(dil_mats),
                         save_id=False, add_id=False, leaky=True))
        conv_entries.append((ct, ci_pad, co_pad))
        dil_mats.append(jnp.asarray(_dilate_matrix_np(H, W), jnp.bfloat16))
        H, W, cin = 2 * H, 2 * W, cout
    ci_pad = _round_up(cin, CA)
    CFp = _round_up(n_channels, OUT_ALIGN)
    plan.append(dict(kind="conv", idx=len(conv_entries),
                     ci_pad=ci_pad, co_pad=CFp,
                     Wp=W + 2, M=H * (W + 2), mask=size_id(H, W),
                     save_id=False, add_id=False, leaky=False))
    conv_entries.append((params["final"], ci_pad, CFp))
    Hf, Wf = H, W
    Wpf, Mf = W + 2, H * (W + 2)

    # ------------------- packed constants (few operands) -------------------
    n_convs = len(conv_entries)
    CMAX = max(co for _, _, co in conv_entries)
    K9MAX = 9 * max(ci for _, ci, _ in conv_entries)
    w_stack = np.zeros((n_convs, CMAX, K9MAX), np.float32)
    sb_all = np.zeros((CMAX, 2 * n_convs), np.float32)
    for i, (entry, cip, cop) in enumerate(conv_entries):
        w = np.asarray(entry["w_oihw"], np.float32)
        co, ci = w.shape[0], w.shape[1]
        wpad = np.zeros((cop, cip, 3, 3), np.float32)
        wpad[:co, :ci] = w
        # (Co_pad, 9*Ci_pad), contraction ordered (kh, kw, ci) to match patches.
        w_stack[i, :cop, :9 * cip] = wpad.transpose(0, 2, 3, 1).reshape(cop, 9 * cip)
        sb_all[:co, 2 * i] = np.asarray(entry["scale"], np.float32)
        sb_all[:co, 2 * i + 1] = np.asarray(entry["bias"], np.float32)

    MMAX = max(h * (w + 2) for h, w in sizes)
    mask_np = np.zeros((len(sizes), MMAX), np.float32)
    for s, (h, w) in enumerate(sizes):
        m2 = np.zeros((h, w + 2), np.float32)
        m2[:, :w] = 1.0
        mask_np[s, :h * (w + 2)] = m2.reshape(-1)

    tensors = [jnp.asarray(w_stack, jnp.bfloat16),     # 0: stacked weights
               jnp.asarray(sb_all, jnp.float32),       # 1: packed scale/bias
               jnp.asarray(mask_np, jnp.float32)] + dil_mats   # 2: masks, 3+: dilate
    DIL0 = 3

    # ------------------- kernel -------------------
    def kernel(*refs):
        x_ref, out_ref = refs[0], refs[-1]
        t = refs[1:-1]
        sb = t[1][...]       # (CMAX, 2*n_convs) f32
        masks = t[2][...]    # (n_sizes, MMAX) f32
        # Bt independent per-image chains, unrolled -> interleavable by the scheduler.
        for b in range(Bt):
            act = x_ref[b]   # (C0p, M0) f32, Wp-form (pad cols are real zeros)
            identity = None
            for st in plan:
                cip, cop, Wp, M = st["ci_pad"], st["co_pad"], st["Wp"], st["M"]
                if st["save_id"]:
                    identity = act
                if st["kind"] == "conv":
                    # zero the 2 don't-care cols/row, then zero-pad via concat
                    mrow = masks[st["mask"]:st["mask"] + 1, :M]
                    a_bf = (act * mrow).astype(jnp.bfloat16)
                    zed = jnp.zeros((cip, Wp + 1), jnp.bfloat16)
                    padded = jnp.concatenate([zed, a_bf, zed], axis=1)
                else:
                    # ConvTranspose2d path: x2 zero-stuff + pad via tiny 0/1 matmul
                    padded = jnp.dot(act.astype(jnp.bfloat16),
                                     t[DIL0 + st["dil"]][...],
                                     preferred_element_type=jnp.float32
                                     ).astype(jnp.bfloat16)
                # im2col: 9 static lane-shifted slices, sublane-aligned concat,
                # ONE bf16 MXU matmul with f32 accumulation.
                taps = [padded[:, kh * Wp + kw: kh * Wp + kw + M]
                        for kh in range(3) for kw in range(3)]
                patches = jnp.concatenate(taps, axis=0)          # (9*cip, M) bf16
                w = t[0][st["idx"]][:cop, :9 * cip]
                y = jnp.dot(w, patches, preferred_element_type=jnp.float32)
                y = (y * sb[:cop, 2 * st["idx"]:2 * st["idx"] + 1]
                     + sb[:cop, 2 * st["idx"] + 1:2 * st["idx"] + 2])
                if st["add_id"]:
                    y = y + identity
                if st["leaky"]:
                    y = jnp.where(y >= 0.0, y, NEG_SLOPE * y)
                act = y
            out_ref[b] = act           # (CFp, Mf) f32, Wp-form, 8-aligned sublanes

    # ------------------- specs / call -------------------
    x_spec = pl.BlockSpec((Bt, C0p, M0), lambda g: (g, 0, 0))
    const_specs = [pl.BlockSpec(a.shape, lambda g, n=a.ndim: (0,) * n)
                   for a in tensors]
    out_spec = pl.BlockSpec((Bt, CFp, Mf), lambda g: (g, 0, 0))

    const_bytes = sum(int(np.prod(a.shape)) * a.dtype.itemsize for a in tensors)
    io_bytes = 4 * Bt * (C0p * M0 + CFp * Mf)
    # explicit VMEM budget derived from the (tiny) operand footprint, with headroom
    vmem_limit = int(max(16 << 20, 4 * (const_bytes + io_bytes)))

    def forward(x2d):
        B = x2d.shape[0]
        Bpad = _round_up(B, Bt)
        # exact dense -> Wp-form conversion in the wrapper (no in-kernel matmul)
        x4 = x2d.reshape(B, C0, H0, W0).astype(jnp.float32)
        x4 = jnp.pad(x4, ((0, Bpad - B), (0, C0p - C0), (0, 0), (0, 2)))
        out = pl.pallas_call(
            kernel,
            out_shape=jax.ShapeDtypeStruct((Bpad, CFp, Mf), jnp.float32),
            grid=(Bpad // Bt,),
            in_specs=[x_spec] + const_specs,
            out_specs=out_spec,
            compiler_params=pltpu.CompilerParams(
                dimension_semantics=("parallel",),
                vmem_limit_bytes=vmem_limit),
        )(x4.reshape(Bpad, C0p, M0), *tensors)
        # Wp-form -> dense: drop the 2 pad cols/row and padded channels/batch
        out = out.reshape(Bpad, CFp, Hf, Wpf)
        return out[:B, :n_channels, :, :Wf]

    return jax.jit(forward)


# ----------------------------------------------------------------------------
# Pure-JAX reference (same math: bf16 MXU operands, f32 accumulation)
# ----------------------------------------------------------------------------
def _ref_conv(a, p, *, dilated=False, residual=None, leaky=True):
    w = p["w_oihw"].astype(jnp.bfloat16)
    xb = a.astype(jnp.bfloat16)
    if dilated:
        y = lax.conv_general_dilated(
            xb, w, (1, 1), ((1, 2), (1, 2)), lhs_dilation=(2, 2),
            dimension_numbers=("NCHW", "OIHW", "NCHW"),
            preferred_element_type=jnp.float32)
    else:
        y = lax.conv_general_dilated(
            xb, w, (1, 1), ((1, 1), (1, 1)),
            dimension_numbers=("NCHW", "OIHW", "NCHW"),
            preferred_element_type=jnp.float32)
    y = y * p["scale"][None, :, None, None] + p["bias"][None, :, None, None]
    if residual is not None:
        y = y + residual
    if leaky:
        y = jnp.where(y >= 0.0, y, NEG_SLOPE * y)
    return y


def decoder_reference(x2d, params, unflat_size):
    C0, H0, W0 = unflat_size
    B = x2d.shape[0]
    a = x2d.reshape(B, C0, H0, W0).astype(jnp.float32)
    for stage in params["stages"]:
        for rb in stage["resblocks"]:
            idt = a
            a = _ref_conv(a, rb["conv1"], leaky=True)
            a = _ref_conv(a, rb["conv2"], residual=idt, leaky=True)
        a = _ref_conv(a, stage["ct"], dilated=True, leaky=True)
    a = _ref_conv(a, params["final"], leaky=False)
    return a


# ----------------------------------------------------------------------------
if __name__ == "__main__":
    n_channels = 3
    layer_channels = [8, 4]        # reversed encoder channels
    unflat_size = (8, 4, 4)        # (C, H, W) after unflatten
    n_residual_blocks = 1
    B = 2

    key = jax.random.PRNGKey(0)
    kx, kp = jax.random.split(key)
    x = jax.random.normal(
        kx, (B, unflat_size[0] * unflat_size[1] * unflat_size[2]), jnp.float32)
    params = init_decoder_params(kp, n_channels, layer_channels, n_residual_blocks)

    decoder = build_decoder_forward(params, n_channels, layer_channels, unflat_size,
                                    batch_tile=2)
    out = jax.block_until_ready(decoder(x))     # single fused Pallas kernel

    # two stride-2 upsamplings: 4 -> 8 -> 16
    assert out.shape == (B, n_channels, 16, 16), out.shape

    ref = jax.block_until_ready(decoder_reference(x, params, unflat_size))
    np.testing.assert_allclose(np.asarray(out), np.asarray(ref),
                               rtol=5e-3, atol=5e-3)
    print("KERNEL_OK")
</pallas_src>

<mosaic_0001>
module attributes {stable_mosaic.version = 11 : i64} {
  func.func @kernel(%arg0: i32, %arg1: memref<2x16x24xf32, #tpu.memory_space<vmem>>, %arg2: memref<7x16x144xbf16, #tpu.memory_space<vmem>>, %arg3: memref<16x14xf32, #tpu.memory_space<vmem>>, %arg4: memref<3x288xf32, #tpu.memory_space<vmem>>, %arg5: memref<24x102xbf16, #tpu.memory_space<vmem>>, %arg6: memref<80x326xbf16, #tpu.memory_space<vmem>>, %arg7: memref<2x8x288xf32, #tpu.memory_space<vmem>>) attributes {dimension_semantics = [#tpu.dimension_semantics<parallel>], iteration_bounds = array<i64: 1>, scalar_prefetch = 0 : i64, scratch_operands = 0 : i64, tpu.core_type = #tpu.core_type<tc>, window_params = [{transform_indices = @transform_0, window_bounds = array<i64: 2, 16, 24>}, {pipeline_mode = #tpu.pipeline_mode<synchronous>, transform_indices = @transform_1, window_bounds = array<i64: 7, 16, 144>}, {pipeline_mode = #tpu.pipeline_mode<synchronous>, transform_indices = @transform_2, window_bounds = array<i64: 16, 14>}, {pipeline_mode = #tpu.pipeline_mode<synchronous>, transform_indices = @transform_3, window_bounds = array<i64: 3, 288>}, {pipeline_mode = #tpu.pipeline_mode<synchronous>, transform_indices = @transform_4, window_bounds = array<i64: 24, 102>}, {pipeline_mode = #tpu.pipeline_mode<synchronous>, transform_indices = @transform_5, window_bounds = array<i64: 80, 326>}, {transform_indices = @transform_6, window_bounds = array<i64: 2, 8, 288>}]} {
    %c0 = arith.constant 0 : index
    %c0_0 = arith.constant 0 : index
    %0 = vector.load %arg3[%c0, %c0_0] : memref<16x14xf32, #tpu.memory_space<vmem>>, vector<16x14xf32>
    %c0_1 = arith.constant 0 : index
    %c0_2 = arith.constant 0 : index
    %1 = vector.load %arg4[%c0_1, %c0_2] : memref<3x288xf32, #tpu.memory_space<vmem>>, vector<3x288xf32>
    %c0_3 = arith.constant 0 : index
    %c0_4 = arith.constant 0 : index
    %c0_5 = arith.constant 0 : index
    %2 = vector.load %arg1[%c0_3, %c0_4, %c0_5] : memref<2x16x24xf32, #tpu.memory_space<vmem>>, vector<1x16x24xf32>
    %3 = vector.shape_cast %2 : vector<1x16x24xf32> to vector<16x24xf32>
    %4 = vector.extract_strided_slice %1 {offsets = [0, 0], sizes = [1, 24], strides = [1, 1]} : vector<3x288xf32> to vector<1x24xf32>
    %5 = vector.broadcast %4 : vector<1x24xf32> to vector<16x24xf32>
    %6 = arith.mulf %3, %5 : vector<16x24xf32>
    %7 = arith.truncf %6 : vector<16x24xf32> to vector<16x24xbf16>
    %cst = arith.constant 0.000000e+00 : bf16
    %8 = vector.broadcast %cst : bf16 to vector<16x7xbf16>
    %9 = tpu.concatenate %8, %7, %8 in 1 : vector<16x7xbf16>, vector<16x24xbf16>, vector<16x7xbf16> -> vector<16x38xbf16>
    %10 = vector.extract_strided_slice %9 {offsets = [0, 0], sizes = [16, 24], strides = [1, 1]} : vector<16x38xbf16> to vector<16x24xbf16>
    %11 = vector.extract_strided_slice %9 {offsets = [0, 1], sizes = [16, 24], strides = [1, 1]} : vector<16x38xbf16> to vector<16x24xbf16>
    %12 = vector.extract_strided_slice %9 {offsets = [0, 2], sizes = [16, 24], strides = [1, 1]} : vector<16x38xbf16> to vector<16x24xbf16>
    %13 = vector.extract_strided_slice %9 {offsets = [0, 6], sizes = [16, 24], strides = [1, 1]} : vector<16x38xbf16> to vector<16x24xbf16>
    %14 = vector.extract_strided_slice %9 {offsets = [0, 7], sizes = [16, 24], strides = [1, 1]} : vector<16x38xbf16> to vector<16x24xbf16>
    %15 = vector.extract_strided_slice %9 {offsets = [0, 8], sizes = [16, 24], strides = [1, 1]} : vector<16x38xbf16> to vector<16x24xbf16>
    %16 = vector.extract_strided_slice %9 {offsets = [0, 12], sizes = [16, 24], strides = [1, 1]} : vector<16x38xbf16> to vector<16x24xbf16>
    %17 = vector.extract_strided_slice %9 {offsets = [0, 13], sizes = [16, 24], strides = [1, 1]} : vector<16x38xbf16> to vector<16x24xbf16>
    %18 = vector.extract_strided_slice %9 {offsets = [0, 14], sizes = [16, 24], strides = [1, 1]} : vector<16x38xbf16> to vector<16x24xbf16>
    %19 = tpu.concatenate %10, %11, %12, %13, %14, %15, %16, %17, %18 in 0 : vector<16x24xbf16>, vector<16x24xbf16>, vector<16x24xbf16>, vector<16x24xbf16>, vector<16x24xbf16>, vector<16x24xbf16>, vector<16x24xbf16>, vector<16x24xbf16>, vector<16x24xbf16> -> vector<144x24xbf16>
    %c0_6 = arith.constant 0 : index
    %c0_7 = arith.constant 0 : index
    %c0_8 = arith.constant 0 : index
    %20 = vector.load %arg2[%c0_6, %c0_7, %c0_8] : memref<7x16x144xbf16, #tpu.memory_space<vmem>>, vector<1x16x144xbf16>
    %21 = vector.shape_cast %20 : vector<1x16x144xbf16> to vector<16x144xbf16>
    %cst_9 = arith.constant dense<0.000000e+00> : vector<16x24xf32>
    %22 = tpu.matmul %21, %19, %cst_9 {dimension_numbers = #tpu.dot_dimension_numbers<[1], [0], [0], [1], [0, 0, 1, 1], [], []>} : vector<16x144xbf16>, vector<144x24xbf16>, vector<16x24xf32> -> vector<16x24xf32>
    %23 = vector.extract_strided_slice %0 {offsets = [0, 0], sizes = [16, 1], strides = [1, 1]} : vector<16x14xf32> to vector<16x1xf32>
    %24 = vector.broadcast %23 : vector<16x1xf32> to vector<16x24xf32>
    %25 = arith.mulf %22, %24 : vector<16x24xf32>
    %26 = vector.extract_strided_slice %0 {offsets = [0, 1], sizes = [16, 1], strides = [1, 1]} : vector<16x14xf32> to vector<16x1xf32>
    %27 = vector.broadcast %26 : vector<16x1xf32> to vector<16x24xf32>
    %28 = arith.addf %25, %27 : vector<16x24xf32>
    %cst_10 = arith.constant 0.000000e+00 : f32
    %29 = vector.broadcast %cst_10 : f32 to vector<16x24xf32>
    %30 = arith.cmpf oge, %28, %29 : vector<16x24xf32>
    %cst_11 = arith.constant 3.000000e-01 : f32
    %31 = vector.broadcast %cst_11 : f32 to vector<16x24xf32>
    %32 = arith.mulf %31, %28 : vector<16x24xf32>
    %33 = arith.select %30, %28, %32 : vector<16x24xi1>, vector<16x24xf32>
    %34 = vector.extract_strided_slice %1 {offsets = [0, 0], sizes = [1, 24], strides = [1, 1]} : vector<3x288xf32> to vector<1x24xf32>
    %35 = vector.broadcast %34 : vector<1x24xf32> to vector<16x24xf32>
    %36 = arith.mulf %33, %35 : vector<16x24xf32>
    %37 = arith.truncf %36 : vector<16x24xf32> to vector<16x24xbf16>
    %cst_12 = arith.constant 0.000000e+00 : bf16
    %38 = vector.broadcast %cst_12 : bf16 to vector<16x7xbf16>
    %39 = tpu.concatenate %38, %37, %38 in 1 : vector<16x7xbf16>, vector<16x24xbf16>, vector<16x7xbf16> -> vector<16x38xbf16>
    %40 = vector.extract_strided_slice %39 {offsets = [0, 0], sizes = [16, 24], strides = [1, 1]} : vector<16x38xbf16> to vector<16x24xbf16>
    %41 = vector.extract_strided_slice %39 {offsets = [0, 1], sizes = [16, 24], strides = [1, 1]} : vector<16x38xbf16> to vector<16x24xbf16>
    %42 = vector.extract_strided_slice %39 {offsets = [0, 2], sizes = [16, 24], strides = [1, 1]} : vector<16x38xbf16> to vector<16x24xbf16>
    %43 = vector.extract_strided_slice %39 {offsets = [0, 6], sizes = [16, 24], strides = [1, 1]} : vector<16x38xbf16> to vector<16x24xbf16>
    %44 = vector.extract_strided_slice %39 {offsets = [0, 7], sizes = [16, 24], strides = [1, 1]} : vector<16x38xbf16> to vector<16x24xbf16>
    %45 = vector.extract_strided_slice %39 {offsets = [0, 8], sizes = [16, 24], strides = [1, 1]} : vector<16x38xbf16> to vector<16x24xbf16>
    %46 = vector.extract_strided_slice %39 {offsets = [0, 12], sizes = [16, 24], strides = [1, 1]} : vector<16x38xbf16> to vector<16x24xbf16>
    %47 = vector.extract_strided_slice %39 {offsets = [0, 13], sizes = [16, 24], strides = [1, 1]} : vector<16x38xbf16> to vector<16x24xbf16>
    %48 = vector.extract_strided_slice %39 {offsets = [0, 14], sizes = [16, 24], strides = [1, 1]} : vector<16x38xbf16> to vector<16x24xbf16>
    %49 = tpu.concatenate %40, %41, %42, %43, %44, %45, %46, %47, %48 in 0 : vector<16x24xbf16>, vector<16x24xbf16>, vector<16x24xbf16>, vector<16x24xbf16>, vector<16x24xbf16>, vector<16x24xbf16>, vector<16x24xbf16>, vector<16x24xbf16>, vector<16x24xbf16> -> vector<144x24xbf16>
    %c1 = arith.constant 1 : index
    %c0_13 = arith.constant 0 : index
    %c0_14 = arith.constant 0 : index
    %50 = vector.load %arg2[%c1, %c0_13, %c0_14] : memref<7x16x144xbf16, #tpu.memory_space<vmem>>, vector<1x16x144xbf16>
    %51 = vector.shape_cast %50 : vector<1x16x144xbf16> to vector<16x144xbf16>
    %cst_15 = arith.constant dense<0.000000e+00> : vector<16x24xf32>
    %52 = tpu.matmul %51, %49, %cst_15 {dimension_numbers = #tpu.dot_dimension_numbers<[1], [0], [0], [1], [0, 0, 1, 1], [], []>} : vector<16x144xbf16>, vector<144x24xbf16>, vector<16x24xf32> -> vector<16x24xf32>
    %53 = vector.extract_strided_slice %0 {offsets = [0, 2], sizes = [16, 1], strides = [1, 1]} : vector<16x14xf32> to vector<16x1xf32>
    %54 = vector.broadcast %53 : vector<16x1xf32> to vector<16x24xf32>
    %55 = arith.mulf %52, %54 : vector<16x24xf32>
    %56 = vector.extract_strided_slice %0 {offsets = [0, 3], sizes = [16, 1], strides = [1, 1]} : vector<16x14xf32> to vector<16x1xf32>
    %57 = vector.broadcast %56 : vector<16x1xf32> to vector<16x24xf32>
    %58 = arith.addf %55, %57 : vector<16x24xf32>
    %59 = arith.addf %58, %3 : vector<16x24xf32>
    %cst_16 = arith.constant 0.000000e+00 : f32
    %60 = vector.broadcast %cst_16 : f32 to vector<16x24xf32>
    %61 = arith.cmpf oge, %59, %60 : vector<16x24xf32>
    %cst_17 = arith.constant 3.000000e-01 : f32
    %62 = vector.broadcast %cst_17 : f32 to vector<16x24xf32>
    %63 = arith.mulf %62, %59 : vector<16x24xf32>
    %64 = arith.select %61, %59, %63 : vector<16x24xi1>, vector<16x24xf32>
    %65 = arith.truncf %64 : vector<16x24xf32> to vector<16x24xbf16>
    %c0_18 = arith.constant 0 : index
    %c0_19 = arith.constant 0 : index
    %66 = vector.load %arg5[%c0_18, %c0_19] : memref<24x102xbf16, #tpu.memory_space<vmem>>, vector<24x102xbf16>
    %cst_20 = arith.constant dense<0.000000e+00> : vector<16x102xf32>
    %67 = tpu.matmul %65, %66, %cst_20 {dimension_numbers = #tpu.dot_dimension_numbers<[1], [0], [0], [1], [0, 0, 1, 1], [], []>} : vector<16x24xbf16>, vector<24x102xbf16>, vector<16x102xf32> -> vector<16x102xf32>
    %68 = arith.truncf %67 : vector<16x102xf32> to vector<16x102xbf16>
    %69 = vector.extract_strided_slice %68 {offsets = [0, 0], sizes = [16, 80], strides = [1, 1]} : vector<16x102xbf16> to vector<16x80xbf16>
    %70 = vector.extract_strided_slice %68 {offsets = [0, 1], sizes = [16, 80], strides = [1, 1]} : vector<16x102xbf16> to vector<16x80xbf16>
    %71 = vector.extract_strided_slice %68 {offsets = [0, 2], sizes = [16, 80], strides = [1, 1]} : vector<16x102xbf16> to vector<16x80xbf16>
    %72 = vector.extract_strided_slice %68 {offsets = [0, 10], sizes = [16, 80], strides = [1, 1]} : vector<16x102xbf16> to vector<16x80xbf16>
    %73 = vector.extract_strided_slice %68 {offsets = [0, 11], sizes = [16, 80], strides = [1, 1]} : vector<16x102xbf16> to vector<16x80xbf16>
    %74 = vector.extract_strided_slice %68 {offsets = [0, 12], sizes = [16, 80], strides = [1, 1]} : vector<16x102xbf16> to vector<16x80xbf16>
    %75 = vector.extract_strided_slice %68 {offsets = [0, 20], sizes = [16, 80], strides = [1, 1]} : vector<16x102xbf16> to vector<16x80xbf16>
    %76 = vector.extract_strided_slice %68 {offsets = [0, 21], sizes = [16, 80], strides = [1, 1]} : vector<16x102xbf16> to vector<16x80xbf16>
    %77 = vector.extract_strided_slice %68 {offsets = [0, 22], sizes = [16, 80], strides = [1, 1]} : vector<16x102xbf16> to vector<16x80xbf16>
    %78 = tpu.concatenate %69, %70, %71, %72, %73, %74, %75, %76, %77 in 0 : vector<16x80xbf16>, vector<16x80xbf16>, vector<16x80xbf16>, vector<16x80xbf16>, vector<16x80xbf16>, vector<16x80xbf16>, vector<16x80xbf16>, vector<16x80xbf16>, vector<16x80xbf16> -> vector<144x80xbf16>
    %c2 = arith.constant 2 : index
    %c0_21 = arith.constant 0 : index
    %c0_22 = arith.constant 0 : index
    %79 = vector.load %arg2[%c2, %c0_21, %c0_22] : memref<7x16x144xbf16, #tpu.memory_space<vmem>>, vector<1x16x144xbf16>
    %80 = vector.shape_cast %79 : vector<1x16x144xbf16> to vector<16x144xbf16>
    %cst_23 = arith.constant dense<0.000000e+00> : vector<16x80xf32>
    %81 = tpu.matmul %80, %78, %cst_23 {dimension_numbers = #tpu.dot_dimension_numbers<[1], [0], [0], [1], [0, 0, 1, 1], [], []>} : vector<16x144xbf16>, vector<144x80xbf16>, vector<16x80xf32> -> vector<16x80xf32>
    %82 = vector.extract_strided_slice %0 {offsets = [0, 4], sizes = [16, 1], strides = [1, 1]} : vector<16x14xf32> to vector<16x1xf32>
    %83 = vector.broadcast %82 : vector<16x1xf32> to vector<16x80xf32>
    %84 = arith.mulf %81, %83 : vector<16x80xf32>
    %85 = vector.extract_strided_slice %0 {offsets = [0, 5], sizes = [16, 1], strides = [1, 1]} : vector<16x14xf32> to vector<16x1xf32>
    %86 = vector.broadcast %85 : vector<16x1xf32> to vector<16x80xf32>
    %87 = arith.addf %84, %86 : vector<16x80xf32>
    %cst_24 = arith.constant 0.000000e+00 : f32
    %88 = vector.broadcast %cst_24 : f32 to vector<16x80xf32>
    %89 = arith.cmpf oge, %87, %88 : vector<16x80xf32>
    %cst_25 = arith.constant 3.000000e-01 : f32
    %90 = vector.broadcast %cst_25 : f32 to vector<16x80xf32>
    %91 = arith.mulf %90, %87 : vector<16x80xf32>
    %92 = arith.select %89, %87, %91 : vector<16x80xi1>, vector<16x80xf32>
    %93 = vector.extract_strided_slice %1 {offsets = [1, 0], sizes = [1, 80], strides = [1, 1]} : vector<3x288xf32> to vector<1x80xf32>
    %94 = vector.broadcast %93 : vector<1x80xf32> to vector<16x80xf32>
    %95 = arith.mulf %92, %94 : vector<16x80xf32>
    %96 = arith.truncf %95 : vector<16x80xf32> to vector<16x80xbf16>
    %cst_26 = arith.constant 0.000000e+00 : bf16
    %97 = vector.broadcast %cst_26 : bf16 to vector<16x11xbf16>
    %98 = tpu.concatenate %97, %96, %97 in 1 : vector<16x11xbf16>, vector<16x80xbf16>, vector<16x11xbf16> -> vector<16x102xbf16>
    %99 = vector.extract_strided_slice %98 {offsets = [0, 0], sizes = [16, 80], strides = [1, 1]} : vector<16x102xbf16> to vector<16x80xbf16>
    %100 = vector.extract_strided_slice %98 {offsets = [0, 1], sizes = [16, 80], strides = [1, 1]} : vector<16x102xbf16> to vector<16x80xbf16>
    %101 = vector.extract_strided_slice %98 {offsets = [0, 2], sizes = [16, 80], strides = [1, 1]} : vector<16x102xbf16> to vector<16x80xbf16>
    %102 = vector.extract_strided_slice %98 {offsets = [0, 10], sizes = [16, 80], strides = [1, 1]} : vector<16x102xbf16> to vector<16x80xbf16>
    %103 = vector.extract_strided_slice %98 {offsets = [0, 11], sizes = [16, 80], strides = [1, 1]} : vector<16x102xbf16> to vector<16x80xbf16>
    %104 = vector.extract_strided_slice %98 {offsets = [0, 12], sizes = [16, 80], strides = [1, 1]} : vector<16x102xbf16> to vector<16x80xbf16>
    %105 = vector.extract_strided_slice %98 {offsets = [0, 20], sizes = [16, 80], strides = [1, 1]} : vector<16x102xbf16> to vector<16x80xbf16>
    %106 = vector.extract_strided_slice %98 {offsets = [0, 21], sizes = [16, 80], strides = [1, 1]} : vector<16x102xbf16> to vector<16x80xbf16>
    %107 = vector.extract_strided_slice %98 {offsets = [0, 22], sizes = [16, 80], strides = [1, 1]} : vector<16x102xbf16> to vector<16x80xbf16>
    %108 = tpu.concatenate %99, %100, %101, %102, %103, %104, %105, %106, %107 in 0 : vector<16x80xbf16>, vector<16x80xbf16>, vector<16x80xbf16>, vector<16x80xbf16>, vector<16x80xbf16>, vector<16x80xbf16>, vector<16x80xbf16>, vector<16x80xbf16>, vector<16x80xbf16> -> vector<144x80xbf16>
    %c3 = arith.constant 3 : index
    %c0_27 = arith.constant 0 : index
    %c0_28 = arith.constant 0 : index
    %109 = vector.load %arg2[%c3, %c0_27, %c0_28] : memref<7x16x144xbf16, #tpu.memory_space<vmem>>, vector<1x16x144xbf16>
    %110 = vector.shape_cast %109 : vector<1x16x144xbf16> to vector<16x144xbf16>
    %cst_29 = arith.constant dense<0.000000e+00> : vector<16x80xf32>
    %111 = tpu.matmul %110, %108, %cst_29 {dimension_numbers = #tpu.dot_dimension_numbers<[1], [0], [0], [1], [0, 0, 1, 1], [], []>} : vector<16x144xbf16>, vector<144x80xbf16>, vector<16x80xf32> -> vector<16x80xf32>
    %112 = vector.extract_strided_slice %0 {offsets = [0, 6], sizes = [16, 1], strides = [1, 1]} : vector<16x14xf32> to vector<16x1xf32>
    %113 = vector.broadcast %112 : vector<16x1xf32> to vector<16x80xf32>
    %114 = arith.mulf %111, %113 : vector<16x80xf32>
    %115 = vector.extract_strided_slice %0 {offsets = [0, 7], sizes = [16, 1], strides = [1, 1]} : vector<16x14xf32> to vector<16x1xf32>
    %116 = vector.broadcast %115 : vector<16x1xf32> to vector<16x80xf32>
    %117 = arith.addf %114, %116 : vector<16x80xf32>
    %cst_30 = arith.constant 0.000000e+00 : f32
    %118 = vector.broadcast %cst_30 : f32 to vector<16x80xf32>
    %119 = arith.cmpf oge, %117, %118 : vector<16x80xf32>
    %cst_31 = arith.constant 3.000000e-01 : f32
    %120 = vector.broadcast %cst_31 : f32 to vector<16x80xf32>
    %121 = arith.mulf %120, %117 : vector<16x80xf32>
    %122 = arith.select %119, %117, %121 : vector<16x80xi1>, vector<16x80xf32>
    %123 = vector.extract_strided_slice %1 {offsets = [1, 0], sizes = [1, 80], strides = [1, 1]} : vector<3x288xf32> to vector<1x80xf32>
    %124 = vector.broadcast %123 : vector<1x80xf32> to vector<16x80xf32>
    %125 = arith.mulf %122, %124 : vector<16x80xf32>
    %126 = arith.truncf %125 : vector<16x80xf32> to vector<16x80xbf16>
    %cst_32 = arith.constant 0.000000e+00 : bf16
    %127 = vector.broadcast %cst_32 : bf16 to vector<16x11xbf16>
    %128 = tpu.concatenate %127, %126, %127 in 1 : vector<16x11xbf16>, vector<16x80xbf16>, vector<16x11xbf16> -> vector<16x102xbf16>
    %129 = vector.extract_strided_slice %128 {offsets = [0, 0], sizes = [16, 80], strides = [1, 1]} : vector<16x102xbf16> to vector<16x80xbf16>
    %130 = vector.extract_strided_slice %128 {offsets = [0, 1], sizes = [16, 80], strides = [1, 1]} : vector<16x102xbf16> to vector<16x80xbf16>
    %131 = vector.extract_strided_slice %128 {offsets = [0, 2], sizes = [16, 80], strides = [1, 1]} : vector<16x102xbf16> to vector<16x80xbf16>
    %132 = vector.extract_strided_slice %128 {offsets = [0, 10], sizes = [16, 80], strides = [1, 1]} : vector<16x102xbf16> to vector<16x80xbf16>
    %133 = vector.extract_strided_slice %128 {offsets = [0, 11], sizes = [16, 80], strides = [1, 1]} : vector<16x102xbf16> to vector<16x80xbf16>
    %134 = vector.extract_strided_slice %128 {offsets = [0, 12], sizes = [16, 80], strides = [1, 1]} : vector<16x102xbf16> to vector<16x80xbf16>
    %135 = vector.extract_strided_slice %128 {offsets = [0, 20], sizes = [16, 80], strides = [1, 1]} : vector<16x102xbf16> to vector<16x80xbf16>
    %136 = vector.extract_strided_slice %128 {offsets = [0, 21], sizes = [16, 80], strides = [1, 1]} : vector<16x102xbf16> to vector<16x80xbf16>
    %137 = vector.extract_strided_slice %128 {offsets = [0, 22], sizes = [16, 80], strides = [1, 1]} : vector<16x102xbf16> to vector<16x80xbf16>
    %138 = tpu.concatenate %129, %130, %131, %132, %133, %134, %135, %136, %137 in 0 : vector<16x80xbf16>, vector<16x80xbf16>, vector<16x80xbf16>, vector<16x80xbf16>, vector<16x80xbf16>, vector<16x80xbf16>, vector<16x80xbf16>, vector<16x80xbf16>, vector<16x80xbf16> -> vector<144x80xbf16>
    %c4 = arith.constant 4 : index
    %c0_33 = arith.constant 0 : index
    %c0_34 = arith.constant 0 : index
    %139 = vector.load %arg2[%c4, %c0_33, %c0_34] : memref<7x16x144xbf16, #tpu.memory_space<vmem>>, vector<1x16x144xbf16>
    %140 = vector.shape_cast %139 : vector<1x16x144xbf16> to vector<16x144xbf16>
    %cst_35 = arith.constant dense<0.000000e+00> : vector<16x80xf32>
    %141 = tpu.matmul %140, %138, %cst_35 {dimension_numbers = #tpu.dot_dimension_numbers<[1], [0], [0], [1], [0, 0, 1, 1], [], []>} : vector<16x144xbf16>, vector<144x80xbf16>, vector<16x80xf32> -> vector<16x80xf32>
    %142 = vector.extract_strided_slice %0 {offsets = [0, 8], sizes = [16, 1], strides = [1, 1]} : vector<16x14xf32> to vector<16x1xf32>
    %143 = vector.broadcast %142 : vector<16x1xf32> to vector<16x80xf32>
    %144 = arith.mulf %141, %143 : vector<16x80xf32>
    %145 = vector.extract_strided_slice %0 {offsets = [0, 9], sizes = [16, 1], strides = [1, 1]} : vector<16x14xf32> to vector<16x1xf32>
    %146 = vector.broadcast %145 : vector<16x1xf32> to vector<16x80xf32>
    %147 = arith.addf %144, %146 : vector<16x80xf32>
    %148 = arith.addf %147, %92 : vector<16x80xf32>
    %cst_36 = arith.constant 0.000000e+00 : f32
    %149 = vector.broadcast %cst_36 : f32 to vector<16x80xf32>
    %150 = arith.cmpf oge, %148, %149 : vector<16x80xf32>
    %cst_37 = arith.constant 3.000000e-01 : f32
    %151 = vector.broadcast %cst_37 : f32 to vector<16x80xf32>
    %152 = arith.mulf %151, %148 : vector<16x80xf32>
    %153 = arith.select %150, %148, %152 : vector<16x80xi1>, vector<16x80xf32>
    %154 = arith.truncf %153 : vector<16x80xf32> to vector<16x80xbf16>
    %c0_38 = arith.constant 0 : index
    %c0_39 = arith.constant 0 : index
    %155 = vector.load %arg6[%c0_38, %c0_39] : memref<80x326xbf16, #tpu.memory_space<vmem>>, vector<80x326xbf16>
    %cst_40 = arith.constant dense<0.000000e+00> : vector<16x326xf32>
    %156 = tpu.matmul %154, %155, %cst_40 {dimension_numbers = #tpu.dot_dimension_numbers<[1], [0], [0], [1], [0, 0, 1, 1], [], []>} : vector<16x80xbf16>, vector<80x326xbf16>, vector<16x326xf32> -> vector<16x326xf32>
    %157 = arith.truncf %156 : vector<16x326xf32> to vector<16x326xbf16>
    %158 = vector.extract_strided_slice %157 {offsets = [0, 0], sizes = [16, 288], strides = [1, 1]} : vector<16x326xbf16> to vector<16x288xbf16>
    %159 = vector.extract_strided_slice %157 {offsets = [0, 1], sizes = [16, 288], strides = [1, 1]} : vector<16x326xbf16> to vector<16x288xbf16>
    %160 = vector.extract_strided_slice %157 {offsets = [0, 2], sizes = [16, 288], strides = [1, 1]} : vector<16x326xbf16> to vector<16x288xbf16>
    %161 = vector.extract_strided_slice %157 {offsets = [0, 18], sizes = [16, 288], strides = [1, 1]} : vector<16x326xbf16> to vector<16x288xbf16>
    %162 = vector.extract_strided_slice %157 {offsets = [0, 19], sizes = [16, 288], strides = [1, 1]} : vector<16x326xbf16> to vector<16x288xbf16>
    %163 = vector.extract_strided_slice %157 {offsets = [0, 20], sizes = [16, 288], strides = [1, 1]} : vector<16x326xbf16> to vector<16x288xbf16>
    %164 = vector.extract_strided_slice %157 {offsets = [0, 36], sizes = [16, 288], strides = [1, 1]} : vector<16x326xbf16> to vector<16x288xbf16>
    %165 = vector.extract_strided_slice %157 {offsets = [0, 37], sizes = [16, 288], strides = [1, 1]} : vector<16x326xbf16> to vector<16x288xbf16>
    %166 = vector.extract_strided_slice %157 {offsets = [0, 38], sizes = [16, 288], strides = [1, 1]} : vector<16x326xbf16> to vector<16x288xbf16>
    %167 = tpu.concatenate %158, %159, %160, %161, %162, %163, %164, %165, %166 in 0 : vector<16x288xbf16>, vector<16x288xbf16>, vector<16x288xbf16>, vector<16x288xbf16>, vector<16x288xbf16>, vector<16x288xbf16>, vector<16x288xbf16>, vector<16x288xbf16>, vector<16x288xbf16> -> vector<144x288xbf16>
    %c5 = arith.constant 5 : index
    %c0_41 = arith.constant 0 : index
    %c0_42 = arith.constant 0 : index
    %168 = vector.load %arg2[%c5, %c0_41, %c0_42] : memref<7x16x144xbf16, #tpu.memory_space<vmem>>, vector<1x16x144xbf16>
    %169 = vector.shape_cast %168 : vector<1x16x144xbf16> to vector<16x144xbf16>
    %cst_43 = arith.constant dense<0.000000e+00> : vector<16x288xf32>
    %170 = tpu.matmul %169, %167, %cst_43 {dimension_numbers = #tpu.dot_dimension_numbers<[1], [0], [0], [1], [0, 0, 1, 1], [], []>} : vector<16x144xbf16>, vector<144x288xbf16>, vector<16x288xf32> -> vector<16x288xf32>
    %171 = vector.extract_strided_slice %0 {offsets = [0, 10], sizes = [16, 1], strides = [1, 1]} : vector<16x14xf32> to vector<16x1xf32>
    %172 = vector.broadcast %171 : vector<16x1xf32> to vector<16x288xf32>
    %173 = arith.mulf %170, %172 : vector<16x288xf32>
    %174 = vector.extract_strided_slice %0 {offsets = [0, 11], sizes = [16, 1], strides = [1, 1]} : vector<16x14xf32> to vector<16x1xf32>
    %175 = vector.broadcast %174 : vector<16x1xf32> to vector<16x288xf32>
    %176 = arith.addf %173, %175 : vector<16x288xf32>
    %cst_44 = arith.constant 0.000000e+00 : f32
    %177 = vector.broadcast %cst_44 : f32 to vector<16x288xf32>
    %178 = arith.cmpf oge, %176, %177 : vector<16x288xf32>
    %cst_45 = arith.constant 3.000000e-01 : f32
    %179 = vector.broadcast %cst_45 : f32 to vector<16x288xf32>
    %180 = arith.mulf %179, %176 : vector<16x288xf32>
    %181 = arith.select %178, %176, %180 : vector<16x288xi1>, vector<16x288xf32>
    %182 = vector.extract_strided_slice %1 {offsets = [2, 0], sizes = [1, 288], strides = [1, 1]} : vector<3x288xf32> to vector<1x288xf32>
    %183 = vector.broadcast %182 : vector<1x288xf32> to vector<16x288xf32>
    %184 = arith.mulf %181, %183 : vector<16x288xf32>
    %185 = arith.truncf %184 : vector<16x288xf32> to vector<16x288xbf16>
    %cst_46 = arith.constant 0.000000e+00 : bf16
    %186 = vector.broadcast %cst_46 : bf16 to vector<16x19xbf16>
    %187 = tpu.concatenate %186, %185, %186 in 1 : vector<16x19xbf16>, vector<16x288xbf16>, vector<16x19xbf16> -> vector<16x326xbf16>
    %188 = vector.extract_strided_slice %187 {offsets = [0, 0], sizes = [16, 288], strides = [1, 1]} : vector<16x326xbf16> to vector<16x288xbf16>
    %189 = vector.extract_strided_slice %187 {offsets = [0, 1], sizes = [16, 288], strides = [1, 1]} : vector<16x326xbf16> to vector<16x288xbf16>
    %190 = vector.extract_strided_slice %187 {offsets = [0, 2], sizes = [16, 288], strides = [1, 1]} : vector<16x326xbf16> to vector<16x288xbf16>
    %191 = vector.extract_strided_slice %187 {offsets = [0, 18], sizes = [16, 288], strides = [1, 1]} : vector<16x326xbf16> to vector<16x288xbf16>
    %192 = vector.extract_strided_slice %187 {offsets = [0, 19], sizes = [16, 288], strides = [1, 1]} : vector<16x326xbf16> to vector<16x288xbf16>
    %193 = vector.extract_strided_slice %187 {offsets = [0, 20], sizes = [16, 288], strides = [1, 1]} : vector<16x326xbf16> to vector<16x288xbf16>
    %194 = vector.extract_strided_slice %187 {offsets = [0, 36], sizes = [16, 288], strides = [1, 1]} : vector<16x326xbf16> to vector<16x288xbf16>
    %195 = vector.extract_strided_slice %187 {offsets = [0, 37], sizes = [16, 288], strides = [1, 1]} : vector<16x326xbf16> to vector<16x288xbf16>
    %196 = vector.extract_strided_slice %187 {offsets = [0, 38], sizes = [16, 288], strides = [1, 1]} : vector<16x326xbf16> to vector<16x288xbf16>
    %197 = tpu.concatenate %188, %189, %190, %191, %192, %193, %194, %195, %196 in 0 : vector<16x288xbf16>, vector<16x288xbf16>, vector<16x288xbf16>, vector<16x288xbf16>, vector<16x288xbf16>, vector<16x288xbf16>, vector<16x288xbf16>, vector<16x288xbf16>, vector<16x288xbf16> -> vector<144x288xbf16>
    %c6 = arith.constant 6 : index
    %c0_47 = arith.constant 0 : index
    %c0_48 = arith.constant 0 : index
    %198 = vector.load %arg2[%c6, %c0_47, %c0_48] : memref<7x16x144xbf16, #tpu.memory_space<vmem>>, vector<1x16x144xbf16>
    %199 = vector.shape_cast %198 : vector<1x16x144xbf16> to vector<16x144xbf16>
    %200 = vector.extract_strided_slice %199 {offsets = [0, 0], sizes = [8, 144], strides = [1, 1]} : vector<16x144xbf16> to vector<8x144xbf16>
    %cst_49 = arith.constant dense<0.000000e+00> : vector<8x288xf32>
    %201 = tpu.matmul %200, %197, %cst_49 {dimension_numbers = #tpu.dot_dimension_numbers<[1], [0], [0], [1], [0, 0, 1, 1], [], []>} : vector<8x144xbf16>, vector<144x288xbf16>, vector<8x288xf32> -> vector<8x288xf32>
    %202 = vector.extract_strided_slice %0 {offsets = [0, 12], sizes = [8, 1], strides = [1, 1]} : vector<16x14xf32> to vector<8x1xf32>
    %203 = vector.broadcast %202 : vector<8x1xf32> to vector<8x288xf32>
    %204 = arith.mulf %201, %203 : vector<8x288xf32>
    %205 = vector.extract_strided_slice %0 {offsets = [0, 13], sizes = [8, 1], strides = [1, 1]} : vector<16x14xf32> to vector<8x1xf32>
    %206 = vector.broadcast %205 : vector<8x1xf32> to vector<8x288xf32>
    %207 = arith.addf %204, %206 : vector<8x288xf32>
    %c0_50 = arith.constant 0 : index
    %c0_51 = arith.constant 0 : index
    %c0_52 = arith.constant 0 : index
    %208 = vector.load %arg7[%c0_50, %c0_51, %c0_52] : memref<2x8x288xf32, #tpu.memory_space<vmem>>, vector<1x8x288xf32>
    %209 = vector.shape_cast %208 : vector<1x8x288xf32> to vector<8x288xf32>
    %210 = vector.shape_cast %207 : vector<8x288xf32> to vector<1x8x288xf32>
    tpu.vector_store %arg7[%c0_50, %c0_51, %c0_52], %210 {strides = array<i32>} : memref<2x8x288xf32, #tpu.memory_space<vmem>>, vector<1x8x288xf32>,
    %c1_53 = arith.constant 1 : index
    %c0_54 = arith.constant 0 : index
    %c0_55 = arith.constant 0 : index
    %211 = vector.load %arg1[%c1_53, %c0_54, %c0_55] : memref<2x16x24xf32, #tpu.memory_space<vmem>>, vector<1x16x24xf32>
    %212 = vector.shape_cast %211 : vector<1x16x24xf32> to vector<16x24xf32>
    %213 = vector.extract_strided_slice %1 {offsets = [0, 0], sizes = [1, 24], strides = [1, 1]} : vector<3x288xf32> to vector<1x24xf32>
    %214 = vector.broadcast %213 : vector<1x24xf32> to vector<16x24xf32>
    %215 = arith.mulf %212, %214 : vector<16x24xf32>
    %216 = arith.truncf %215 : vector<16x24xf32> to vector<16x24xbf16>
    %cst_56 = arith.constant 0.000000e+00 : bf16
    %217 = vector.broadcast %cst_56 : bf16 to vector<16x7xbf16>
    %218 = tpu.concatenate %217, %216, %217 in 1 : vector<16x7xbf16>, vector<16x24xbf16>, vector<16x7xbf16> -> vector<16x38xbf16>
    %219 = vector.extract_strided_slice %218 {offsets = [0, 0], sizes = [16, 24], strides = [1, 1]} : vector<16x38xbf16> to vector<16x24xbf16>
    %220 = vector.extract_strided_slice %218 {offsets = [0, 1], sizes = [16, 24], strides = [1, 1]} : vector<16x38xbf16> to vector<16x24xbf16>
    %221 = vector.extract_strided_slice %218 {offsets = [0, 2], sizes = [16, 24], strides = [1, 1]} : vector<16x38xbf16> to vector<16x24xbf16>
    %222 = vector.extract_strided_slice %218 {offsets = [0, 6], sizes = [16, 24], strides = [1, 1]} : vector<16x38xbf16> to vector<16x24xbf16>
    %223 = vector.extract_strided_slice %218 {offsets = [0, 7], sizes = [16, 24], strides = [1, 1]} : vector<16x38xbf16> to vector<16x24xbf16>
    %224 = vector.extract_strided_slice %218 {offsets = [0, 8], sizes = [16, 24], strides = [1, 1]} : vector<16x38xbf16> to vector<16x24xbf16>
    %225 = vector.extract_strided_slice %218 {offsets = [0, 12], sizes = [16, 24], strides = [1, 1]} : vector<16x38xbf16> to vector<16x24xbf16>
    %226 = vector.extract_strided_slice %218 {offsets = [0, 13], sizes = [16, 24], strides = [1, 1]} : vector<16x38xbf16> to vector<16x24xbf16>
    %227 = vector.extract_strided_slice %218 {offsets = [0, 14], sizes = [16, 24], strides = [1, 1]} : vector<16x38xbf16> to vector<16x24xbf16>
    %228 = tpu.concatenate %219, %220, %221, %222, %223, %224, %225, %226, %227 in 0 : vector<16x24xbf16>, vector<16x24xbf16>, vector<16x24xbf16>, vector<16x24xbf16>, vector<16x24xbf16>, vector<16x24xbf16>, vector<16x24xbf16>, vector<16x24xbf16>, vector<16x24xbf16> -> vector<144x24xbf16>
    %c0_57 = arith.constant 0 : index
    %c0_58 = arith.constant 0 : index
    %c0_59 = arith.constant 0 : index
    %229 = vector.load %arg2[%c0_57, %c0_58, %c0_59] : memref<7x16x144xbf16, #tpu.memory_space<vmem>>, vector<1x16x144xbf16>
    %230 = vector.shape_cast %229 : vector<1x16x144xbf16> to vector<16x144xbf16>
    %cst_60 = arith.constant dense<0.000000e+00> : vector<16x24xf32>
    %231 = tpu.matmul %230, %228, %cst_60 {dimension_numbers = #tpu.dot_dimension_numbers<[1], [0], [0], [1], [0, 0, 1, 1], [], []>} : vector<16x144xbf16>, vector<144x24xbf16>, vector<16x24xf32> -> vector<16x24xf32>
    %232 = vector.extract_strided_slice %0 {offsets = [0, 0], sizes = [16, 1], strides = [1, 1]} : vector<16x14xf32> to vector<16x1xf32>
    %233 = vector.broadcast %232 : vector<16x1xf32> to vector<16x24xf32>
    %234 = arith.mulf %231, %233 : vector<16x24xf32>
    %235 = vector.extract_strided_slice %0 {offsets = [0, 1], sizes = [16, 1], strides = [1, 1]} : vector<16x14xf32> to vector<16x1xf32>
    %236 = vector.broadcast %235 : vector<16x1xf32> to vector<16x24xf32>
    %237 = arith.addf %234, %236 : vector<16x24xf32>
    %cst_61 = arith.constant 0.000000e+00 : f32
    %238 = vector.broadcast %cst_61 : f32 to vector<16x24xf32>
    %239 = arith.cmpf oge, %237, %238 : vector<16x24xf32>
    %cst_62 = arith.constant 3.000000e-01 : f32
    %240 = vector.broadcast %cst_62 : f32 to vector<16x24xf32>
    %241 = arith.mulf %240, %237 : vector<16x24xf32>
    %242 = arith.select %239, %237, %241 : vector<16x24xi1>, vector<16x24xf32>
    %243 = vector.extract_strided_slice %1 {offsets = [0, 0], sizes = [1, 24], strides = [1, 1]} : vector<3x288xf32> to vector<1x24xf32>
    %244 = vector.broadcast %243 : vector<1x24xf32> to vector<16x24xf32>
    %245 = arith.mulf %242, %244 : vector<16x24xf32>
    %246 = arith.truncf %245 : vector<16x24xf32> to vector<16x24xbf16>
    %cst_63 = arith.constant 0.000000e+00 : bf16
    %247 = vector.broadcast %cst_63 : bf16 to vector<16x7xbf16>
    %248 = tpu.concatenate %247, %246, %247 in 1 : vector<16x7xbf16>, vector<16x24xbf16>, vector<16x7xbf16> -> vector<16x38xbf16>
    %249 = vector.extract_strided_slice %248 {offsets = [0, 0], sizes = [16, 24], strides = [1, 1]} : vector<16x38xbf16> to vector<16x24xbf16>
    %250 = vector.extract_strided_slice %248 {offsets = [0, 1], sizes = [16, 24], strides = [1, 1]} : vector<16x38xbf16> to vector<16x24xbf16>
    %251 = vector.extract_strided_slice %248 {offsets = [0, 2], sizes = [16, 24], strides = [1, 1]} : vector<16x38xbf16> to vector<16x24xbf16>
    %252 = vector.extract_strided_slice %248 {offsets = [0, 6], sizes = [16, 24], strides = [1, 1]} : vector<16x38xbf16> to vector<16x24xbf16>
    %253 = vector.extract_strided_slice %248 {offsets = [0, 7], sizes = [16, 24], strides = [1, 1]} : vector<16x38xbf16> to vector<16x24xbf16>
    %254 = vector.extract_strided_slice %248 {offsets = [0, 8], sizes = [16, 24], strides = [1, 1]} : vector<16x38xbf16> to vector<16x24xbf16>
    %255 = vector.extract_strided_slice %248 {offsets = [0, 12], sizes = [16, 24], strides = [1, 1]} : vector<16x38xbf16> to vector<16x24xbf16>
    %256 = vector.extract_strided_slice %248 {offsets = [0, 13], sizes = [16, 24], strides = [1, 1]} : vector<16x38xbf16> to vector<16x24xbf16>
    %257 = vector.extract_strided_slice %248 {offsets = [0, 14], sizes = [16, 24], strides = [1, 1]} : vector<16x38xbf16> to vector<16x24xbf16>
    %258 = tpu.concatenate %249, %250, %251, %252, %253, %254, %255, %256, %257 in 0 : vector<16x24xbf16>, vector<16x24xbf16>, vector<16x24xbf16>, vector<16x24xbf16>, vector<16x24xbf16>, vector<16x24xbf16>, vector<16x24xbf16>, vector<16x24xbf16>, vector<16x24xbf16> -> vector<144x24xbf16>
    %c1_64 = arith.constant 1 : index
    %c0_65 = arith.constant 0 : index
    %c0_66 = arith.constant 0 : index
    %259 = vector.load %arg2[%c1_64, %c0_65, %c0_66] : memref<7x16x144xbf16, #tpu.memory_space<vmem>>, vector<1x16x144xbf16>
    %260 = vector.shape_cast %259 : vector<1x16x144xbf16> to vector<16x144xbf16>
    %cst_67 = arith.constant dense<0.000000e+00> : vector<16x24xf32>
    %261 = tpu.matmul %260, %258, %cst_67 {dimension_numbers = #tpu.dot_dimension_numbers<[1], [0], [0], [1], [0, 0, 1, 1], [], []>} : vector<16x144xbf16>, vector<144x24xbf16>, vector<16x24xf32> -> vector<16x24xf32>
    %262 = vector.extract_strided_slice %0 {offsets = [0, 2], sizes = [16, 1], strides = [1, 1]} : vector<16x14xf32> to vector<16x1xf32>
    %263 = vector.broadcast %262 : vector<16x1xf32> to vector<16x24xf32>
    %264 = arith.mulf %261, %263 : vector<16x24xf32>
    %265 = vector.extract_strided_slice %0 {offsets = [0, 3], sizes = [16, 1], strides = [1, 1]} : vector<16x14xf32> to vector<16x1xf32>
    %266 = vector.broadcast %265 : vector<16x1xf32> to vector<16x24xf32>
    %267 = arith.addf %264, %266 : vector<16x24xf32>
    %268 = arith.addf %267, %212 : vector<16x24xf32>
    %cst_68 = arith.constant 0.000000e+00 : f32
    %269 = vector.broadcast %cst_68 : f32 to vector<16x24xf32>
    %270 = arith.cmpf oge, %268, %269 : vector<16x24xf32>
    %cst_69 = arith.constant 3.000000e-01 : f32
    %271 = vector.broadcast %cst_69 : f32 to vector<16x24xf32>
    %272 = arith.mulf %271, %268 : vector<16x24xf32>
    %273 = arith.select %270, %268, %272 : vector<16x24xi1>, vector<16x24xf32>
    %274 = arith.truncf %273 : vector<16x24xf32> to vector<16x24xbf16>
    %c0_70 = arith.constant 0 : index
    %c0_71 = arith.constant 0 : index
    %275 = vector.load %arg5[%c0_70, %c0_71] : memref<24x102xbf16, #tpu.memory_space<vmem>>, vector<24x102xbf16>
    %cst_72 = arith.constant dense<0.000000e+00> : vector<16x102xf32>
    %276 = tpu.matmul %274, %275, %cst_72 {dimension_numbers = #tpu.dot_dimension_numbers<[1], [0], [0], [1], [0, 0, 1, 1], [], []>} : vector<16x24xbf16>, vector<24x102xbf16>, vector<16x102xf32> -> vector<16x102xf32>
    %277 = arith.truncf %276 : vector<16x102xf32> to vector<16x102xbf16>
    %278 = vector.extract_strided_slice %277 {offsets = [0, 0], sizes = [16, 80], strides = [1, 1]} : vector<16x102xbf16> to vector<16x80xbf16>
    %279 = vector.extract_strided_slice %277 {offsets = [0, 1], sizes = [16, 80], strides = [1, 1]} : vector<16x102xbf16> to vector<16x80xbf16>
    %280 = vector.extract_strided_slice %277 {offsets = [0, 2], sizes = [16, 80], strides = [1, 1]} : vector<16x102xbf16> to vector<16x80xbf16>
    %281 = vector.extract_strided_slice %277 {offsets = [0, 10], sizes = [16, 80], strides = [1, 1]} : vector<16x102xbf16> to vector<16x80xbf16>
    %282 = vector.extract_strided_slice %277 {offsets = [0, 11], sizes = [16, 80], strides = [1, 1]} : vector<16x102xbf16> to vector<16x80xbf16>
    %283 = vector.extract_strided_slice %277 {offsets = [0, 12], sizes = [16, 80], strides = [1, 1]} : vector<16x102xbf16> to vector<16x80xbf16>
    %284 = vector.extract_strided_slice %277 {offsets = [0, 20], sizes = [16, 80], strides = [1, 1]} : vector<16x102xbf16> to vector<16x80xbf16>
    %285 = vector.extract_strided_slice %277 {offsets = [0, 21], sizes = [16, 80], strides = [1, 1]} : vector<16x102xbf16> to vector<16x80xbf16>
    %286 = vector.extract_strided_slice %277 {offsets = [0, 22], sizes = [16, 80], strides = [1, 1]} : vector<16x102xbf16> to vector<16x80xbf16>
    %287 = tpu.concatenate %278, %279, %280, %281, %282, %283, %284, %285, %286 in 0 : vector<16x80xbf16>, vector<16x80xbf16>, vector<16x80xbf16>, vector<16x80xbf16>, vector<16x80xbf16>, vector<16x80xbf16>, vector<16x80xbf16>, vector<16x80xbf16>, vector<16x80xbf16> -> vector<144x80xbf16>
    %c2_73 = arith.constant 2 : index
    %c0_74 = arith.constant 0 : index
    %c0_75 = arith.constant 0 : index
    %288 = vector.load %arg2[%c2_73, %c0_74, %c0_75] : memref<7x16x144xbf16, #tpu.memory_space<vmem>>, vector<1x16x144xbf16>
    %289 = vector.shape_cast %288 : vector<1x16x144xbf16> to vector<16x144xbf16>
    %cst_76 = arith.constant dense<0.000000e+00> : vector<16x80xf32>
    %290 = tpu.matmul %289, %287, %cst_76 {dimension_numbers = #tpu.dot_dimension_numbers<[1], [0], [0], [1], [0, 0, 1, 1], [], []>} : vector<16x144xbf16>, vector<144x80xbf16>, vector<16x80xf32> -> vector<16x80xf32>
    %291 = vector.extract_strided_slice %0 {offsets = [0, 4], sizes = [16, 1], strides = [1, 1]} : vector<16x14xf32> to vector<16x1xf32>
    %292 = vector.broadcast %291 : vector<16x1xf32> to vector<16x80xf32>
    %293 = arith.mulf %290, %292 : vector<16x80xf32>
    %294 = vector.extract_strided_slice %0 {offsets = [0, 5], sizes = [16, 1], strides = [1, 1]} : vector<16x14xf32> to vector<16x1xf32>
    %295 = vector.broadcast %294 : vector<16x1xf32> to vector<16x80xf32>
    %296 = arith.addf %293, %295 : vector<16x80xf32>
    %cst_77 = arith.constant 0.000000e+00 : f32
    %297 = vector.broadcast %cst_77 : f32 to vector<16x80xf32>
    %298 = arith.cmpf oge, %296, %297 : vector<16x80xf32>
    %cst_78 = arith.constant 3.000000e-01 : f32
    %299 = vector.broadcast %cst_78 : f32 to vector<16x80xf32>
    %300 = arith.mulf %299, %296 : vector<16x80xf32>
    %301 = arith.select %298, %296, %300 : vector<16x80xi1>, vector<16x80xf32>
    %302 = vector.extract_strided_slice %1 {offsets = [1, 0], sizes = [1, 80], strides = [1, 1]} : vector<3x288xf32> to vector<1x80xf32>
    %303 = vector.broadcast %302 : vector<1x80xf32> to vector<16x80xf32>
    %304 = arith.mulf %301, %303 : vector<16x80xf32>
    %305 = arith.truncf %304 : vector<16x80xf32> to vector<16x80xbf16>
    %cst_79 = arith.constant 0.000000e+00 : bf16
    %306 = vector.broadcast %cst_79 : bf16 to vector<16x11xbf16>
    %307 = tpu.concatenate %306, %305, %306 in 1 : vector<16x11xbf16>, vector<16x80xbf16>, vector<16x11xbf16> -> vector<16x102xbf16>
    %308 = vector.extract_strided_slice %307 {offsets = [0, 0], sizes = [16, 80], strides = [1, 1]} : vector<16x102xbf16> to vector<16x80xbf16>
    %309 = vector.extract_strided_slice %307 {offsets = [0, 1], sizes = [16, 80], strides = [1, 1]} : vector<16x102xbf16> to vector<16x80xbf16>
    %310 = vector.extract_strided_slice %307 {offsets = [0, 2], sizes = [16, 80], strides = [1, 1]} : vector<16x102xbf16> to vector<16x80xbf16>
    %311 = vector.extract_strided_slice %307 {offsets = [0, 10], sizes = [16, 80], strides = [1, 1]} : vector<16x102xbf16> to vector<16x80xbf16>
    %312 = vector.extract_strided_slice %307 {offsets = [0, 11], sizes = [16, 80], strides = [1, 1]} : vector<16x102xbf16> to vector<16x80xbf16>
    %313 = vector.extract_strided_slice %307 {offsets = [0, 12], sizes = [16, 80], strides = [1, 1]} : vector<16x102xbf16> to vector<16x80xbf16>
    %314 = vector.extract_strided_slice %307 {offsets = [0, 20], sizes = [16, 80], strides = [1, 1]} : vector<16x102xbf16> to vector<16x80xbf16>
    %315 = vector.extract_strided_slice %307 {offsets = [0, 21], sizes = [16, 80], strides = [1, 1]} : vector<16x102xbf16> to vector<16x80xbf16>
    %316 = vector.extract_strided_slice %307 {offsets = [0, 22], sizes = [16, 80], strides = [1, 1]} : vector<16x102xbf16> to vector<16x80xbf16>
    %317 = tpu.concatenate %308, %309, %310, %311, %312, %313, %314, %315, %316 in 0 : vector<16x80xbf16>, vector<16x80xbf16>, vector<16x80xbf16>, vector<16x80xbf16>, vector<16x80xbf16>, vector<16x80xbf16>, vector<16x80xbf16>, vector<16x80xbf16>, vector<16x80xbf16> -> vector<144x80xbf16>
    %c3_80 = arith.constant 3 : index
    %c0_81 = arith.constant 0 : index
    %c0_82 = arith.constant 0 : index
    %318 = vector.load %arg2[%c3_80, %c0_81, %c0_82] : memref<7x16x144xbf16, #tpu.memory_space<vmem>>, vector<1x16x144xbf16>
    %319 = vector.shape_cast %318 : vector<1x16x144xbf16> to vector<16x144xbf16>
    %cst_83 = arith.constant dense<0.000000e+00> : vector<16x80xf32>
    %320 = tpu.matmul %319, %317, %cst_83 {dimension_numbers = #tpu.dot_dimension_numbers<[1], [0], [0], [1], [0, 0, 1, 1], [], []>} : vector<16x144xbf16>, vector<144x80xbf16>, vector<16x80xf32> -> vector<16x80xf32>
    %321 = vector.extract_strided_slice %0 {offsets = [0, 6], sizes = [16, 1], strides = [1, 1]} : vector<16x14xf32> to vector<16x1xf32>
    %322 = vector.broadcast %321 : vector<16x1xf32> to vector<16x80xf32>
    %323 = arith.mulf %320, %322 : vector<16x80xf32>
    %324 = vector.extract_strided_slice %0 {offsets = [0, 7], sizes = [16, 1], strides = [1, 1]} : vector<16x14xf32> to vector<16x1xf32>
    %325 = vector.broadcast %324 : vector<16x1xf32> to vector<16x80xf32>
    %326 = arith.addf %323, %325 : vector<16x80xf32>
    %cst_84 = arith.constant 0.000000e+00 : f32
    %327 = vector.broadcast %cst_84 : f32 to vector<16x80xf32>
    %328 = arith.cmpf oge, %326, %327 : vector<16x80xf32>
    %cst_85 = arith.constant 3.000000e-01 : f32
    %329 = vector.broadcast %cst_85 : f32 to vector<16x80xf32>
    %330 = arith.mulf %329, %326 : vector<16x80xf32>
    %331 = arith.select %328, %326, %330 : vector<16x80xi1>, vector<16x80xf32>
    %332 = vector.extract_strided_slice %1 {offsets = [1, 0], sizes = [1, 80], strides = [1, 1]} : vector<3x288xf32> to vector<1x80xf32>
    %333 = vector.broadcast %332 : vector<1x80xf32> to vector<16x80xf32>
    %334 = arith.mulf %331, %333 : vector<16x80xf32>
    %335 = arith.truncf %334 : vector<16x80xf32> to vector<16x80xbf16>
    %cst_86 = arith.constant 0.000000e+00 : bf16
    %336 = vector.broadcast %cst_86 : bf16 to vector<16x11xbf16>
    %337 = tpu.concatenate %336, %335, %336 in 1 : vector<16x11xbf16>, vector<16x80xbf16>, vector<16x11xbf16> -> vector<16x102xbf16>
    %338 = vector.extract_strided_slice %337 {offsets = [0, 0], sizes = [16, 80], strides = [1, 1]} : vector<16x102xbf16> to vector<16x80xbf16>
    %339 = vector.extract_strided_slice %337 {offsets = [0, 1], sizes = [16, 80], strides = [1, 1]} : vector<16x102xbf16> to vector<16x80xbf16>
    %340 = vector.extract_strided_slice %337 {offsets = [0, 2], sizes = [16, 80], strides = [1, 1]} : vector<16x102xbf16> to vector<16x80xbf16>
    %341 = vector.extract_strided_slice %337 {offsets = [0, 10], sizes = [16, 80], strides = [1, 1]} : vector<16x102xbf16> to vector<16x80xbf16>
    %342 = vector.extract_strided_slice %337 {offsets = [0, 11], sizes = [16, 80], strides = [1, 1]} : vector<16x102xbf16> to vector<16x80xbf16>
    %343 = vector.extract_strided_slice %337 {offsets = [0, 12], sizes = [16, 80], strides = [1, 1]} : vector<16x102xbf16> to vector<16x80xbf16>
    %344 = vector.extract_strided_slice %337 {offsets = [0, 20], sizes = [16, 80], strides = [1, 1]} : vector<16x102xbf16> to vector<16x80xbf16>
    %345 = vector.extract_strided_slice %337 {offsets = [0, 21], sizes = [16, 80], strides = [1, 1]} : vector<16x102xbf16> to vector<16x80xbf16>
    %346 = vector.extract_strided_slice %337 {offsets = [0, 22], sizes = [16, 80], strides = [1, 1]} : vector<16x102xbf16> to vector<16x80xbf16>
    %347 = tpu.concatenate %338, %339, %340, %341, %342, %343, %344, %345, %346 in 0 : vector<16x80xbf16>, vector<16x80xbf16>, vector<16x80xbf16>, vector<16x80xbf16>, vector<16x80xbf16>, vector<16x80xbf16>, vector<16x80xbf16>, vector<16x80xbf16>, vector<16x80xbf16> -> vector<144x80xbf16>
    %c4_87 = arith.constant 4 : index
    %c0_88 = arith.constant 0 : index
    %c0_89 = arith.constant 0 : index
    %348 = vector.load %arg2[%c4_87, %c0_88, %c0_89] : memref<7x16x144xbf16, #tpu.memory_space<vmem>>, vector<1x16x144xbf16>
    %349 = vector.shape_cast %348 : vector<1x16x144xbf16> to vector<16x144xbf16>
    %cst_90 = arith.constant dense<0.000000e+00> : vector<16x80xf32>
    %350 = tpu.matmul %349, %347, %cst_90 {dimension_numbers = #tpu.dot_dimension_numbers<[1], [0], [0], [1], [0, 0, 1, 1], [], []>} : vector<16x144xbf16>, vector<144x80xbf16>, vector<16x80xf32> -> vector<16x80xf32>
    %351 = vector.extract_strided_slice %0 {offsets = [0, 8], sizes = [16, 1], strides = [1, 1]} : vector<16x14xf32> to vector<16x1xf32>
    %352 = vector.broadcast %351 : vector<16x1xf32> to vector<16x80xf32>
    %353 = arith.mulf %350, %352 : vector<16x80xf32>
    %354 = vector.extract_strided_slice %0 {offsets = [0, 9], sizes = [16, 1], strides = [1, 1]} : vector<16x14xf32> to vector<16x1xf32>
    %355 = vector.broadcast %354 : vector<16x1xf32> to vector<16x80xf32>
    %356 = arith.addf %353, %355 : vector<16x80xf32>
    %357 = arith.addf %356, %301 : vector<16x80xf32>
    %cst_91 = arith.constant 0.000000e+00 : f32
    %358 = vector.broadcast %cst_91 : f32 to vector<16x80xf32>
    %359 = arith.cmpf oge, %357, %358 : vector<16x80xf32>
    %cst_92 = arith.constant 3.000000e-01 : f32
    %360 = vector.broadcast %cst_92 : f32 to vector<16x80xf32>
    %361 = arith.mulf %360, %357 : vector<16x80xf32>
    %362 = arith.select %359, %357, %361 : vector<16x80xi1>, vector<16x80xf32>
    %363 = arith.truncf %362 : vector<16x80xf32> to vector<16x80xbf16>
    %c0_93 = arith.constant 0 : index
    %c0_94 = arith.constant 0 : index
    %364 = vector.load %arg6[%c0_93, %c0_94] : memref<80x326xbf16, #tpu.memory_space<vmem>>, vector<80x326xbf16>
    %cst_95 = arith.constant dense<0.000000e+00> : vector<16x326xf32>
    %365 = tpu.matmul %363, %364, %cst_95 {dimension_numbers = #tpu.dot_dimension_numbers<[1], [0], [0], [1], [0, 0, 1, 1], [], []>} : vector<16x80xbf16>, vector<80x326xbf16>, vector<16x326xf32> -> vector<16x326xf32>
    %366 = arith.truncf %365 : vector<16x326xf32> to vector<16x326xbf16>
    %367 = vector.extract_strided_slice %366 {offsets = [0, 0], sizes = [16, 288], strides = [1, 1]} : vector<16x326xbf16> to vector<16x288xbf16>
    %368 = vector.extract_strided_slice %366 {offsets = [0, 1], sizes = [16, 288], strides = [1, 1]} : vector<16x326xbf16> to vector<16x288xbf16>
    %369 = vector.extract_strided_slice %366 {offsets = [0, 2], sizes = [16, 288], strides = [1, 1]} : vector<16x326xbf16> to vector<16x288xbf16>
    %370 = vector.extract_strided_slice %366 {offsets = [0, 18], sizes = [16, 288], strides = [1, 1]} : vector<16x326xbf16> to vector<16x288xbf16>
    %371 = vector.extract_strided_slice %366 {offsets = [0, 19], sizes = [16, 288], strides = [1, 1]} : vector<16x326xbf16> to vector<16x288xbf16>
    %372 = vector.extract_strided_slice %366 {offsets = [0, 20], sizes = [16, 288], strides = [1, 1]} : vector<16x326xbf16> to vector<16x288xbf16>
    %373 = vector.extract_strided_slice %366 {offsets = [0, 36], sizes = [16, 288], strides = [1, 1]} : vector<16x326xbf16> to vector<16x288xbf16>
    %374 = vector.extract_strided_slice %366 {offsets = [0, 37], sizes = [16, 288], strides = [1, 1]} : vector<16x326xbf16> to vector<16x288xbf16>
    %375 = vector.extract_strided_slice %366 {offsets = [0, 38], sizes = [16, 288], strides = [1, 1]} : vector<16x326xbf16> to vector<16x288xbf16>
    %376 = tpu.concatenate %367, %368, %369, %370, %371, %372, %373, %374, %375 in 0 : vector<16x288xbf16>, vector<16x288xbf16>, vector<16x288xbf16>, vector<16x288xbf16>, vector<16x288xbf16>, vector<16x288xbf16>, vector<16x288xbf16>, vector<16x288xbf16>, vector<16x288xbf16> -> vector<144x288xbf16>
    %c5_96 = arith.constant 5 : index
    %c0_97 = arith.constant 0 : index
    %c0_98 = arith.constant 0 : index
    %377 = vector.load %arg2[%c5_96, %c0_97, %c0_98] : memref<7x16x144xbf16, #tpu.memory_space<vmem>>, vector<1x16x144xbf16>
    %378 = vector.shape_cast %377 : vector<1x16x144xbf16> to vector<16x144xbf16>
    %cst_99 = arith.constant dense<0.000000e+00> : vector<16x288xf32>
    %379 = tpu.matmul %378, %376, %cst_99 {dimension_numbers = #tpu.dot_dimension_numbers<[1], [0], [0], [1], [0, 0, 1, 1], [], []>} : vector<16x144xbf16>, vector<144x288xbf16>, vector<16x288xf32> -> vector<16x288xf32>
    %380 = vector.extract_strided_slice %0 {offsets = [0, 10], sizes = [16, 1], strides = [1, 1]} : vector<16x14xf32> to vector<16x1xf32>
    %381 = vector.broadcast %380 : vector<16x1xf32> to vector<16x288xf32>
    %382 = arith.mulf %379, %381 : vector<16x288xf32>
    %383 = vector.extract_strided_slice %0 {offsets = [0, 11], sizes = [16, 1], strides = [1, 1]} : vector<16x14xf32> to vector<16x1xf32>
    %384 = vector.broadcast %383 : vector<16x1xf32> to vector<16x288xf32>
    %385 = arith.addf %382, %384 : vector<16x288xf32>
    %cst_100 = arith.constant 0.000000e+00 : f32
    %386 = vector.broadcast %cst_100 : f32 to vector<16x288xf32>
    %387 = arith.cmpf oge, %385, %386 : vector<16x288xf32>
    %cst_101 = arith.constant 3.000000e-01 : f32
    %388 = vector.broadcast %cst_101 : f32 to vector<16x288xf32>
    %389 = arith.mulf %388, %385 : vector<16x288xf32>
    %390 = arith.select %387, %385, %389 : vector<16x288xi1>, vector<16x288xf32>
    %391 = vector.extract_strided_slice %1 {offsets = [2, 0], sizes = [1, 288], strides = [1, 1]} : vector<3x288xf32> to vector<1x288xf32>
    %392 = vector.broadcast %391 : vector<1x288xf32> to vector<16x288xf32>
    %393 = arith.mulf %390, %392 : vector<16x288xf32>
    %394 = arith.truncf %393 : vector<16x288xf32> to vector<16x288xbf16>
    %cst_102 = arith.constant 0.000000e+00 : bf16
    %395 = vector.broadcast %cst_102 : bf16 to vector<16x19xbf16>
    %396 = tpu.concatenate %395, %394, %395 in 1 : vector<16x19xbf16>, vector<16x288xbf16>, vector<16x19xbf16> -> vector<16x326xbf16>
    %397 = vector.extract_strided_slice %396 {offsets = [0, 0], sizes = [16, 288], strides = [1, 1]} : vector<16x326xbf16> to vector<16x288xbf16>
    %398 = vector.extract_strided_slice %396 {offsets = [0, 1], sizes = [16, 288], strides = [1, 1]} : vector<16x326xbf16> to vector<16x288xbf16>
    %399 = vector.extract_strided_slice %396 {offsets = [0, 2], sizes = [16, 288], strides = [1, 1]} : vector<16x326xbf16> to vector<16x288xbf16>
    %400 = vector.extract_strided_slice %396 {offsets = [0, 18], sizes = [16, 288], strides = [1, 1]} : vector<16x326xbf16> to vector<16x288xbf16>
    %401 = vector.extract_strided_slice %396 {offsets = [0, 19], sizes = [16, 288], strides = [1, 1]} : vector<16x326xbf16> to vector<16x288xbf16>
    %402 = vector.extract_strided_slice %396 {offsets = [0, 20], sizes = [16, 288], strides = [1, 1]} : vector<16x326xbf16> to vector<16x288xbf16>
    %403 = vector.extract_strided_slice %396 {offsets = [0, 36], sizes = [16, 288], strides = [1, 1]} : vector<16x326xbf16> to vector<16x288xbf16>
    %404 = vector.extract_strided_slice %396 {offsets = [0, 37], sizes = [16, 288], strides = [1, 1]} : vector<16x326xbf16> to vector<16x288xbf16>
    %405 = vector.extract_strided_slice %396 {offsets = [0, 38], sizes = [16, 288], strides = [1, 1]} : vector<16x326xbf16> to vector<16x288xbf16>
    %406 = tpu.concatenate %397, %398, %399, %400, %401, %402, %403, %404, %405 in 0 : vector<16x288xbf16>, vector<16x288xbf16>, vector<16x288xbf16>, vector<16x288xbf16>, vector<16x288xbf16>, vector<16x288xbf16>, vector<16x288xbf16>, vector<16x288xbf16>, vector<16x288xbf16> -> vector<144x288xbf16>
    %c6_103 = arith.constant 6 : index
    %c0_104 = arith.constant 0 : index
    %c0_105 = arith.constant 0 : index
    %407 = vector.load %arg2[%c6_103, %c0_104, %c0_105] : memref<7x16x144xbf16, #tpu.memory_space<vmem>>, vector<1x16x144xbf16>
    %408 = vector.shape_cast %407 : vector<1x16x144xbf16> to vector<16x144xbf16>
    %409 = vector.extract_strided_slice %408 {offsets = [0, 0], sizes = [8, 144], strides = [1, 1]} : vector<16x144xbf16> to vector<8x144xbf16>
    %cst_106 = arith.constant dense<0.000000e+00> : vector<8x288xf32>
    %410 = tpu.matmul %409, %406, %cst_106 {dimension_numbers = #tpu.dot_dimension_numbers<[1], [0], [0], [1], [0, 0, 1, 1], [], []>} : vector<8x144xbf16>, vector<144x288xbf16>, vector<8x288xf32> -> vector<8x288xf32>
    %411 = vector.extract_strided_slice %0 {offsets = [0, 12], sizes = [8, 1], strides = [1, 1]} : vector<16x14xf32> to vector<8x1xf32>
    %412 = vector.broadcast %411 : vector<8x1xf32> to vector<8x288xf32>
    %413 = arith.mulf %410, %412 : vector<8x288xf32>
    %414 = vector.extract_strided_slice %0 {offsets = [0, 13], sizes = [8, 1], strides = [1, 1]} : vector<16x14xf32> to vector<8x1xf32>
    %415 = vector.broadcast %414 : vector<8x1xf32> to vector<8x288xf32>
    %416 = arith.addf %413, %415 : vector<8x288xf32>
    %c1_107 = arith.constant 1 : index
    %c0_108 = arith.constant 0 : index
    %c0_109 = arith.constant 0 : index
    %417 = vector.load %arg7[%c1_107, %c0_108, %c0_109] : memref<2x8x288xf32, #tpu.memory_space<vmem>>, vector<1x8x288xf32>
    %418 = vector.shape_cast %417 : vector<1x8x288xf32> to vector<8x288xf32>
    %419 = vector.shape_cast %416 : vector<8x288xf32> to vector<1x8x288xf32>
    tpu.vector_store %arg7[%c1_107, %c0_108, %c0_109], %419 {strides = array<i32>} : memref<2x8x288xf32, #tpu.memory_space<vmem>>, vector<1x8x288xf32>,
    return
  }
  func.func @transform_0(%arg0: i32) -> (i32, i32, i32) {
    %c0_i32 = arith.constant 0 : i32
    %c0_i32_0 = arith.constant 0 : i32
    %c0_i32_1 = arith.constant 0 : i32
    return %arg0, %c0_i32, %c0_i32_0 : i32, i32, i32
  }
  func.func @transform_1(%arg0: i32) -> (i32, i32, i32) {
    %c0_i32 = arith.constant 0 : i32
    %c0_i32_0 = arith.constant 0 : i32
    %c0_i32_1 = arith.constant 0 : i32
    %c0_i32_2 = arith.constant 0 : i32
    return %c0_i32, %c0_i32_0, %c0_i32_1 : i32, i32, i32
  }
  func.func @transform_2(%arg0: i32) -> (i32, i32) {
    %c0_i32 = arith.constant 0 : i32
    %c0_i32_0 = arith.constant 0 : i32
    %c0_i32_1 = arith.constant 0 : i32
    return %c0_i32, %c0_i32_0 : i32, i32
  }
  func.func @transform_3(%arg0: i32) -> (i32, i32) {
    %c0_i32 = arith.constant 0 : i32
    %c0_i32_0 = arith.constant 0 : i32
    %c0_i32_1 = arith.constant 0 : i32
    return %c0_i32, %c0_i32_0 : i32, i32
  }
  func.func @transform_4(%arg0: i32) -> (i32, i32) {
    %c0_i32 = arith.constant 0 : i32
    %c0_i32_0 = arith.constant 0 : i32
    %c0_i32_1 = arith.constant 0 : i32
    return %c0_i32, %c0_i32_0 : i32, i32
  }
  func.func @transform_5(%arg0: i32) -> (i32, i32) {
    %c0_i32 = arith.constant 0 : i32
    %c0_i32_0 = arith.constant 0 : i32
    %c0_i32_1 = arith.constant 0 : i32
    return %c0_i32, %c0_i32_0 : i32, i32
  }
  func.func @transform_6(%arg0: i32) -> (i32, i32, i32) {
    %c0_i32 = arith.constant 0 : i32
    %c0_i32_0 = arith.constant 0 : i32
    %c0_i32_1 = arith.constant 0 : i32
    return %arg0, %c0_i32, %c0_i32_0 : i32, i32, i32
  }
}

</mosaic_0001>

<bundles_post_ra>
// kernel: forward.1
= control target key start
LH: loop header
LB: loop body
LE: loop exit
PB: predicated region body
PF: predicated region fallthrough
CT: control target
= control target key end

     0   :  { %v30_v0 = vlaneseq  ;;  %v2899_v1 = vmov 0   ;;  %s2900_s27 = smov 7   ;;  %vm40_vm0 = vcmask 56320   ;;  %vm44_vm1 = vcmask 252928   ;;  %s2901_s28 = smov 126   ;;  %s3920_s3 = inlined_call_operand.vmem [shape: f32[3,288], index: 3, kind: input, shape index: {}]   ;;  %s3921_s0 = inlined_call_operand.vmem [shape: f32[2,16,24], index: 0, kind: input, shape index: {}]   ;;  %s3922_s1 = inlined_call_operand.vmem [shape: bf16[7,16,144], index: 1, kind: input, shape index: {}]   ;;  %s3923_s2 = inlined_call_operand.vmem [shape: f32[16,14], index: 2, kind: input, shape index: {}]   ;;  %s3924_s4 = inlined_call_operand.vmem [shape: bf16[24,102], index: 4, kind: input, shape index: {}]   ;;  %s3925_s5 = inlined_call_operand.vmem [shape: bf16[80,326], index: 5, kind: input, shape index: {}]   ;;  %s3926_s6 = inlined_call_operand.vmem [shape: f32[2,8,288], index: 6, kind: output, shape index: {}]  }
   0x1   :  { %87 = vmatprep.subr.bf16.mxu0 %v2899_v1  ;;  %2788 = vset.pattern.permute.xlu1 %v2899_v1  ;;  %v2980_v3 = vld [vmem:[%s3920_s3] sm:$0x77]  ;;  %v2991_v6 = vld [vmem:[%s3921_s0 + $0x8] sm:$0xff]  ;;  %s2902_s29 = smov 127   ;;  %s2903_s30 = smov 122   ;;  %vm83_vm2 = vcmask 130048  }
   0x2   :  { %v2973_v2 = vshrl.u32 %v30_v0, 7  ;;  %2789 = vset.pattern.permute.xlu0 %v2899_v1  ;;  %206 = vmatprep.subr.bf16.mxu1 %v2899_v1  ;;  %v2986_v5 = vld [vmem:[%s3921_s0] sm:$0xff]  ;;  %s2904_s7 = smov 121   ;;  %s2905_s8 = smov 120   ;;  %v3024_v16 = vld [vmem:[%s3923_s2 + $0x8] sm:$0xff]  ;;  %v2909_v17 = vmov 1  }
   0x3   :  { %s2906_s9 = smov 116   ;;  %s2907_s10 = smov 115   ;;  %v2813_v14 = vld [vmem:[%s3922_s1 + $0x4] ss:$8 sps:$4 sm:$0xff]   ;;  %v2811_v26 = vld [vmem:[%s3922_s1] ss:$8 sps:$4 sm:$0xff]  }
   0x4   :  { %v32_v4 = vsub.s32 0, %v2973_v2  ;;  %s2908_s11 = smov 114   ;;  %2574 = vmatprep.mubr.msk.bf16.mxu0 %vm83_vm2, %v2813_v14  ;;  %v3019_v15 = vld [vmem:[%s3923_s2] sm:$0xff]  ;;  %v2816_v49 = vld [vmem:[%s3922_s1 + $0x14] ss:$8 sps:$4 sm:$0xff]   ;;  %v2910_v50 = vmov 2  }
   0x5   :  { %2579 = vmatprep.mubr.msk.bf16.mxu1 %vm83_vm2, %v2816_v49  ;;  %v2911_v51 = vmov 3   ;;  %v2814_v60 = vld [vmem:[%s3922_s1 + $0x10] ss:$8 sps:$4 sm:$0xff]   ;;  %v2817_v61 = vld [vmem:[%s3924_s4] sm:$0xff]   ;;  %v2912_v62 = vmov 0.0   ;;  %vm3932_vm5 = vcmask 1043456  }
   0x6   :  { %v2994_v7 = vrot.slane %v2980_v3, %v32_v4  ;;  %v2818_v63 = vld [vmem:[%s3924_s4 + $0x8] ss:$0 sps:$4 sm:$0xff]   ;;  %vm3933_vm6 = vmmov 0   ;;  %vm3931_vm9 = vcmask 195584   ;;  %s2914_s13 = smov 117   ;;  %s2915_s14 = smov 118  }
   0x7   :  { %v294_v0 = vsel %vm3932_vm5, %v2818_v63, 0  ;;  %s2916_s15 = smov 108   ;;  %s2917_s16 = smov 106   ;;  %vm3930_vm12 = vcmask 89088   ;;  %vm458_vm13 = vcmask 744448  }
   0x8   :  { %v34_v8 = vmul.f32 %v2994_v7, %v2986_v5  ;;  %v35_v9 = vmul.f32 %v2994_v7, %v2991_v6  ;;  %s2918_s17 = smov 107   ;;  %s3927_s22 = smov 11  }
   0x9   :  { %s2927_s23 = smov 109   ;;  %s2928_s24 = smov 92  }
   0xa   :  { %v36_v10 = vpack.c.bf16 %v35_v9, %v34_v8  ;;  %s2929_s25 = smov 91   ;;  %s2931_s18 = smov 90  }
   0xb   :  { %s2933_s26 = smov 19   ;;  %s3941_s21 = smov 11  }
   0xc   :  { %38 = vrot.lane.b32.xlu0 %v36_v10, %s2900_s27 }
  0x7e   :  { %v39_v11 = vpop.permute.xlu0 %38 }
  0x7f   :  { %v43_v12 = vsel %vm40_vm0, 0, %v39_v11 }
  0x80   :  { %v45_v13 = vsel %vm44_vm1, %v43_v12, 0 }
  0x81   :  { %51 = vrot.lane.b32.xlu1 %v45_v13, %s2901_s28  ;;  %48 = vrot.lane.b32.xlu0 %v45_v13, %s2902_s29 }
  0x82   :  { %88 = vmatpush1.bf16.msra.mxu0 %v45_v13 }
  0x83   :  { %89 = vmatprep.subr.bf16.mxu0 %v2899_v1 }
  0x85   :  { %54 = vrot.lane.b32.xlu1 %v45_v13, %s2903_s30  ;;  %57 = vrot.lane.b32.xlu0 %v45_v13, %s2904_s7 }
  0x89   :  { %60 = vrot.lane.b32.xlu1 %v45_v13, %s2905_s8  ;;  %63 = vrot.lane.b32.xlu0 %v45_v13, %s2906_s9 }
  0x8d   :  { %66 = vrot.lane.b32.xlu1 %v45_v13, %s2907_s10  ;;  %69 = vrot.lane.b32.xlu0 %v45_v13, %s2908_s11 }
  0x91   :  { %130 = vperm.xlu1 %2788, %v3019_v15   ;;  %135 = vperm.xlu0 %2789, %v3024_v16  }
  0x95   :  { %2790 = vset.pattern.permute.xlu1 %v2909_v17  ;;  %2792 = vset.pattern.permute.xlu0 %v2910_v50 }
  0x96   :  { %141 = vperm.xlu1 %2790, %v3019_v15  }
  0x9a   :  { %145 = vperm.xlu1 %2790, %v3024_v16  }
  0x9e   :  { %2791 = vset.pattern.permute.xlu1 %v2910_v50 }
  0xf3   :  { %v49_v18 = vpop.permute.xlu0 %48  ;;  %v52_v19 = vpop.permute.xlu1 %51 }
  0xf4   :  { %90 = vmatpush1.bf16.msra.mxu0 %v49_v18 }
  0xf5   :  { %91 = vmatprep.subr.bf16.mxu0 %v2899_v1 }
  0xf7   :  { %v55_v20 = vpop.permute.xlu1 %54  ;;  %v58_v21 = vpop.permute.xlu0 %57 }
  0xf8   :  { %92 = vmatpush1.bf16.msra.mxu0 %v52_v19 }
  0xf9   :  { %93 = vmatprep.subr.bf16.mxu0 %v2899_v1 }
  0xfb   :  { %v61_v22 = vpop.permute.xlu1 %60  ;;  %v64_v23 = vpop.permute.xlu0 %63 }
  0xfc   :  { %94 = vmatpush1.bf16.msra.mxu0 %v55_v20 }
  0xfd   :  { %95 = vmatprep.subr.bf16.mxu0 %v2899_v1 }
  0xff   :  { %v67_v24 = vpop.permute.xlu1 %66  ;;  %v70_v25 = vpop.permute.xlu0 %69 }
 0x100   :  { %96 = vmatpush1.bf16.msra.mxu0 %v58_v21 }
 0x101   :  { %97 = vmatprep.subr.bf16.mxu0 %v2899_v1 }
 0x104   :  { %98 = vmatpush1.bf16.msra.mxu0 %v61_v22 }
 0x105   :  { %99 = vmatprep.subr.bf16.mxu0 %v2899_v1 }
 0x108   :  { %100 = vmatpush1.bf16.msra.mxu0 %v64_v23 }
 0x109   :  { %101 = vmatprep.subr.bf16.mxu0 %v2899_v1 }
 0x10c   :  { %102 = vmatpush1.bf16.msra.mxu0 %v67_v24 }
 0x10d   :  { %103 = vmatprep.subr.bf16.mxu0 %v2899_v1 }
 0x110   :  { %104 = vmatpush1.bf16.msra.mxu0 %v70_v25  ;;  %v3040_v27 = vpop.permute.xlu1 %130  ;;  %v3044_v30 = vpop.permute.xlu0 %135 }
 0x111   :  { %2707 = vmatprep.subr.bf16.mxu0 %v2912_v62 }
 0x113   :  { %120 = vmatmul.mubr.bf16.vlgmr.msra.gmra.mrb[0].mxu0 %v2811_v26 }
 0x114   :  { %2708 = vmatpush3.bf16.msra.mxu0 %v2817_v61  ;;  %2711 = vmatprep.mubr.msk.bf16.mxu0 %vm3933_vm6, %v2912_v62 }
 0x115   :  { %v3042_v28 = vpop.permute.xlu1 %141  ;;  %2709 = vmatprep.subr.bf16.mxu0 %v2912_v62 }
 0x118   :  { %2710 = vmatpush3.bf16.msra.mxu0 %v294_v0 }
 0x119   :  { %v3049_v37 = vpop.permute.xlu1 %145  ;;  %501 = vmatprep.subr.bf16.mxu0 %v2899_v1 }
 0x1e6   :  { %v121_v29 = vpop.f32.mrb[0].mxu0 }
 0x1e7   :  { %v138_v31 = vmul.f32 %v3040_v27, %v121_v29  ;;  %v123_v32 = vpop.f32.mrb[1].mxu0 }
 0x1e8   :  { %v124_v33 = vpop.f32.mrb[2].mxu0 }
 0x1e9   :  { %v148_v34 = vadd.f32 %v3042_v28, %v138_v31  ;;  %v139_v35 = vmul.f32 %v3044_v30, %v124_v33  ;;  %v126_v36 = vpop.f32.mrb[3].mxu0 }
 0x1ea   :  { %v2920_v36 = vmov 5  }
 0x1eb   :  { %vm150_vm3 = vcmp.ge.f32.partialorder %v148_v34, 0.0  ;;  %v152_v38 = vmul.f32 0.3, %v148_v34  ;;  %v149_v39 = vadd.f32 %v3049_v37, %v139_v35 }
 0x1ed   :  { %vm151_vm4 = vcmp.ge.f32.partialorder %v149_v39, 0.0  ;;  %v153_v40 = vmul.f32 0.3, %v149_v39  ;;  %v154_v41 = vsel %vm150_vm3, %v148_v34, %v152_v38 }
 0x1ee   :  { %v156_v43 = vmul.f32 %v154_v41, %v2994_v7 }
 0x1ef   :  { %v155_v42 = vsel %vm151_vm4, %v149_v39, %v153_v40 }
 0x1f0   :  { %v157_v44 = vmul.f32 %v155_v42, %v2994_v7 }
 0x1f2   :  { %v158_v45 = vpack.c.bf16 %v157_v44, %v156_v43 }
 0x1f4   :  { %160 = vrot.lane.b32.xlu0 %v158_v45, %s2900_s27 }
 0x266   :  { %v161_v46 = vpop.permute.xlu0 %160 }
 0x267   :  { %v163_v47 = vsel %vm40_vm0, 0, %v161_v46  ;;  %v2821_v46 = vld [vmem:[%s3922_s1 + $0x20] ss:$8 sps:$4 sm:$0xff]  }
 0x268   :  { %v164_v48 = vsel %vm44_vm1, %v163_v47, 0 }
 0x269   :  { %170 = vrot.lane.b32.xlu0 %v164_v48, %s2901_s28  ;;  %167 = vrot.lane.b32.xlu1 %v164_v48, %s2902_s29 }
 0x26a   :  { %207 = vmatpush1.bf16.msra.mxu1 %v164_v48 }
 0x26b   :  { %208 = vmatprep.subr.bf16.mxu1 %v2899_v1 }
 0x26d   :  { %176 = vrot.lane.b32.xlu0 %v164_v48, %s2904_s7  ;;  %173 = vrot.lane.b32.xlu1 %v164_v48, %s2903_s30 }
 0x271   :  { %182 = vrot.lane.b32.xlu0 %v164_v48, %s2906_s9  ;;  %179 = vrot.lane.b32.xlu1 %v164_v48, %s2905_s8 }
 0x275   :  { %188 = vrot.lane.b32.xlu0 %v164_v48, %s2908_s11  ;;  %185 = vrot.lane.b32.xlu1 %v164_v48, %s2907_s10 }
 0x279   :  { %248 = vperm.xlu1 %2791, %v3019_v15   ;;  %252 = vperm.xlu0 %2792, %v3024_v16  }
 0x27d   :  { %2793 = vset.pattern.permute.xlu1 %v2911_v51 }
 0x27e   :  { %258 = vperm.xlu1 %2793, %v3019_v15  }
 0x282   :  { %262 = vperm.xlu1 %2793, %v3024_v16  }
 0x2db   :  { %v168_v52 = vpop.permute.xlu1 %167  ;;  %v171_v53 = vpop.permute.xlu0 %170 }
 0x2dc   :  { %209 = vmatpush1.bf16.msra.mxu1 %v168_v52 }
 0x2dd   :  { %210 = vmatprep.subr.bf16.mxu1 %v2899_v1 }
 0x2df   :  { %v174_v54 = vpop.permute.xlu1 %173  ;;  %v177_v55 = vpop.permute.xlu0 %176 }
 0x2e0   :  { %211 = vmatpush1.bf16.msra.mxu1 %v171_v53 }
 0x2e1   :  { %212 = vmatprep.subr.bf16.mxu1 %v2899_v1 }
 0x2e3   :  { %v180_v56 = vpop.permute.xlu1 %179  ;;  %v183_v57 = vpop.permute.xlu0 %182 }
 0x2e4   :  { %213 = vmatpush1.bf16.msra.mxu1 %v174_v54 }
 0x2e5   :  { %214 = vmatprep.subr.bf16.mxu1 %v2899_v1 }
 0x2e7   :  { %v186_v58 = vpop.permute.xlu1 %185  ;;  %v189_v59 = vpop.permute.xlu0 %188 }
 0x2e8   :  { %215 = vmatpush1.bf16.msra.mxu1 %v177_v55  ;;  %v447_v55 = vsub.s32 1, %v2973_v2 }
 0x2e9   :  { %216 = vmatprep.subr.bf16.mxu1 %v2899_v1 }
 0x2ea   :  { %v3154_v61 = vrot.slane %v2980_v3, %v447_v55 }
 0x2ec   :  { %217 = vmatpush1.bf16.msra.mxu1 %v180_v56 }
 0x2ed   :  { %218 = vmatprep.subr.bf16.mxu1 %v2899_v1 }
 0x2f0   :  { %219 = vmatpush1.bf16.msra.mxu1 %v183_v57 }
 0x2f1   :  { %220 = vmatprep.subr.bf16.mxu1 %v2899_v1 }
 0x2f4   :  { %221 = vmatpush1.bf16.msra.mxu1 %v186_v58 }
 0x2f5   :  { %222 = vmatprep.subr.bf16.mxu1 %v2899_v1 }
 0x2f8   :  { %223 = vmatpush1.bf16.msra.mxu1 %v189_v59  ;;  %v3097_v4 = vpop.permute.xlu1 %248  ;;  %v3101_v10 = vpop.permute.xlu0 %252 }
 0x2f9   :  { %378 = vmatprep.subr.bf16.mxu1 %v2899_v1 }
 0x2fb   :  { %239 = vmatmul.mubr.bf16.vlgmr.msra.gmra.mrb[0].mxu1 %v2814_v60 }
 0x2fd   :  { %v3099_v8 = vpop.permute.xlu1 %258 }
 0x301   :  { %v3106_v19 = vpop.permute.xlu1 %262 }
 0x3ce   :  { %v240_v9 = vpop.f32.mrb[0].mxu1 }
 0x3cf   :  { %v255_v11 = vmul.f32 %v3097_v4, %v240_v9  ;;  %v242_v12 = vpop.f32.mrb[1].mxu1 }
 0x3d0   :  { %v243_v13 = vpop.f32.mrb[2].mxu1 }
 0x3d1   :  { %v265_v14 = vadd.f32 %v3099_v8, %v255_v11  ;;  %v256_v17 = vmul.f32 %v3101_v10, %v243_v13  ;;  %v245_v18 = vpop.f32.mrb[3].mxu1 }
 0x3d2   :  { %v2822_v18 = vld [vmem:[%s3922_s1 + $0x34] ss:$8 sps:$4 sm:$0xff]  }
 0x3d3   :  { %v267_v20 = vadd.f32 %v265_v14, %v2986_v5  ;;  %v266_v21 = vadd.f32 %v3106_v19, %v256_v17  ;;  %v2819_v5 = vld [vmem:[%s3922_s1 + $0x24] ss:$8 sps:$4 sm:$0xff]  }
 0x3d4   :  { %2587 = vmatprep.mubr.msk.bf16.mxu1 %vm83_vm2, %v2819_v5 }
 0x3d5   :  { %v271_v22 = vmul.f32 0.3, %v267_v20  ;;  %v268_v23 = vadd.f32 %v266_v21, %v2991_v6  ;;  %vm269_vm7 = vcmp.ge.f32.partialorder %v267_v20, 0.0  ;;  %v2919_v6 = vmov 4  }
 0x3d6   :  { %2795 = vset.pattern.permute.xlu1 %v2919_v6  ;;  %2794 = vset.pattern.permute.xlu0 %v2919_v6  ;;  %v2923_v21 = vmov 7  }
 0x3d7   :  { %vm270_vm8 = vcmp.ge.f32.partialorder %v268_v23, 0.0  ;;  %v272_v24 = vmul.f32 0.3, %v268_v23  ;;  %v273_v25 = vsel %vm269_vm7, %v267_v20, %v271_v22  ;;  %v2922_v20 = vmov 6  }
 0x3d8   :  { %vm3929_vm7 = vcmask 654336  }
 0x3d9   :  { %v274_v26 = vsel %vm270_vm8, %v268_v23, %v272_v24  ;;  %vm888_vm8 = vcmask 1039360  }
 0x3da   :  { %v275_v29 = vpack.c.bf16 %v274_v26, %v273_v25 }
 0x3dc   :  { %2712 = vmatmul.mubr.msk.bf16.vlgmr.msra.gmra.mrb[4].mxu0 %vm3931_vm9, %v275_v29 }
 0x3dd   :  { %2592 = vmatprep.mubr.msk.bf16.mxu0 %vm83_vm2, %v2822_v18 }
 0x4af   :  { %v330_v31 = vpop.f32.mrb[4].mxu0 }
 0x4b0   :  { %v2713_v32 = vpop.f32.mrb[5].mxu0 }
 0x4b1   :  { %v333_v33 = vpop.f32.mrb[6].mxu0 }
 0x4b2   :  { %v337_v34 = vpack.c.bf16 %v333_v33, %v330_v31  ;;  %v2714_v35 = vpop.f32.mrb[7].mxu0  ;;  %v2824_v33 = vld [vmem:[%s3922_s1 + $0x30] ss:$8 sps:$4 sm:$0xff]  }
 0x4b4   :  { %342 = vrot.lane.b32.xlu1 %v337_v34, %s2901_s28  ;;  %339 = vrot.lane.b32.xlu0 %v337_v34, %s2902_s29 }
 0x4b5   :  { %379 = vmatpush1.bf16.msra.mxu1 %v337_v34 }
 0x4b6   :  { %380 = vmatprep.subr.bf16.mxu1 %v2899_v1 }
 0x4b8   :  { %348 = vrot.lane.b32.xlu1 %v337_v34, %s2914_s13  ;;  %345 = vrot.lane.b32.xlu0 %v337_v34, %s2915_s14 }
 0x4bc   :  { %354 = vrot.lane.b32.xlu1 %v337_v34, %s2916_s15  ;;  %351 = vrot.lane.b32.xlu0 %v337_v34, %s2906_s9 }
 0x4c0   :  { %360 = vrot.lane.b32.xlu1 %v337_v34, %s2917_s16  ;;  %357 = vrot.lane.b32.xlu0 %v337_v34, %s2918_s17 }
 0x4c4   :  { %424 = vperm.xlu1 %2795, %v3024_v16   ;;  %420 = vperm.xlu0 %2794, %v3019_v15  }
 0x4c8   :  { %2796 = vset.pattern.permute.xlu1 %v2920_v36  ;;  %2797 = vset.pattern.permute.xlu0 %v2920_v36 }
 0x4c9   :  { %430 = vperm.xlu1 %2796, %v3019_v15   ;;  %434 = vperm.xlu0 %2797, %v3024_v16  }
 0x4cd   :  { %2798 = vset.pattern.permute.xlu1 %v2922_v20  ;;  %2799 = vset.pattern.permute.xlu0 %v2922_v20 }
 0x526   :  { %v340_v38 = vpop.permute.xlu0 %339  ;;  %v343_v39 = vpop.permute.xlu1 %342 }
 0x527   :  { %381 = vmatpush1.bf16.msra.mxu1 %v340_v38 }
 0x528   :  { %382 = vmatprep.subr.bf16.mxu1 %v2899_v1 }
 0x52a   :  { %v346_v40 = vpop.permute.xlu0 %345  ;;  %v349_v41 = vpop.permute.xlu1 %348 }
 0x52b   :  { %383 = vmatpush1.bf16.msra.mxu1 %v343_v39 }
 0x52c   :  { %384 = vmatprep.subr.bf16.mxu1 %v2899_v1 }
 0x52e   :  { %v352_v42 = vpop.permute.xlu0 %351  ;;  %v355_v43 = vpop.permute.xlu1 %354 }
 0x52f   :  { %385 = vmatpush1.bf16.msra.mxu1 %v346_v40 }
 0x530   :  { %386 = vmatprep.subr.bf16.mxu1 %v2899_v1 }
 0x532   :  { %v358_v44 = vpop.permute.xlu0 %357  ;;  %v361_v45 = vpop.permute.xlu1 %360 }
 0x533   :  { %387 = vmatpush1.bf16.msra.mxu1 %v349_v41 }
 0x534   :  { %388 = vmatprep.subr.bf16.mxu1 %v2899_v1 }
 0x537   :  { %389 = vmatpush1.bf16.msra.mxu1 %v352_v42 }
 0x538   :  { %390 = vmatprep.subr.bf16.mxu1 %v2899_v1 }
 0x53b   :  { %391 = vmatpush1.bf16.msra.mxu1 %v355_v43 }
 0x53c   :  { %392 = vmatprep.subr.bf16.mxu1 %v2899_v1 }
 0x53f   :  { %393 = vmatpush1.bf16.msra.mxu1 %v358_v44 }
 0x540   :  { %394 = vmatprep.subr.bf16.mxu1 %v2899_v1 }
 0x543   :  { %395 = vmatpush1.bf16.msra.mxu1 %v361_v45  ;;  %v3140_v47 = vpop.permute.xlu1 %424  ;;  %v3142_v48 = vpop.permute.xlu0 %420 }
 0x544   :  { %618 = vmatprep.subr.bf16.mxu1 %v2899_v1 }
 0x546   :  { %411 = vmatmul.mubr.bf16.vlgmr.msra.gmra.mrb[4].mxu1 %v2821_v46 }
 0x548   :  { %v3144_v50 = vpop.permute.xlu1 %430  ;;  %v3147_v54 = vpop.permute.xlu0 %434 }
 0x619   :  { %v412_v49 = vpop.f32.mrb[4].mxu1 }
 0x61a   :  { %v427_v51 = vmul.f32 %v3142_v48, %v412_v49  ;;  %v414_v52 = vpop.f32.mrb[5].mxu1 }
 0x61b   :  { %v415_v53 = vpop.f32.mrb[6].mxu1 }
 0x61c   :  { %v437_v56 = vadd.f32 %v3144_v50, %v427_v51  ;;  %v428_v57 = vmul.f32 %v3140_v47, %v415_v53  ;;  %v417_v58 = vpop.f32.mrb[7].mxu1 }
 0x61e   :  { %vm439_vm10 = vcmp.ge.f32.partialorder %v437_v56, 0.0  ;;  %v441_v59 = vmul.f32 0.3, %v437_v56  ;;  %v438_v60 = vadd.f32 %v3147_v54, %v428_v57 }
 0x620   :  { %vm440_vm11 = vcmp.ge.f32.partialorder %v438_v60, 0.0  ;;  %v442_v63 = vmul.f32 0.3, %v438_v60  ;;  %v3156_v0 = vsel %vm439_vm10, %v437_v56, %v441_v59  ;;  %v2825_v59 = vld [vmem:[%s3922_s1 + $0x44] ss:$8 sps:$4 sm:$0xff]   ;;  %vm900_vm10 = vcmask 1031168  }
 0x621   :  { %v449_v11 = vmul.f32 %v3154_v61, %v3156_v0  ;;  %2597 = vmatprep.mubr.msk.bf16.mxu1 %vm83_vm2, %v2825_v59 }
 0x622   :  { %v3158_v9 = vsel %vm440_vm11, %v438_v60, %v442_v63  ;;  %v2924_v60 = vmov 8   ;;  %v2828_v63 = vld [vmem:[%s3925_s5] ss:$12 sps:$4 sm:$0xff]   ;;  %vm912_vm11 = vcmask 900096  }
 0x623   :  { %v450_v12 = vmul.f32 %v3154_v61, %v3158_v9 }
 0x625   :  { %v451_v13 = vpack.c.bf16 %v450_v12, %v449_v11  ;;  %v2830_v11 = vld [vmem:[%s3925_s5 + $0x4] ss:$12 sps:$4 sm:$0xff]   ;;  %v2925_v12 = vmov 9  }
 0x627   :  { %453 = vrot.lane.b32.xlu1 %v451_v13, %s3927_s22  ;;  %v2831_v13 = vld [vmem:[%s3925_s5 + $0x18] ss:$12 sps:$4 sm:$0xff]  }
 0x699   :  { %v454_v3 = vpop.permute.xlu1 %453 }
 0x69a   :  { %v457_v14 = vsel %vm3930_vm12, 0, %v454_v3  ;;  %v2833_v3 = vld [vmem:[%s3925_s5 + $0x1c] ss:$12 sps:$4 sm:$0xff]  }
 0x69b   :  { %v459_v17 = vsel %vm458_vm13, %v457_v14, 0 }
 0x69c   :  { %465 = vrot.lane.b32.xlu0 %v459_v17, %s2901_s28  ;;  %462 = vrot.lane.b32.xlu1 %v459_v17, %s2902_s29 }
 0x69d   :  { %502 = vmatpush1.bf16.msra.mxu0 %v459_v17 }
 0x69e   :  { %503 = vmatprep.subr.bf16.mxu0 %v2899_v1 }
 0x6a0   :  { %471 = vrot.lane.b32.xlu0 %v459_v17, %s2914_s13  ;;  %468 = vrot.lane.b32.xlu1 %v459_v17, %s2915_s14 }
 0x6a4   :  { %477 = vrot.lane.b32.xlu0 %v459_v17, %s2916_s15  ;;  %474 = vrot.lane.b32.xlu1 %v459_v17, %s2906_s9 }
 0x6a8   :  { %483 = vrot.lane.b32.xlu0 %v459_v17, %s2917_s16  ;;  %480 = vrot.lane.b32.xlu1 %v459_v17, %s2918_s17 }
 0x6ac   :  { %543 = vperm.xlu1 %2798, %v3019_v15   ;;  %547 = vperm.xlu0 %2799, %v3024_v16  }
 0x6b0   :  { %2800 = vset.pattern.permute.xlu1 %v2923_v21  ;;  %2802 = vset.pattern.permute.xlu0 %v2924_v60 }
 0x6b1   :  { %553 = vperm.xlu1 %2800, %v3019_v15  }
 0x6b5   :  { %557 = vperm.xlu1 %2800, %v3024_v16  }
 0x6b9   :  { %2801 = vset.pattern.permute.xlu1 %v2924_v60  ;;  %v2846_v60 = vld [vmem:[%s3925_s5 + $0x50] ss:$12 sps:$4 sm:$0xff]  }
 0x70e   :  { %v463_v22 = vpop.permute.xlu1 %462  ;;  %v466_v23 = vpop.permute.xlu0 %465 }
 0x70f   :  { %504 = vmatpush1.bf16.msra.mxu0 %v463_v22 }
 0x710   :  { %505 = vmatprep.subr.bf16.mxu0 %v2899_v1 }
 0x712   :  { %v469_v24 = vpop.permute.xlu1 %468  ;;  %v472_v25 = vpop.permute.xlu0 %471 }
 0x713   :  { %506 = vmatpush1.bf16.msra.mxu0 %v466_v23  ;;  %v2827_v23 = vld [vmem:[%s3922_s1 + $0x40] ss:$8 sps:$4 sm:$0xff]  }
 0x714   :  { %507 = vmatprep.subr.bf16.mxu0 %v2899_v1 }
 0x716   :  { %v475_v26 = vpop.permute.xlu1 %474  ;;  %v478_v29 = vpop.permute.xlu0 %477 }
 0x717   :  { %508 = vmatpush1.bf16.msra.mxu0 %v469_v24  ;;  %v2836_v24 = vld [vmem:[%s3925_s5 + $0x34] ss:$12 sps:$4 sm:$0xff]  }
 0x718   :  { %509 = vmatprep.subr.bf16.mxu0 %v2899_v1 }
 0x71a   :  { %v481_v31 = vpop.permute.xlu1 %480  ;;  %v484_v32 = vpop.permute.xlu0 %483 }
 0x71b   :  { %510 = vmatpush1.bf16.msra.mxu0 %v472_v25  ;;  %v2834_v25 = vld [vmem:[%s3925_s5 + $0x30] ss:$12 sps:$4 sm:$0xff]  }
 0x71c   :  { %511 = vmatprep.subr.bf16.mxu0 %v2899_v1 }
 0x71f   :  { %512 = vmatpush1.bf16.msra.mxu0 %v475_v26  ;;  %v2839_v26 = vld [vmem:[%s3925_s5 + $0x4c] ss:$12 sps:$4 sm:$0xff]  }
 0x720   :  { %513 = vmatprep.subr.bf16.mxu0 %v2899_v1 }
 0x723   :  { %514 = vmatpush1.bf16.msra.mxu0 %v478_v29  ;;  %v2837_v29 = vld [vmem:[%s3925_s5 + $0x48] ss:$12 sps:$4 sm:$0xff]  }
 0x724   :  { %515 = vmatprep.subr.bf16.mxu0 %v2899_v1 }
 0x727   :  { %516 = vmatpush1.bf16.msra.mxu0 %v481_v31  ;;  %v2842_v31 = vld [vmem:[%s3925_s5 + $0x64] ss:$12 sps:$4 sm:$0xff]  }
 0x728   :  { %517 = vmatprep.subr.bf16.mxu0 %v2899_v1 }
 0x72b   :  { %518 = vmatpush1.bf16.msra.mxu0 %v484_v32  ;;  %v3195_v34 = vpop.permute.xlu1 %543  ;;  %v3199_v6 = vpop.permute.xlu0 %547  ;;  %v2840_v32 = vld [vmem:[%s3925_s5 + $0x60] ss:$12 sps:$4 sm:$0xff]  }
 0x72c   :  { %792 = vmatprep.subr.bf16.mxu0 %v2830_v11 }
 0x72e   :  { %534 = vmatmul.mubr.bf16.vlgmr.msra.gmra.mrb[8].mxu0 %v2824_v33 }
 0x72f   :  { %824 = vmatprep.mubr.bf16.mxu0 %v2899_v1  ;;  %793 = vmatpush1.bf16.msra.mxu0 %v2828_v63  ;;  %v2847_v63 = vld [vmem:[%s3925_s5 + $0x68] ss:$12 sps:$4 sm:$0xff]  }
 0x730   :  { %v3197_v35 = vpop.permute.xlu1 %553  ;;  %794 = vmatprep.subr.bf16.mxu0 %v2833_v3 }
 0x733   :  { %795 = vmatpush1.bf16.msra.mxu0 %v2831_v13 }
 0x734   :  { %v3204_v43 = vpop.permute.xlu1 %557  ;;  %796 = vmatprep.subr.bf16.mxu0 %v2836_v24  ;;  %v2895_v24 = vld [vmem:[%s3923_s2] sm:$0xff] }
 0x737   :  { %797 = vmatpush1.bf16.msra.mxu0 %v2834_v25  ;;  %v2932_v25 = vmov 11  }
 0x738   :  { %798 = vmatprep.subr.bf16.mxu0 %v2839_v26  ;;  %v2896_v26 = vld [vmem:[%s3923_s2 + $0x8] sm:$0xff] }
 0x73b   :  { %799 = vmatpush1.bf16.msra.mxu0 %v2837_v29 }
 0x73c   :  { %800 = vmatprep.subr.bf16.mxu0 %v2842_v31 }
 0x73f   :  { %801 = vmatpush1.bf16.msra.mxu0 %v2840_v32 }
 0x740   :  { %2715 = vmatprep.subr.bf16.mxu0 %v2912_v62 }
 0x801   :  { %v535_v5 = vpop.f32.mrb[8].mxu0 }
 0x802   :  { %v550_v36 = vmul.f32 %v3195_v34, %v535_v5  ;;  %v537_v38 = vpop.f32.mrb[9].mxu0 }
 0x803   :  { %v538_v39 = vpop.f32.mrb[10].mxu0 }
 0x804   :  { %v560_v40 = vadd.f32 %v3197_v35, %v550_v36  ;;  %v551_v41 = vmul.f32 %v3199_v6, %v538_v39  ;;  %v540_v42 = vpop.f32.mrb[11].mxu0 }
 0x806   :  { %vm562_vm14 = vcmp.ge.f32.partialorder %v560_v40, 0.0  ;;  %v564_v44 = vmul.f32 0.3, %v560_v40  ;;  %v561_v45 = vadd.f32 %v3204_v43, %v551_v41 }
 0x808   :  { %vm563_vm15 = vcmp.ge.f32.partialorder %v561_v45, 0.0  ;;  %v565_v46 = vmul.f32 0.3, %v561_v45  ;;  %v566_v49 = vsel %vm562_vm14, %v560_v40, %v564_v44  ;;  %vm924_vm14 = vcmask 891904  }
 0x809   :  { %v568_v52 = vmul.f32 %v566_v49, %v3154_v61 }
 0x80a   :  { %v567_v51 = vsel %vm563_vm15, %v561_v45, %v565_v46  ;;  %vm936_vm15 = vcmask 883712  }
 0x80b   :  { %v569_v53 = vmul.f32 %v567_v51, %v3154_v61 }
 0x80d   :  { %v570_v55 = vpack.c.bf16 %v569_v53, %v568_v52 }
 0x80f   :  { %572 = vrot.lane.b32.xlu0 %v570_v55, %s3927_s22  ;;  %s2926_s22 = smov 110  }
 0x881   :  { %v573_v56 = vpop.permute.xlu0 %572 }
 0x882   :  { %v575_v57 = vsel %vm3930_vm12, 0, %v573_v56 }
 0x883   :  { %v576_v58 = vsel %vm458_vm13, %v575_v57, 0 }
 0x884   :  { %582 = vrot.lane.b32.xlu0 %v576_v58, %s2901_s28  ;;  %579 = vrot.lane.b32.xlu1 %v576_v58, %s2902_s29 }
 0x885   :  { %619 = vmatpush1.bf16.msra.mxu1 %v576_v58 }
 0x886   :  { %620 = vmatprep.subr.bf16.mxu1 %v2899_v1 }
 0x888   :  { %588 = vrot.lane.b32.xlu0 %v576_v58, %s2914_s13  ;;  %585 = vrot.lane.b32.xlu1 %v576_v58, %s2915_s14 }
 0x88c   :  { %594 = vrot.lane.b32.xlu0 %v576_v58, %s2916_s15  ;;  %591 = vrot.lane.b32.xlu1 %v576_v58, %s2906_s9 }
 0x890   :  { %600 = vrot.lane.b32.xlu0 %v576_v58, %s2917_s16  ;;  %597 = vrot.lane.b32.xlu1 %v576_v58, %s2918_s17  ;;  %v2843_v58 = vld [vmem:[%s3925_s5 + $0x8] ss:$12 sps:$4 sm:$0xff]  }
 0x894   :  { %660 = vperm.xlu1 %2801, %v3019_v15   ;;  %664 = vperm.xlu0 %2802, %v3024_v16  }
 0x898   :  { %2803 = vset.pattern.permute.xlu1 %v2925_v12 }
 0x899   :  { %670 = vperm.xlu1 %2803, %v3019_v15  }
 0x89d   :  { %674 = vperm.xlu1 %2803, %v3024_v16  }
 0x8f6   :  { %v580_v14 = vpop.permute.xlu1 %579  ;;  %v583_v17 = vpop.permute.xlu0 %582 }
 0x8f7   :  { %621 = vmatpush1.bf16.msra.mxu1 %v580_v14 }
 0x8f8   :  { %622 = vmatprep.subr.bf16.mxu1 %v2899_v1 }
 0x8fa   :  { %v586_v18 = vpop.permute.xlu1 %585  ;;  %v589_v20 = vpop.permute.xlu0 %588 }
 0x8fb   :  { %623 = vmatpush1.bf16.msra.mxu1 %v583_v17 }
 0x8fc   :  { %624 = vmatprep.subr.bf16.mxu1 %v2899_v1 }
 0x8fe   :  { %v592_v15 = vpop.permute.xlu1 %591  ;;  %v595_v16 = vpop.permute.xlu0 %594 }
 0x8ff   :  { %625 = vmatpush1.bf16.msra.mxu1 %v586_v18 }
 0x900   :  { %626 = vmatprep.subr.bf16.mxu1 %v2899_v1 }
 0x902   :  { %v598_v21 = vpop.permute.xlu1 %597  ;;  %v601_v22 = vpop.permute.xlu0 %600 }
 0x903   :  { %627 = vmatpush1.bf16.msra.mxu1 %v589_v20 }
 0x904   :  { %628 = vmatprep.subr.bf16.mxu1 %v2899_v1 }
 0x907   :  { %629 = vmatpush1.bf16.msra.mxu1 %v592_v15 }
 0x908   :  { %630 = vmatprep.subr.bf16.mxu1 %v2899_v1 }
 0x90b   :  { %631 = vmatpush1.bf16.msra.mxu1 %v595_v16 }
 0x90c   :  { %632 = vmatprep.subr.bf16.mxu1 %v2899_v1 }
 0x90f   :  { %633 = vmatpush1.bf16.msra.mxu1 %v598_v21 }
 0x910   :  { %634 = vmatprep.subr.bf16.mxu1 %v2899_v1 }
 0x913   :  { %635 = vmatpush1.bf16.msra.mxu1 %v601_v22  ;;  %v3270_v33 = vpop.permute.xlu1 %660  ;;  %v3274_v38 = vpop.permute.xlu0 %664  ;;  %v2848_v22 = vld [vmem:[%s3922_s1 + $0x54] ss:$8 sps:$4 sm:$0xff]  }
 0x916   :  { %651 = vmatmul.mubr.bf16.vlgmr.msra.gmra.mrb[8].mxu1 %v2827_v23  ;;  %v2930_v23 = vmov 10  }
 0x917   :  { %2619 = vmatprep.mubr.msk.bf16.mxu1 %vm83_vm2, %v2848_v22  ;;  %2804 = vset.pattern.permute.xlu0 %v2930_v23 }
 0x918   :  { %v3272_v5 = vpop.permute.xlu1 %670  ;;  %2805 = vset.pattern.permute.xlu1 %v2930_v23 }
 0x91c   :  { %v3279_v46 = vpop.permute.xlu1 %674 }
 0x9e9   :  { %v652_v36 = vpop.f32.mrb[8].mxu1 }
 0x9ea   :  { %v667_v39 = vmul.f32 %v3270_v33, %v652_v36  ;;  %v654_v40 = vpop.f32.mrb[9].mxu1 }
 0x9eb   :  { %v655_v41 = vpop.f32.mrb[10].mxu1 }
 0x9ec   :  { %v677_v42 = vadd.f32 %v3272_v5, %v667_v39  ;;  %v668_v44 = vmul.f32 %v3274_v38, %v655_v41  ;;  %v657_v45 = vpop.f32.mrb[11].mxu1 }
 0x9ee   :  { %v679_v49 = vadd.f32 %v677_v42, %v3156_v0  ;;  %v678_v51 = vadd.f32 %v3279_v46, %v668_v44  ;;  %v2844_v0 = vld [vmem:[%s3925_s5 + $0x20] ss:$12 sps:$4 sm:$0xff]  }
 0x9f0   :  { %v683_v52 = vmul.f32 0.3, %v679_v49  ;;  %v680_v53 = vadd.f32 %v678_v51, %v3158_v9  ;;  %vm681_vm3 = vcmp.ge.f32.partialorder %v679_v49, 0.0  ;;  %v2845_v9 = vld [vmem:[%s3925_s5 + $0x38] ss:$12 sps:$4 sm:$0xff]  }
 0x9f2   :  { %vm682_vm4 = vcmp.ge.f32.partialorder %v680_v53, 0.0  ;;  %v684_v55 = vmul.f32 0.3, %v680_v53  ;;  %v685_v56 = vsel %vm681_vm3, %v679_v49, %v683_v52  ;;  %vm948_vm3 = vcmask 752640  }
 0x9f4   :  { %v686_v57 = vsel %vm682_vm4, %v680_v53, %v684_v55  ;;  %vm972_vm4 = vcmask 736256  }
 0x9f5   :  { %v687_v59 = vpack.c.bf16 %v686_v57, %v685_v56 }
 0x9f7   :  { %2613 = vmatmul.mubr.msk.bf16.vlgmr.msra.gmra.mrb[12].mxu0 %vm3929_vm7, %v687_v59 }
 0x9f8   :  { %2716 = vmatpush3.bf16.msra.mxu0 %v2843_v58  ;;  %2725 = vmatprep.mubr.msk.bf16.mxu0 %vm3933_vm6, %v2912_v62 }
 0x9f9   :  { %2717 = vmatprep.subr.bf16.mxu0 %v2912_v62 }
 0x9fc   :  { %2718 = vmatpush3.bf16.msra.mxu0 %v2844_v0 }
 0x9fd   :  { %2719 = vmatprep.subr.bf16.mxu0 %v2912_v62 }
 0xa00   :  { %2720 = vmatpush3.bf16.msra.mxu0 %v2845_v9 }
 0xa01   :  { %2721 = vmatprep.subr.bf16.mxu0 %v2912_v62 }
 0xa04   :  { %2722 = vmatpush3.bf16.msra.mxu0 %v2846_v60 }
 0xa05   :  { %2723 = vmatprep.subr.bf16.mxu0 %v2912_v62 }
 0xa08   :  { %2724 = vmatpush3.bf16.msra.mxu0 %v2847_v63 }
 0xa09   :  { %1036 = vmatprep.subr.bf16.mxu0 %v2899_v1 }
 0xa0b   :  { %2726 = vmatmul.mubr.msk.bf16.vlgmr.msra.gmra.mrb[16].mxu0 %vm3929_vm7, %v687_v59 }
 0xa0c   :  { %2620 = vmatprep.mubr.msk.bf16.mxu0 %vm83_vm2, %v2848_v22 }
 0xaca   :  { %v826_v11 = vpop.f32.mrb[12].mxu0 }
 0xacb   :  { %v828_v12 = vpop.f32.mrb[13].mxu0 }
 0xacc   :  { %v830_v13 = vpop.f32.mrb[14].mxu0 }
 0xacd   :  { %v876_v3 = vpack.c.bf16 %v830_v13, %v826_v11  ;;  %v832_v14 = vpop.f32.mrb[15].mxu0 }
 0xace   :  { %v877_v17 = vpack.c.bf16 %v832_v14, %v828_v12 }
 0xacf   :  { %894 = vrot.lane.b32.xlu1 %v876_v3, %s2901_s28  ;;  %882 = vrot.lane.b32.xlu0 %v876_v3, %s2902_s29 }
 0xad0   :  { %993 = vmatprep.subr.bf16.mxu1 %v877_v17 }
 0xad1   :  { %994 = vmatpush1.bf16.msra.mxu1 %v876_v3 }
 0xad3   :  { %906 = vrot.lane.b32.xlu0 %v876_v3, %s2926_s22  ;;  %896 = vrot.lane.b32.xlu1 %v877_v17, %s2901_s28 }
 0xad7   :  { %920 = vrot.lane.b32.xlu1 %v877_v17, %s2927_s23  ;;  %884 = vrot.lane.b32.xlu0 %v877_v17, %s2902_s29 }
 0xadb   :  { %908 = vrot.lane.b32.xlu0 %v877_v17, %s2926_s22 }
 0xade   :  { %v869_v18 = vpop.f32.mrb[16].mxu0 }
 0xadf   :  { %v2727_v20 = vpop.f32.mrb[17].mxu0  ;;  %932 = vrot.lane.b32.xlu0 %v877_v17, %s2916_s15 }
 0xae0   :  { %v872_v15 = vpop.f32.mrb[18].mxu0 }
 0xae1   :  { %v878_v16 = vpack.c.bf16 %v872_v15, %v869_v18  ;;  %v2728_v21 = vpop.f32.mrb[19].mxu0 }
 0xae3   :  { %886 = vrot.lane.b32.xlu1 %v878_v16, %s2902_s29  ;;  %1037 = vmatpush1.bf16.msra.mxu0 %v878_v16 }
 0xae4   :  { %898 = vrot.lane.b32.xlu0 %v878_v16, %s2901_s28  ;;  %1038 = vmatprep.subr.bf16.mxu0 %v2899_v1 }
 0xae7   :  { %918 = vrot.lane.b32.xlu1 %v876_v3, %s2927_s23 }
 0xae8   :  { %930 = vrot.lane.b32.xlu0 %v876_v3, %s2916_s15 }
 0xaeb   :  { %910 = vrot.lane.b32.xlu1 %v878_v16, %s2926_s22 }
 0xaec   :  { %922 = vrot.lane.b32.xlu0 %v878_v16, %s2927_s23 }
 0xaef   :  { %944 = vrot.lane.b32.xlu1 %v877_v17, %s2928_s24 }
 0xaf0   :  { %956 = vrot.lane.b32.xlu0 %v877_v17, %s2929_s25 }
 0xaf3   :  { %934 = vrot.lane.b32.xlu1 %v878_v16, %s2916_s15 }
 0xaf4   :  { %946 = vrot.lane.b32.xlu0 %v878_v16, %s2928_s24 }
 0xaf7   :  { %942 = vrot.lane.b32.xlu1 %v876_v3, %s2928_s24 }
 0xaf8   :  { %954 = vrot.lane.b32.xlu0 %v876_v3, %s2929_s25 }
 0xafb   :  { %958 = vrot.lane.b32.xlu1 %v878_v16, %s2929_s25 }
 0xafc   :  { %970 = vrot.lane.b32.xlu0 %v878_v16, %s2931_s18 }
 0xaff   :  { %968 = vrot.lane.b32.xlu1 %v877_v17, %s2931_s18 }
 0xb00   :  { %1078 = vperm.xlu0 %2804, %v2895_v24  }
 0xb03   :  { %966 = vrot.lane.b32.xlu1 %v876_v3, %s2931_s18 }
 0xb04   :  { %2807 = vset.pattern.permute.xlu0 %v2932_v25 }
 0xb05   :  { %1096 = vperm.xlu0 %2807, %v2896_v26  }
 0xb07   :  { %1082 = vperm.xlu1 %2805, %v2896_v26  }
 0xb0b   :  { %2806 = vset.pattern.permute.xlu1 %v2932_v25  ;;  %v2850_v25 = vld [vmem:[%s3922_s1 + $0x50] ss:$8 sps:$4 sm:$0xff]  }
 0xb0c   :  { %1092 = vperm.xlu1 %2806, %v2895_v24  }
 0xb41   :  { %v883_v29 = vpop.permute.xlu0 %882  ;;  %v895_v31 = vpop.permute.xlu1 %894 }
 0xb45   :  { %v907_v32 = vpop.permute.xlu0 %906  ;;  %v897_v39 = vpop.permute.xlu1 %896 }
 0xb46   :  { %v901_v56 = vsel %vm900_vm10, %v895_v31, %v897_v39 }
 0xb49   :  { %v885_v36 = vpop.permute.xlu0 %884  ;;  %v921_v41 = vpop.permute.xlu1 %920 }
 0xb4a   :  { %v889_v51 = vsel %vm888_vm8, %v883_v29, %v885_v36 }
 0xb4d   :  { %v909_v40 = vpop.permute.xlu0 %908 }
 0xb4e   :  { %v913_v0 = vsel %vm912_vm11, %v907_v32, %v909_v40 }
 0xb51   :  { %v933_v42 = vpop.permute.xlu0 %932 }
 0xb55   :  { %v887_v44 = vpop.permute.xlu1 %886 }
 0xb56   :  { %v899_v45 = vpop.permute.xlu0 %898  ;;  %1039 = vmatpush1.bf16.msra.mxu0 %v887_v44  ;;  %v890_v49 = vsel %vm888_vm8, %v885_v36, %v887_v44 }
 0xb57   :  { %995 = vmatprep.subr.bf16.mxu1 %v890_v49  ;;  %v902_v52 = vsel %vm900_vm10, %v897_v39, %v899_v45  ;;  %1040 = vmatprep.subr.bf16.mxu0 %v2899_v1  ;;  %v1127_v39 = vsub.s32 2, %v2973_v2 }
 0xb58   :  { %996 = vmatpush1.bf16.msra.mxu1 %v889_v51 }
 0xb59   :  { %997 = vmatprep.subr.bf16.mxu1 %v902_v52  ;;  %v919_v53 = vpop.permute.xlu1 %918 }
 0xb5a   :  { %v931_v55 = vpop.permute.xlu0 %930  ;;  %1041 = vmatpush1.bf16.msra.mxu0 %v899_v45  ;;  %v925_v11 = vsel %vm924_vm14, %v919_v53, %v921_v41  ;;  %v1131_v53 = vsub.s32 6, %v2973_v2 }
 0xb5b   :  { %1042 = vmatprep.subr.bf16.mxu0 %v2899_v1  ;;  %v937_v14 = vsel %vm936_vm15, %v931_v55, %v933_v42 }
 0xb5c   :  { %998 = vmatpush1.bf16.msra.mxu1 %v901_v56 }
 0xb5d   :  { %v911_v57 = vpop.permute.xlu1 %910 }
 0xb5e   :  { %v923_v58 = vpop.permute.xlu0 %922  ;;  %1043 = vmatpush1.bf16.msra.mxu0 %v911_v57  ;;  %v914_v59 = vsel %vm912_vm11, %v909_v40, %v911_v57  ;;  %v27_v40 = vld [vmem:[%s3920_s3 + $0x8] sm:$0x7] }
 0xb5f   :  { %999 = vmatprep.subr.bf16.mxu1 %v914_v59  ;;  %v926_v9 = vsel %vm924_vm14, %v921_v41, %v923_v58  ;;  %1044 = vmatprep.subr.bf16.mxu0 %v2899_v1  ;;  %v1136_v44 = vrot.slane %v27_v40, %v1127_v39 }
 0xb60   :  { %1000 = vmatpush1.bf16.msra.mxu1 %v913_v0  ;;  %v2897_v0 = vld [vmem:[%s3920_s3] sm:$0x77] }
 0xb61   :  { %1001 = vmatprep.subr.bf16.mxu1 %v926_v9  ;;  %v945_v60 = vpop.permute.xlu1 %944  ;;  %v1128_v9 = vrot.slane %v2897_v0, %v1127_v39 }
 0xb62   :  { %v957_v63 = vpop.permute.xlu0 %956  ;;  %1045 = vmatpush1.bf16.msra.mxu0 %v923_v58  ;;  %v3387_v58 = vrot.slane %v1136_v44, %v1127_v39 }
 0xb63   :  { %1046 = vmatprep.subr.bf16.mxu0 %v2899_v1 }
 0xb64   :  { %1002 = vmatpush1.bf16.msra.mxu1 %v925_v11 }
 0xb65   :  { %v935_v12 = vpop.permute.xlu1 %934 }
 0xb66   :  { %v947_v13 = vpop.permute.xlu0 %946  ;;  %1047 = vmatpush1.bf16.msra.mxu0 %v935_v12  ;;  %v938_v3 = vsel %vm936_vm15, %v933_v42, %v935_v12  ;;  %v1132_v12 = vrot.slane %v2897_v0, %v1131_v53 }
 0xb67   :  { %1003 = vmatprep.subr.bf16.mxu1 %v938_v3  ;;  %v950_v17 = vsel %vm948_vm3, %v945_v60, %v947_v13  ;;  %1048 = vmatprep.subr.bf16.mxu0 %v2899_v1 }
 0xb68   :  { %1004 = vmatpush1.bf16.msra.mxu1 %v937_v14  ;;  %v3404_v40 = vrot.slane %v1132_v12, %v1127_v39 }
 0xb69   :  { %1005 = vmatprep.subr.bf16.mxu1 %v950_v17  ;;  %v943_v18 = vpop.permute.xlu1 %942 }
 0xb6a   :  { %v949_v20 = vsel %vm948_vm3, %v943_v18, %v945_v60  ;;  %1049 = vmatpush1.bf16.msra.mxu0 %v947_v13  ;;  %v955_v15 = vpop.permute.xlu0 %954 }
 0xb6b   :  { %1050 = vmatprep.subr.bf16.mxu0 %v2899_v1  ;;  %v961_v22 = vsel %vm458_vm13, %v955_v15, %v957_v63 }
 0xb6c   :  { %1006 = vmatpush1.bf16.msra.mxu1 %v949_v20 }
 0xb6d   :  { %v959_v16 = vpop.permute.xlu1 %958 }
 0xb6e   :  { %1051 = vmatpush1.bf16.msra.mxu0 %v959_v16  ;;  %v962_v21 = vsel %vm458_vm13, %v957_v63, %v959_v16  ;;  %v971_v23 = vpop.permute.xlu0 %970 }
 0xb6f   :  { %1007 = vmatprep.subr.bf16.mxu1 %v962_v21  ;;  %1052 = vmatprep.subr.bf16.mxu0 %v2899_v1 }
 0xb70   :  { %1008 = vmatpush1.bf16.msra.mxu1 %v961_v22 }
 0xb71   :  { %v969_v24 = vpop.permute.xlu1 %968 }
 0xb72   :  { %1053 = vmatpush1.bf16.msra.mxu0 %v971_v23  ;;  %v974_v26 = vsel %vm972_vm4, %v969_v24, %v971_v23  ;;  %v3400_v23 = vrot.slane %v1128_v9, %v1127_v39 }
 0xb73   :  { %1009 = vmatprep.subr.bf16.mxu1 %v974_v26  ;;  %1324 = vmatprep.subr.bf16.mxu0 %v2899_v1 }
 0xb75   :  { %v967_v29 = vpop.permute.xlu1 %966  ;;  %1069 = vmatmul.mubr.bf16.vlgmr.msra.gmra.mrb[20].mxu0 %v2850_v25 }
 0xb76   :  { %v973_v31 = vsel %vm972_vm4, %v967_v29, %v969_v24 }
 0xb77   :  { %1010 = vmatpush1.bf16.msra.mxu1 %v973_v31 }
 0xb7a   :  { %1026 = vmatmul.mubr.bf16.vlgmr.msra.gmra.mrb[12].mxu1 %v2850_v25 }
 0xb7f   :  { %v3373_v36 = vpop.permute.xlu0 %1078 }
 0xb84   :  { %v3382_v52 = vpop.permute.xlu0 %1096 }
 0xb86   :  { %v3371_v32 = vpop.permute.xlu1 %1082 }
 0xb8b   :  { %v3379_v42 = vpop.permute.xlu1 %1092 }
 0xc48   :  { %v1070_v41 = vpop.f32.mrb[20].mxu0 }
 0xc49   :  { %v1087_v45 = vmul.f32 %v3373_v36, %v1070_v41  ;;  %v1072_v49 = vpop.f32.mrb[21].mxu0 }
 0xc4a   :  { %v1073_v51 = vpop.f32.mrb[22].mxu0 }
 0xc4b   :  { %v1090_v55 = vmul.f32 %v3371_v32, %v1073_v51  ;;  %v1075_v56 = vpop.f32.mrb[23].mxu0  ;;  %v1101_v57 = vadd.f32 %v3379_v42, %v1087_v45 }
 0xc4d   :  { %v1027_v59 = vpop.f32.mrb[12].mxu1  ;;  %v1104_v60 = vadd.f32 %v3382_v52, %v1090_v55  ;;  %vm1107_vm7 = vcmp.ge.f32.partialorder %v1101_v57, 0.0  ;;  %v1113_v63 = vmul.f32 0.3, %v1101_v57 }
 0xc4e   :  { %v1085_v11 = vmul.f32 %v3373_v36, %v1027_v59  ;;  %v1029_v2 = vpop.f32.mrb[13].mxu1 }
 0xc4f   :  { %v1086_v13 = vmul.f32 %v3373_v36, %v1029_v2  ;;  %v1031_v3 = vpop.f32.mrb[14].mxu1  ;;  %vm1110_vm12 = vcmp.ge.f32.partialorder %v1104_v60, 0.0  ;;  %v1116_v14 = vmul.f32 0.3, %v1104_v60  ;;  %v1119_v17 = vsel %vm1107_vm7, %v1101_v57, %v1113_v63  ;;  %v3419_v63 = vld [vmem:[%s3921_s0 + $0x18] sm:$0xff] }
 0xc50   :  { %v1099_v18 = vadd.f32 %v3379_v42, %v1085_v11  ;;  %v1088_v20 = vmul.f32 %v3371_v32, %v1031_v3  ;;  %v1033_v15 = vpop.f32.mrb[15].mxu1  ;;  %v1154_v16 = vmul.f32 %v3387_v58, %v1119_v17  ;;  %v1386_v12 = vmul.f32 %v3419_v63, %v2994_v7 }
 0xc51   :  { %v1100_v21 = vadd.f32 %v3379_v42, %v1086_v13  ;;  %v1089_v22 = vmul.f32 %v3371_v32, %v1033_v15  ;;  %v1122_v24 = vsel %vm1110_vm12, %v1104_v60, %v1116_v14  ;;  %v3414_v60 = vld [vmem:[%s3921_s0 + $0x10] sm:$0xff]  ;;  %vm3938_vm12 = vmmov 0  }
 0xc52   :  { %vm1105_vm9 = vcmp.ge.f32.partialorder %v1099_v18, 0.0  ;;  %v1111_v25 = vmul.f32 0.3, %v1099_v18  ;;  %v1102_v26 = vadd.f32 %v3382_v52, %v1088_v20  ;;  %v1157_v29 = vmul.f32 %v3387_v58, %v1122_v24 }
 0xc53   :  { %vm1106_vm7 = vcmp.ge.f32.partialorder %v1100_v21, 0.0  ;;  %v1112_v31 = vmul.f32 0.3, %v1100_v21  ;;  %v1103_v41 = vadd.f32 %v3382_v52, %v1089_v22  ;;  %v1385_v2 = vmul.f32 %v3414_v60, %v2994_v7  ;;  %v3462_v22 = vld [vmem:[%s3922_s1 + $0x60] sm:$0xff] }
 0xc54   :  { %vm1108_vm5 = vcmp.ge.f32.partialorder %v1102_v26, 0.0  ;;  %v1114_v44 = vmul.f32 0.3, %v1102_v26  ;;  %v1117_v45 = vsel %vm1105_vm9, %v1099_v18, %v1111_v25  ;;  %v1160_v49 = vpack.c.bf16 %v1157_v29, %v1154_v16  ;;  %v3855_v18 = vld [vmem:[%s3922_s1 + $0x60] sm:$0xff] }
 0xc55   :  { %v1118_v51 = vsel %vm1106_vm7, %v1100_v21, %v1112_v31  ;;  %vm1109_vm6 = vcmp.ge.f32.partialorder %v1103_v41, 0.0  ;;  %v1115_v53 = vmul.f32 0.3, %v1103_v41  ;;  %v1152_v57 = vmul.f32 %v3400_v23, %v1117_v45 }
 0xc56   :  { %v1120_v55 = vsel %vm1108_vm5, %v1102_v26, %v1114_v44  ;;  %v1153_v0 = vmul.f32 %v3404_v40, %v1118_v51  ;;  %v1387_v13 = vpack.c.bf16 %v1386_v12, %v1385_v2  ;;  %vm1170_vm5 = vcmask 154624  }
 0xc57   :  { %v1121_v56 = vsel %vm1109_vm6, %v1103_v41, %v1115_v53  ;;  %v1155_v59 = vmul.f32 %v3400_v23, %v1120_v55  ;;  %vm3431_vm6 = vmneg %vm1170_vm5  ;;  %vm3935_vm9 = vcmask 416768   ;;  %v2623_v24 = vcombine.high %v3462_v22, %v3462_v22 }
 0xc58   :  { %v1156_v39 = vmul.f32 %v3404_v40, %v1121_v56 }
 0xc59   :  { %v1158_v9 = vpack.c.bf16 %v1155_v59, %v1152_v57  ;;  %2626 = vmatprep.mubr.msk.bf16.mxu1 %vm83_vm2, %v2623_v24  ;;  %2627 = vmatprep.mubr.msk.bf16.mxu0 %vm83_vm2, %v2623_v24 }
 0xc5a   :  { %v1159_v11 = vpack.c.bf16 %v1156_v39, %v1153_v0 }
 0xc5b   :  { %1164 = vrot.lane.b32.xlu0 %v1158_v9, %s2933_s26 }
 0xc5c   :  { %1166 = vrot.lane.b32.xlu1 %v1159_v11, %s2933_s26 }
 0xc60   :  { %1168 = vrot.lane.b32.xlu1 %v1160_v49, %s2933_s26 }
 0xc64   :  { %1389 = vrot.lane.b32.xlu1 %v1387_v13, %s2900_s27 }
 0xccd   :  { %v1165_v3 = vpop.permute.xlu0 %1164 }
 0xcce   :  { %v1176_v14 = vsel %vm1170_vm5, 0, %v1165_v3  ;;  %v1167_v17 = vpop.permute.xlu1 %1166 }
 0xccf   :  { %v1171_v20 = vsel %vm1170_vm5, %v1165_v3, %v1167_v17  ;;  %1184 = vrot.lane.b32.xlu0 %v1176_v14, %s2902_s29  ;;  %1195 = vrot.lane.b32.xlu1 %v1176_v14, %s2901_s28 }
 0xcd0   :  { %1283 = vmatprep.subr.bf16.mxu1 %v1171_v20 }
 0xcd1   :  { %2625 = vmatpush1.bf16.msk.msra.mxu1 %vm3431_vm6, %v1165_v3 }
 0xcd2   :  { %v1169_v15 = vpop.permute.xlu1 %1168 }
 0xcd3   :  { %v1172_v16 = vsel %vm1170_vm5, %v1167_v17, %v1169_v15  ;;  %1206 = vrot.lane.b32.xlu0 %v1176_v14, %s2926_s22  ;;  %1197 = vrot.lane.b32.xlu1 %v1171_v20, %s2901_s28 }
 0xcd4   :  { %v1180_v21 = vsel %vm3935_vm9, %v1172_v16, 0 }
 0xcd5   :  { %1325 = vmatpush1.bf16.msra.mxu0 %v1180_v21 }
 0xcd6   :  { %1326 = vmatprep.subr.bf16.mxu0 %v2899_v1  ;;  %v1390_v25 = vpop.permute.xlu1 %1389 }
 0xcd7   :  { %1186 = vrot.lane.b32.xlu0 %v1171_v20, %s2902_s29  ;;  %1219 = vrot.lane.b32.xlu1 %v1171_v20, %s2927_s23  ;;  %v1392_v26 = vsel %vm40_vm0, 0, %v1390_v25 }
 0xcd8   :  { %v3476_v29 = vsel %vm44_vm1, %v1392_v26, 0 }
 0xcdb   :  { %1208 = vrot.lane.b32.xlu0 %v1171_v20, %s2926_s22  ;;  %1188 = vrot.lane.b32.xlu1 %v1180_v21, %s2902_s29 }
 0xcdf   :  { %1230 = vrot.lane.b32.xlu0 %v1171_v20, %s2916_s15  ;;  %1217 = vrot.lane.b32.xlu1 %v1176_v14, %s2927_s23 }
 0xce3   :  { %1199 = vrot.lane.b32.xlu0 %v1180_v21, %s2901_s28  ;;  %1210 = vrot.lane.b32.xlu1 %v1180_v21, %s2926_s22 }
 0xce7   :  { %1228 = vrot.lane.b32.xlu0 %v1176_v14, %s2916_s15  ;;  %1241 = vrot.lane.b32.xlu1 %v1171_v20, %s2928_s24 }
 0xceb   :  { %1221 = vrot.lane.b32.xlu0 %v1180_v21, %s2927_s23  ;;  %1232 = vrot.lane.b32.xlu1 %v1180_v21, %s2916_s15 }
 0xcef   :  { %1252 = vrot.lane.b32.xlu0 %v1171_v20, %s2929_s25  ;;  %1239 = vrot.lane.b32.xlu1 %v1176_v14, %s2928_s24 }
 0xcf3   :  { %1243 = vrot.lane.b32.xlu0 %v1180_v21, %s2928_s24  ;;  %1254 = vrot.lane.b32.xlu1 %v1180_v21, %s2929_s25 }
 0xcf7   :  { %1250 = vrot.lane.b32.xlu0 %v1176_v14, %s2929_s25  ;;  %1263 = vrot.lane.b32.xlu1 %v1171_v20, %s2931_s18 }
 0xcfb   :  { %1265 = vrot.lane.b32.xlu0 %v1180_v21, %s2931_s18  ;;  %1261 = vrot.lane.b32.xlu1 %v1176_v14, %s2931_s18 }
 0xcff   :  { %1399 = vrot.lane.b32.xlu1 %v3476_v29, %s2901_s28  ;;  %1396 = vrot.lane.b32.xlu0 %v3476_v29, %s2902_s29 }
 0xd03   :  { %1405 = vrot.lane.b32.xlu1 %v3476_v29, %s2904_s7  ;;  %1402 = vrot.lane.b32.xlu0 %v3476_v29, %s2903_s30 }
 0xd07   :  { %1411 = vrot.lane.b32.xlu1 %v3476_v29, %s2906_s9  ;;  %1408 = vrot.lane.b32.xlu0 %v3476_v29, %s2905_s8 }
 0xd0b   :  { %1417 = vrot.lane.b32.xlu1 %v3476_v29, %s2908_s11  ;;  %1414 = vrot.lane.b32.xlu0 %v3476_v29, %s2907_s10 }
 0xd41   :  { %v1185_v31 = vpop.permute.xlu0 %1184  ;;  %v1196_v41 = vpop.permute.xlu1 %1195 }
 0xd45   :  { %v1207_v44 = vpop.permute.xlu0 %1206  ;;  %v1198_v45 = vpop.permute.xlu1 %1197 }
 0xd46   :  { %v1201_v2 = vsel %vm900_vm10, %v1196_v41, %v1198_v45 }
 0xd49   :  { %v1187_v49 = vpop.permute.xlu0 %1186  ;;  %v1220_v51 = vpop.permute.xlu1 %1219 }
 0xd4a   :  { %v1190_v57 = vsel %vm888_vm8, %v1185_v31, %v1187_v49 }
 0xd4d   :  { %v1209_v53 = vpop.permute.xlu0 %1208  ;;  %v1189_v55 = vpop.permute.xlu1 %1188 }
 0xd4e   :  { %1327 = vmatpush1.bf16.msra.mxu0 %v1189_v55  ;;  %v1191_v56 = vsel %vm888_vm8, %v1187_v49, %v1189_v55  ;;  %v1212_v14 = vsel %vm912_vm11, %v1207_v44, %v1209_v53 }
 0xd4f   :  { %1285 = vmatprep.subr.bf16.mxu1 %v1191_v56  ;;  %1328 = vmatprep.subr.bf16.mxu0 %v2899_v1 }
 0xd50   :  { %1286 = vmatpush1.bf16.msra.mxu1 %v1190_v57 }
 0xd51   :  { %v1231_v59 = vpop.permute.xlu0 %1230  ;;  %v1218_v0 = vpop.permute.xlu1 %1217 }
 0xd52   :  { %v1223_v16 = vsel %vm924_vm14, %v1218_v0, %v1220_v51 }
 0xd55   :  { %v1200_v39 = vpop.permute.xlu0 %1199  ;;  %v1211_v9 = vpop.permute.xlu1 %1210 }
 0xd56   :  { %1329 = vmatpush1.bf16.msra.mxu0 %v1200_v39  ;;  %v1202_v11 = vsel %vm900_vm10, %v1198_v45, %v1200_v39  ;;  %v1213_v12 = vsel %vm912_vm11, %v1209_v53, %v1211_v9  ;;  %v2622_v39 = vcombine.low %v3462_v22, %v3462_v22 }
 0xd57   :  { %1287 = vmatprep.subr.bf16.mxu1 %v1202_v11  ;;  %1330 = vmatprep.subr.bf16.mxu0 %v2899_v1 }
 0xd58   :  { %1288 = vmatpush1.bf16.msra.mxu1 %v1201_v2 }
 0xd59   :  { %v1229_v13 = vpop.permute.xlu0 %1228  ;;  %1289 = vmatprep.subr.bf16.mxu1 %v1213_v12  ;;  %v1242_v3 = vpop.permute.xlu1 %1241 }
 0xd5a   :  { %1331 = vmatpush1.bf16.msra.mxu0 %v1211_v9  ;;  %v1234_v26 = vsel %vm936_vm15, %v1229_v13, %v1231_v59  ;;  %v2853_v9 = vld [vmem:[%s3922_s1 + $0x4] ss:$8 sps:$4 sm:$0xff]  }
 0xd5b   :  { %1332 = vmatprep.subr.bf16.mxu0 %v2899_v1 }
 0xd5c   :  { %1290 = vmatpush1.bf16.msra.mxu1 %v1212_v14 }
 0xd5d   :  { %v1222_v17 = vpop.permute.xlu0 %1221  ;;  %v1233_v20 = vpop.permute.xlu1 %1232 }
 0xd5e   :  { %1333 = vmatpush1.bf16.msra.mxu0 %v1222_v17  ;;  %v1224_v15 = vsel %vm924_vm14, %v1220_v51, %v1222_v17  ;;  %v1235_v21 = vsel %vm936_vm15, %v1231_v59, %v1233_v20  ;;  %v2855_v17 = vld [vmem:[%s3922_s1] ss:$8 sps:$4 sm:$0xff]  }
 0xd5f   :  { %1291 = vmatprep.subr.bf16.mxu1 %v1224_v15  ;;  %1334 = vmatprep.subr.bf16.mxu0 %v2899_v1 }
 0xd60   :  { %1292 = vmatpush1.bf16.msra.mxu1 %v1223_v16 }
 0xd61   :  { %v1253_v24 = vpop.permute.xlu0 %1252  ;;  %1293 = vmatprep.subr.bf16.mxu1 %v1235_v21  ;;  %v1240_v25 = vpop.permute.xlu1 %1239 }
 0xd62   :  { %1335 = vmatpush1.bf16.msra.mxu0 %v1233_v20  ;;  %v1245_v45 = vsel %vm948_vm3, %v1240_v25, %v1242_v3 }
 0xd63   :  { %1336 = vmatprep.subr.bf16.mxu0 %v2899_v1 }
 0xd64   :  { %1294 = vmatpush1.bf16.msra.mxu1 %v1234_v26 }
 0xd65   :  { %v1244_v31 = vpop.permute.xlu0 %1243  ;;  %v1255_v41 = vpop.permute.xlu1 %1254 }
 0xd66   :  { %1337 = vmatpush1.bf16.msra.mxu0 %v1244_v31  ;;  %v1246_v44 = vsel %vm948_vm3, %v1242_v3, %v1244_v31  ;;  %v1257_v49 = vsel %vm458_vm13, %v1253_v24, %v1255_v41 }
 0xd67   :  { %1295 = vmatprep.subr.bf16.mxu1 %v1246_v44  ;;  %1338 = vmatprep.subr.bf16.mxu0 %v2899_v1 }
 0xd68   :  { %1296 = vmatpush1.bf16.msra.mxu1 %v1245_v45 }
 0xd69   :  { %v1251_v51 = vpop.permute.xlu0 %1250  ;;  %1297 = vmatprep.subr.bf16.mxu1 %v1257_v49  ;;  %v1264_v53 = vpop.permute.xlu1 %1263 }
 0xd6a   :  { %v1256_v55 = vsel %vm458_vm13, %v1251_v51, %v1253_v24  ;;  %1339 = vmatpush1.bf16.msra.mxu0 %v1255_v41 }
 0xd6b   :  { %1340 = vmatprep.subr.bf16.mxu0 %v2899_v1 }
 0xd6c   :  { %1298 = vmatpush1.bf16.msra.mxu1 %v1256_v55 }
 0xd6d   :  { %v1266_v56 = vpop.permute.xlu0 %1265  ;;  %v1262_v57 = vpop.permute.xlu1 %1261 }
 0xd6e   :  { %v1267_v59 = vsel %vm972_vm4, %v1262_v57, %v1264_v53  ;;  %1341 = vmatpush1.bf16.msra.mxu0 %v1266_v56  ;;  %v1268_v0 = vsel %vm972_vm4, %v1264_v53, %v1266_v56 }
 0xd6f   :  { %1299 = vmatprep.subr.bf16.mxu1 %v1268_v0  ;;  %1534 = vmatprep.subr.bf16.mxu0 %v2899_v1 }
 0xd70   :  { %1300 = vmatpush1.bf16.msra.mxu1 %v1267_v59 }
 0xd71   :  { %1434 = vmatprep.subr.bf16.mxu1 %v2899_v1  ;;  %1357 = vmatmul.mubr.bf16.vlgmr.msra.gmra.mrb[24].mxu0 %v2622_v39  ;;  %v1397_v11 = vpop.permute.xlu0 %1396  ;;  %v1400_v22 = vpop.permute.xlu1 %1399 }
 0xd73   :  { %1316 = vmatmul.mubr.bf16.vlgmr.msra.gmra.mrb[16].mxu1 %v2622_v39 }
 0xd74   :  { %1435 = vmatpush1.bf16.msra.mxu1 %v3476_v29  ;;  %2632 = vmatprep.mubr.msk.bf16.mxu1 %vm83_vm2, %v2853_v9 }
 0xd75   :  { %1436 = vmatprep.subr.bf16.mxu1 %v2899_v1  ;;  %v1403_v2 = vpop.permute.xlu0 %1402  ;;  %v1406_v12 = vpop.permute.xlu1 %1405 }
 0xd78   :  { %1437 = vmatpush1.bf16.msra.mxu1 %v1397_v11 }
 0xd79   :  { %1438 = vmatprep.subr.bf16.mxu1 %v2899_v1  ;;  %v1409_v29 = vpop.permute.xlu0 %1408  ;;  %v1412_v13 = vpop.permute.xlu1 %1411 }
 0xd7c   :  { %1439 = vmatpush1.bf16.msra.mxu1 %v1400_v22 }
 0xd7d   :  { %1440 = vmatprep.subr.bf16.mxu1 %v2899_v1  ;;  %v1415_v3 = vpop.permute.xlu0 %1414  ;;  %v1418_v14 = vpop.permute.xlu1 %1417 }
 0xd80   :  { %1441 = vmatpush1.bf16.msra.mxu1 %v1403_v2 }
 0xd81   :  { %1442 = vmatprep.subr.bf16.mxu1 %v2899_v1 }
 0xd84   :  { %1443 = vmatpush1.bf16.msra.mxu1 %v1406_v12 }
 0xd85   :  { %1444 = vmatprep.subr.bf16.mxu1 %v2899_v1 }
 0xd88   :  { %1445 = vmatpush1.bf16.msra.mxu1 %v1409_v29 }
 0xd89   :  { %1446 = vmatprep.subr.bf16.mxu1 %v2899_v1 }
 0xd8c   :  { %1447 = vmatpush1.bf16.msra.mxu1 %v1412_v13 }
 0xd8d   :  { %1448 = vmatprep.subr.bf16.mxu1 %v2899_v1 }
 0xd90   :  { %1449 = vmatpush1.bf16.msra.mxu1 %v1415_v3 }
 0xd91   :  { %1450 = vmatprep.subr.bf16.mxu1 %v2899_v1 }
 0xd94   :  { %1451 = vmatpush1.bf16.msra.mxu1 %v1418_v14 }
 0xd95   :  { %2729 = vmatprep.subr.bf16.mxu1 %v2912_v62 }
 0xd97   :  { %1467 = vmatmul.mubr.bf16.vlgmr.msra.gmra.mrb[20].mxu1 %v2855_v17 }
 0xd98   :  { %2733 = vmatprep.mubr.msk.bf16.mxu1 %vm3938_vm12, %v2912_v62 }
 0xe46   :  { %v3540_v20 = vpop.f32.mrb[16].mxu1 }
 0xe47   :  { %v3542_v15 = vpop.f32.mrb[17].mxu1 }
 0xe48   :  { %v1321_v16 = vpop.f32.mrb[18].mxu1 }
 0xe49   :  { %v1322_v21 = vpop.f32.mrb[19].mxu1  ;;  %v2858_v16 = vld [vmem:[%s3922_s1 + $0x10] ss:$8 sps:$4 sm:$0xff]  }
 0xe4a   :  { %v2859_v21 = vld [vmem:[%s3924_s4] sm:$0xff]  }
 0xe4b   :  { %2730 = vmatpush3.bf16.msra.mxu1 %v2859_v21 }
 0xe4c   :  { %2731 = vmatprep.subr.bf16.mxu1 %v2912_v62 }
 0xe6a   :  { %v1468_v24 = vpop.f32.mrb[20].mxu1 }
 0xe6b   :  { %v1475_v25 = vmul.f32 %v1468_v24, %v3040_v27  ;;  %v1470_v26 = vpop.f32.mrb[21].mxu1  ;;  %v2860_v24 = vld [vmem:[%s3924_s4 + $0x8] ss:$0 sps:$4 sm:$0xff]  }
 0xe6c   :  { %v1471_v31 = vpop.f32.mrb[22].mxu1 }
 0xe6d   :  { %v1477_v41 = vadd.f32 %v1475_v25, %v3042_v28  ;;  %v1476_v44 = vmul.f32 %v1471_v31, %v3044_v30  ;;  %v1473_v45 = vpop.f32.mrb[23].mxu1 }
 0xe6f   :  { %vm1479_vm7 = vcmp.ge.f32.partialorder %v1477_v41, 0.0  ;;  %v1481_v49 = vmul.f32 0.3, %v1477_v41  ;;  %v1478_v51 = vadd.f32 %v1476_v44, %v3049_v37  ;;  %v3566_v37 = vpop.f32.mrb[24].mxu0 }
 0xe70   :  { %v1360_v39 = vpop.f32.mrb[25].mxu0 }
 0xe71   :  { %v1483_v53 = vsel %vm1479_vm7, %v1477_v41, %v1481_v49  ;;  %vm1480_vm9 = vcmp.ge.f32.partialorder %v1478_v51, 0.0  ;;  %v1482_v55 = vmul.f32 0.3, %v1478_v51  ;;  %v1361_v9 = vpop.f32.mrb[26].mxu0  ;;  %vm3940_vm7 = vcmask 195584  }
 0xe72   :  { %v1485_v57 = vmul.f32 %v1483_v53, %v2994_v7  ;;  %v1362_v11 = vpop.f32.mrb[27].mxu0 }
 0xe73   :  { %v1484_v56 = vsel %vm1480_vm9, %v1478_v51, %v1482_v55 }
 0xe74   :  { %v1486_v59 = vmul.f32 %v1484_v56, %v2994_v7  ;;  %v2856_v7 = vld [vmem:[%s3922_s1 + $0x14] ss:$8 sps:$4 sm:$0xff]  }
 0xe75   :  { %2637 = vmatprep.mubr.msk.bf16.mxu0 %vm83_vm2, %v2856_v7 }
 0xe76   :  { %v1487_v27 = vpack.c.bf16 %v1486_v59, %v1485_v57 }
 0xe78   :  { %1489 = vrot.lane.b32.xlu0 %v1487_v27, %s2900_s27 }
 0xeea   :  { %v1490_v0 = vpop.permute.xlu0 %1489 }
 0xeeb   :  { %v1492_v28 = vsel %vm40_vm0, 0, %v1490_v0  ;;  %vm3939_vm0 = vcmask 1043456  }
 0xeec   :  { %v1493_v30 = vsel %vm44_vm1, %v1492_v28, 0  ;;  %v1604_v25 = vsel %vm3939_vm0, %v2860_v24, 0 }
 0xeed   :  { %1499 = vrot.lane.b32.xlu0 %v1493_v30, %s2901_s28  ;;  %1496 = vrot.lane.b32.xlu1 %v1493_v30, %s2902_s29 }
 0xeee   :  { %1535 = vmatpush1.bf16.msra.mxu0 %v1493_v30  ;;  %2732 = vmatpush3.bf16.msra.mxu1 %v1604_v25 }
 0xeef   :  { %1536 = vmatprep.subr.bf16.mxu0 %v2899_v1  ;;  %1687 = vmatprep.subr.bf16.mxu1 %v2899_v1 }
 0xef1   :  { %1505 = vrot.lane.b32.xlu0 %v1493_v30, %s2904_s7  ;;  %1502 = vrot.lane.b32.xlu1 %v1493_v30, %s2903_s30 }
 0xef5   :  { %1511 = vrot.lane.b32.xlu0 %v1493_v30, %s2906_s9  ;;  %1508 = vrot.lane.b32.xlu1 %v1493_v30, %s2905_s8 }
 0xef9   :  { %1517 = vrot.lane.b32.xlu0 %v1493_v30, %s2908_s11  ;;  %1514 = vrot.lane.b32.xlu1 %v1493_v30, %s2907_s10 }
 0xf5f   :  { %v1497_v22 = vpop.permute.xlu1 %1496  ;;  %v1500_v2 = vpop.permute.xlu0 %1499 }
 0xf60   :  { %1537 = vmatpush1.bf16.msra.mxu0 %v1497_v22 }
 0xf61   :  { %1538 = vmatprep.subr.bf16.mxu0 %v2899_v1 }
 0xf63   :  { %v1503_v12 = vpop.permute.xlu1 %1502  ;;  %v1506_v29 = vpop.permute.xlu0 %1505 }
 0xf64   :  { %1539 = vmatpush1.bf16.msra.mxu0 %v1500_v2 }
 0xf65   :  { %1540 = vmatprep.subr.bf16.mxu0 %v2899_v1 }
 0xf67   :  { %v1509_v13 = vpop.permute.xlu1 %1508  ;;  %v1512_v3 = vpop.permute.xlu0 %1511 }
 0xf68   :  { %1541 = vmatpush1.bf16.msra.mxu0 %v1503_v12 }
 0xf69   :  { %1542 = vmatprep.subr.bf16.mxu0 %v2899_v1 }
 0xf6b   :  { %v1515_v14 = vpop.permute.xlu1 %1514  ;;  %v1518_v17 = vpop.permute.xlu0 %1517 }
 0xf6c   :  { %1543 = vmatpush1.bf16.msra.mxu0 %v1506_v29  ;;  %v2863_v29 = vld [vmem:[%s3922_s1 + $0x20] ss:$8 sps:$4 sm:$0xff]  }
 0xf6d   :  { %1544 = vmatprep.subr.bf16.mxu0 %v2899_v1 }
 0xf70   :  { %1545 = vmatpush1.bf16.msra.mxu0 %v1509_v13 }
 0xf71   :  { %1546 = vmatprep.subr.bf16.mxu0 %v2899_v1 }
 0xf74   :  { %1547 = vmatpush1.bf16.msra.mxu0 %v1512_v3 }
 0xf75   :  { %1548 = vmatprep.subr.bf16.mxu0 %v2899_v1 }
 0xf78   :  { %1549 = vmatpush1.bf16.msra.mxu0 %v1515_v14 }
 0xf79   :  { %1550 = vmatprep.subr.bf16.mxu0 %v2899_v1 }
 0xf7c   :  { %1551 = vmatpush1.bf16.msra.mxu0 %v1518_v17 }
 0xf7d   :  { %1787 = vmatprep.subr.bf16.mxu0 %v2899_v1 }
 0xf7f   :  { %1567 = vmatmul.mubr.bf16.vlgmr.msra.gmra.mrb[28].mxu0 %v2858_v16 }
0x1052   :  { %v1568_v26 = vpop.f32.mrb[28].mxu0 }
0x1053   :  { %v1575_v31 = vmul.f32 %v1568_v26, %v3097_v4  ;;  %v1570_v41 = vpop.f32.mrb[29].mxu0 }
0x1054   :  { %v1571_v44 = vpop.f32.mrb[30].mxu0 }
0x1055   :  { %v1577_v45 = vadd.f32 %v1575_v31, %v3099_v8  ;;  %v1576_v49 = vmul.f32 %v1571_v44, %v3101_v10  ;;  %v1573_v51 = vpop.f32.mrb[31].mxu0 }
0x1056   :  { %v2864_v51 = vld [vmem:[%s3922_s1 + $0x34] ss:$8 sps:$4 sm:$0xff]  }
0x1057   :  { %v1579_v53 = vadd.f32 %v3414_v60, %v1577_v45  ;;  %v1578_v55 = vadd.f32 %v1576_v49, %v3106_v19  ;;  %v2861_v19 = vld [vmem:[%s3922_s1 + $0x24] ss:$8 sps:$4 sm:$0xff]   ;;  %2650 = vmatprep.mubr.msk.bf16.mxu0 %vm83_vm2, %v2864_v51  ;;  %v2879_v51 = vld [vmem:[%s3925_s5 + $0x48] ss:$12 sps:$4 sm:$0xff]  }
0x1059   :  { %v1583_v56 = vmul.f32 0.3, %v1579_v53  ;;  %v1580_v57 = vadd.f32 %v3419_v63, %v1578_v55  ;;  %vm1581_vm1 = vcmp.ge.f32.partialorder %v1579_v53, 0.0 }
0x105b   :  { %vm1582_vm9 = vcmp.ge.f32.partialorder %v1580_v57, 0.0  ;;  %v1584_v59 = vmul.f32 0.3, %v1580_v57  ;;  %v1585_v27 = vsel %vm1581_vm1, %v1579_v53, %v1583_v56 }
0x105d   :  { %v1586_v0 = vsel %vm1582_vm9, %v1580_v57, %v1584_v59  ;;  %vm3942_vm9 = vcmask 89088  }
0x105e   :  { %v1587_v4 = vpack.c.bf16 %v1586_v0, %v1585_v27 }
0x1060   :  { %2734 = vmatmul.mubr.msk.bf16.vlgmr.msra.gmra.mrb[24].mxu1 %vm3940_vm7, %v1587_v4 }
0x1061   :  { %2645 = vmatprep.mubr.msk.bf16.mxu1 %vm83_vm2, %v2861_v19 }
0x1133   :  { %v1640_v28 = vpop.f32.mrb[24].mxu1 }
0x1134   :  { %v2735_v8 = vpop.f32.mrb[25].mxu1 }
0x1135   :  { %v1643_v30 = vpop.f32.mrb[26].mxu1 }
0x1136   :  { %v1647_v10 = vpack.c.bf16 %v1643_v30, %v1640_v28  ;;  %v2736_v7 = vpop.f32.mrb[27].mxu1  ;;  %v2866_v28 = vld [vmem:[%s3922_s1 + $0x30] ss:$8 sps:$4 sm:$0xff]  }
0x1138   :  { %1652 = vrot.lane.b32.xlu0 %v1647_v10, %s2901_s28  ;;  %1649 = vrot.lane.b32.xlu1 %v1647_v10, %s2902_s29 }
0x1139   :  { %1688 = vmatpush1.bf16.msra.mxu1 %v1647_v10 }
0x113a   :  { %1689 = vmatprep.subr.bf16.mxu1 %v2899_v1 }
0x113c   :  { %1658 = vrot.lane.b32.xlu0 %v1647_v10, %s2914_s13  ;;  %1655 = vrot.lane.b32.xlu1 %v1647_v10, %s2915_s14 }
0x1140   :  { %1664 = vrot.lane.b32.xlu0 %v1647_v10, %s2916_s15  ;;  %1661 = vrot.lane.b32.xlu1 %v1647_v10, %s2906_s9 }
0x1144   :  { %1670 = vrot.lane.b32.xlu0 %v1647_v10, %s2917_s16  ;;  %1667 = vrot.lane.b32.xlu1 %v1647_v10, %s2918_s17 }
0x11aa   :  { %v1650_v60 = vpop.permute.xlu1 %1649  ;;  %v1653_v63 = vpop.permute.xlu0 %1652 }
0x11ab   :  { %1690 = vmatpush1.bf16.msra.mxu1 %v1650_v60 }
0x11ac   :  { %1691 = vmatprep.subr.bf16.mxu1 %v2899_v1 }
0x11ae   :  { %v1656_v39 = vpop.permute.xlu1 %1655  ;;  %v1659_v9 = vpop.permute.xlu0 %1658 }
0x11af   :  { %1692 = vmatpush1.bf16.msra.mxu1 %v1653_v63 }
0x11b0   :  { %1693 = vmatprep.subr.bf16.mxu1 %v2899_v1 }
0x11b2   :  { %v1662_v11 = vpop.permute.xlu1 %1661  ;;  %v1665_v22 = vpop.permute.xlu0 %1664 }
0x11b3   :  { %1694 = vmatpush1.bf16.msra.mxu1 %v1656_v39 }
0x11b4   :  { %1695 = vmatprep.subr.bf16.mxu1 %v2899_v1 }
0x11b6   :  { %v1668_v2 = vpop.permute.xlu1 %1667  ;;  %v1671_v12 = vpop.permute.xlu0 %1670 }
0x11b7   :  { %1696 = vmatpush1.bf16.msra.mxu1 %v1659_v9 }
0x11b8   :  { %1697 = vmatprep.subr.bf16.mxu1 %v2899_v1 }
0x11bb   :  { %1698 = vmatpush1.bf16.msra.mxu1 %v1662_v11 }
0x11bc   :  { %1699 = vmatprep.subr.bf16.mxu1 %v2899_v1 }
0x11bf   :  { %1700 = vmatpush1.bf16.msra.mxu1 %v1665_v22 }
0x11c0   :  { %1701 = vmatprep.subr.bf16.mxu1 %v2899_v1 }
0x11c3   :  { %1702 = vmatpush1.bf16.msra.mxu1 %v1668_v2 }
0x11c4   :  { %1703 = vmatprep.subr.bf16.mxu1 %v2899_v1 }
0x11c7   :  { %1704 = vmatpush1.bf16.msra.mxu1 %v1671_v12 }
0x11c8   :  { %1887 = vmatprep.subr.bf16.mxu1 %v2899_v1 }
0x11ca   :  { %1720 = vmatmul.mubr.bf16.vlgmr.msra.gmra.mrb[28].mxu1 %v2863_v29 }
0x129d   :  { %v1721_v13 = vpop.f32.mrb[28].mxu1 }
0x129e   :  { %v1728_v3 = vmul.f32 %v1721_v13, %v3142_v48  ;;  %v1723_v14 = vpop.f32.mrb[29].mxu1 }
0x129f   :  { %v1724_v17 = vpop.f32.mrb[30].mxu1  ;;  %v2875_v14 = vld [vmem:[%s3925_s5 + $0x1c] ss:$12 sps:$4 sm:$0xff]  }
0x12a0   :  { %v1730_v16 = vadd.f32 %v1728_v3, %v3144_v50  ;;  %v1729_v21 = vmul.f32 %v1724_v17, %v3140_v47  ;;  %v1726_v24 = vpop.f32.mrb[31].mxu1  ;;  %v2872_v3 = vld [vmem:[%s3925_s5 + $0x4] ss:$12 sps:$4 sm:$0xff]  }
0x12a1   :  { %v2873_v17 = vld [vmem:[%s3925_s5 + $0x18] ss:$12 sps:$4 sm:$0xff]  }
0x12a2   :  { %vm1732_vm0 = vcmp.ge.f32.partialorder %v1730_v16, 0.0  ;;  %v1734_v25 = vmul.f32 0.3, %v1730_v16  ;;  %v1731_v26 = vadd.f32 %v1729_v21, %v3147_v54 }
0x12a4   :  { %v3623_v31 = vsel %vm1732_vm0, %v1730_v16, %v1734_v25  ;;  %vm1733_vm1 = vcmp.ge.f32.partialorder %v1731_v26, 0.0  ;;  %v1735_v41 = vmul.f32 0.3, %v1731_v26 }
0x12a5   :  { %v1738_v48 = vmul.f32 %v3623_v31, %v3154_v61 }
0x12a6   :  { %v3625_v44 = vsel %vm1733_vm1, %v1731_v26, %v1735_v41  ;;  %vm3943_vm1 = vmmov %vm3942_vm9 }
0x12a7   :  { %v1739_v45 = vmul.f32 %v3625_v44, %v3154_v61 }
0x12a9   :  { %v1740_v50 = vpack.c.bf16 %v1739_v45, %v1738_v48 }
0x12ab   :  { %1742 = vrot.lane.b32.xlu1 %v1740_v50, %s3941_s21  ;;  %v2869_v50 = vld [vmem:[%s3922_s1 + $0x40] ss:$8 sps:$4 sm:$0xff]  }
0x131d   :  { %v1743_v47 = vpop.permute.xlu1 %1742 }
0x131e   :  { %v1745_v49 = vsel %vm3942_vm9, 0, %v1743_v47  ;;  %v2878_v47 = vld [vmem:[%s3925_s5 + $0x34] ss:$12 sps:$4 sm:$0xff]  }
0x131f   :  { %v1746_v54 = vsel %vm458_vm13, %v1745_v49, 0  ;;  %v2876_v49 = vld [vmem:[%s3925_s5 + $0x30] ss:$12 sps:$4 sm:$0xff]  }
0x1320   :  { %1752 = vrot.lane.b32.xlu1 %v1746_v54, %s2901_s28  ;;  %1749 = vrot.lane.b32.xlu0 %v1746_v54, %s2902_s29 }
0x1321   :  { %1788 = vmatpush1.bf16.msra.mxu0 %v1746_v54 }
0x1322   :  { %1789 = vmatprep.subr.bf16.mxu0 %v2899_v1 }
0x1324   :  { %1758 = vrot.lane.b32.xlu1 %v1746_v54, %s2914_s13  ;;  %1755 = vrot.lane.b32.xlu0 %v1746_v54, %s2915_s14 }
0x1328   :  { %1764 = vrot.lane.b32.xlu1 %v1746_v54, %s2916_s15  ;;  %1761 = vrot.lane.b32.xlu0 %v1746_v54, %s2906_s9 }
0x132c   :  { %1770 = vrot.lane.b32.xlu1 %v1746_v54, %s2917_s16  ;;  %1767 = vrot.lane.b32.xlu0 %v1746_v54, %s2918_s17  ;;  %v2881_v54 = vld [vmem:[%s3925_s5 + $0x4c] ss:$12 sps:$4 sm:$0xff]  }
0x1392   :  { %v1750_v53 = vpop.permute.xlu0 %1749  ;;  %v1753_v55 = vpop.permute.xlu1 %1752 }
0x1393   :  { %1790 = vmatpush1.bf16.msra.mxu0 %v1750_v53  ;;  %v2884_v53 = vld [vmem:[%s3925_s5 + $0x64] ss:$12 sps:$4 sm:$0xff]  }
0x1394   :  { %1791 = vmatprep.subr.bf16.mxu0 %v2899_v1 }
0x1396   :  { %v1756_v56 = vpop.permute.xlu0 %1755  ;;  %v1759_v57 = vpop.permute.xlu1 %1758 }
0x1397   :  { %1792 = vmatpush1.bf16.msra.mxu0 %v1753_v55  ;;  %v2882_v55 = vld [vmem:[%s3925_s5 + $0x60] ss:$12 sps:$4 sm:$0xff]  }
0x1398   :  { %1793 = vmatprep.subr.bf16.mxu0 %v2899_v1 }
0x139a   :  { %v1762_v59 = vpop.permute.xlu0 %1761  ;;  %v1765_v27 = vpop.permute.xlu1 %1764 }
0x139b   :  { %1794 = vmatpush1.bf16.msra.mxu0 %v1756_v56 }
0x139c   :  { %1795 = vmatprep.subr.bf16.mxu0 %v2899_v1 }
0x139e   :  { %v1768_v0 = vpop.permute.xlu0 %1767  ;;  %v1771_v4 = vpop.permute.xlu1 %1770 }
0x139f   :  { %1796 = vmatpush1.bf16.msra.mxu0 %v1759_v57 }
0x13a0   :  { %1797 = vmatprep.subr.bf16.mxu0 %v2899_v1 }
0x13a3   :  { %1798 = vmatpush1.bf16.msra.mxu0 %v1762_v59 }
0x13a4   :  { %1799 = vmatprep.subr.bf16.mxu0 %v2899_v1 }
0x13a7   :  { %1800 = vmatpush1.bf16.msra.mxu0 %v1765_v27 }
0x13a8   :  { %1801 = vmatprep.subr.bf16.mxu0 %v2899_v1 }
0x13ab   :  { %1802 = vmatpush1.bf16.msra.mxu0 %v1768_v0 }
0x13ac   :  { %1803 = vmatprep.subr.bf16.mxu0 %v2899_v1 }
0x13af   :  { %1804 = vmatpush1.bf16.msra.mxu0 %v1771_v4 }
0x13b0   :  { %2044 = vmatprep.subr.bf16.mxu0 %v2872_v3 }
0x13b2   :  { %1820 = vmatmul.mubr.bf16.vlgmr.msra.gmra.mrb[32].mxu0 %v2866_v28 }
0x13b3   :  { %2076 = vmatprep.mubr.bf16.mxu0 %v2899_v1 }
0x1485   :  { %v1821_v8 = vpop.f32.mrb[32].mxu0 }
0x1486   :  { %v1828_v30 = vmul.f32 %v1821_v8, %v3195_v34  ;;  %v1823_v10 = vpop.f32.mrb[33].mxu0 }
0x1487   :  { %v1824_v7 = vpop.f32.mrb[34].mxu0 }
0x1488   :  { %v1830_v19 = vadd.f32 %v1828_v30, %v3197_v35  ;;  %v1829_v60 = vmul.f32 %v1824_v7, %v3199_v6  ;;  %v1826_v63 = vpop.f32.mrb[35].mxu0 }
0x148a   :  { %vm1832_vm7 = vcmp.ge.f32.partialorder %v1830_v19, 0.0  ;;  %v1834_v39 = vmul.f32 0.3, %v1830_v19  ;;  %v1831_v9 = vadd.f32 %v1829_v60, %v3204_v43  ;;  %v2870_v43 = vld [vmem:[%s3925_s5] ss:$12 sps:$4 sm:$0xff]  }
0x148b   :  { %2045 = vmatpush1.bf16.msra.mxu0 %v2870_v43 }
0x148c   :  { %v1836_v11 = vsel %vm1832_vm7, %v1830_v19, %v1834_v39  ;;  %vm1833_vm0 = vcmp.ge.f32.partialorder %v1831_v9, 0.0  ;;  %v1835_v22 = vmul.f32 0.3, %v1831_v9  ;;  %2046 = vmatprep.subr.bf16.mxu0 %v2875_v14 }
0x148d   :  { %v1838_v12 = vmul.f32 %v1836_v11, %v3154_v61 }
0x148e   :  { %v1837_v2 = vsel %vm1833_vm0, %v1831_v9, %v1835_v22  ;;  %vm3944_vm0 = vcmask 654336  }
0x148f   :  { %v1839_v29 = vmul.f32 %v1837_v2, %v3154_v61  ;;  %v2867_v61 = vld [vmem:[%s3922_s1 + $0x44] ss:$8 sps:$4 sm:$0xff]   ;;  %2047 = vmatpush1.bf16.msra.mxu0 %v2873_v17 }
0x1490   :  { %2655 = vmatprep.mubr.msk.bf16.mxu1 %vm83_vm2, %v2867_v61  ;;  %2048 = vmatprep.subr.bf16.mxu0 %v2878_v47 }
0x1491   :  { %v1840_v34 = vpack.c.bf16 %v1839_v29, %v1838_v12 }
0x1493   :  { %1842 = vrot.lane.b32.xlu0 %v1840_v34, %s3941_s21  ;;  %2049 = vmatpush1.bf16.msra.mxu0 %v2876_v49 }
0x1494   :  { %2050 = vmatprep.subr.bf16.mxu0 %v2881_v54 }
0x1497   :  { %2051 = vmatpush1.bf16.msra.mxu0 %v2879_v51 }
0x1498   :  { %2052 = vmatprep.subr.bf16.mxu0 %v2884_v53 }
0x149b   :  { %2053 = vmatpush1.bf16.msra.mxu0 %v2882_v55 }
0x149c   :  { %2737 = vmatprep.subr.bf16.mxu0 %v2912_v62 }
0x1505   :  { %v1843_v13 = vpop.permute.xlu0 %1842 }
0x1506   :  { %v1845_v35 = vsel %vm3943_vm1, 0, %v1843_v13 }
0x1507   :  { %v1846_v6 = vsel %vm458_vm13, %v1845_v35, 0 }
0x1508   :  { %1852 = vrot.lane.b32.xlu0 %v1846_v6, %s2901_s28  ;;  %1849 = vrot.lane.b32.xlu1 %v1846_v6, %s2902_s29 }
0x1509   :  { %1888 = vmatpush1.bf16.msra.mxu1 %v1846_v6 }
0x150a   :  { %1889 = vmatprep.subr.bf16.mxu1 %v2899_v1 }
0x150c   :  { %1858 = vrot.lane.b32.xlu0 %v1846_v6, %s2914_s13  ;;  %1855 = vrot.lane.b32.xlu1 %v1846_v6, %s2915_s14 }
0x1510   :  { %1864 = vrot.lane.b32.xlu0 %v1846_v6, %s2916_s15  ;;  %1861 = vrot.lane.b32.xlu1 %v1846_v6, %s2906_s9 }
0x1514   :  { %1870 = vrot.lane.b32.xlu0 %v1846_v6, %s2917_s16  ;;  %1867 = vrot.lane.b32.xlu1 %v1846_v6, %s2918_s17  ;;  %v2890_v6 = vld [vmem:[%s3922_s1 + $0x54] ss:$8 sps:$4 sm:$0xff]  }
0x157a   :  { %v1850_v16 = vpop.permute.xlu1 %1849  ;;  %v1853_v21 = vpop.permute.xlu0 %1852 }
0x157b   :  { %1890 = vmatpush1.bf16.msra.mxu1 %v1850_v16 }
0x157c   :  { %1891 = vmatprep.subr.bf16.mxu1 %v2899_v1 }
0x157e   :  { %v1856_v24 = vpop.permute.xlu1 %1855  ;;  %v1859_v25 = vpop.permute.xlu0 %1858 }
0x157f   :  { %1892 = vmatpush1.bf16.msra.mxu1 %v1853_v21 }
0x1580   :  { %1893 = vmatprep.subr.bf16.mxu1 %v2899_v1 }
0x1582   :  { %v1862_v26 = vpop.permute.xlu1 %1861  ;;  %v1865_v41 = vpop.permute.xlu0 %1864 }
0x1583   :  { %1894 = vmatpush1.bf16.msra.mxu1 %v1856_v24 }
0x1584   :  { %1895 = vmatprep.subr.bf16.mxu1 %v2899_v1 }
0x1586   :  { %v1868_v48 = vpop.permute.xlu1 %1867  ;;  %v1871_v45 = vpop.permute.xlu0 %1870 }
0x1587   :  { %1896 = vmatpush1.bf16.msra.mxu1 %v1859_v25 }
0x1588   :  { %1897 = vmatprep.subr.bf16.mxu1 %v2899_v1 }
0x158b   :  { %1898 = vmatpush1.bf16.msra.mxu1 %v1862_v26 }
0x158c   :  { %1899 = vmatprep.subr.bf16.mxu1 %v2899_v1 }
0x158f   :  { %1900 = vmatpush1.bf16.msra.mxu1 %v1865_v41 }
0x1590   :  { %1901 = vmatprep.subr.bf16.mxu1 %v2899_v1 }
0x1593   :  { %1902 = vmatpush1.bf16.msra.mxu1 %v1868_v48 }
0x1594   :  { %1903 = vmatprep.subr.bf16.mxu1 %v2899_v1 }
0x1597   :  { %1904 = vmatpush1.bf16.msra.mxu1 %v1871_v45 }
0x159a   :  { %1920 = vmatmul.mubr.bf16.vlgmr.msra.gmra.mrb[32].mxu1 %v2869_v50 }
0x159b   :  { %2677 = vmatprep.mubr.msk.bf16.mxu1 %vm83_vm2, %v2890_v6 }
0x166d   :  { %v1921_v56 = vpop.f32.mrb[32].mxu1 }
0x166e   :  { %v1928_v57 = vmul.f32 %v1921_v56, %v3270_v33  ;;  %v1923_v59 = vpop.f32.mrb[33].mxu1  ;;  %v2885_v33 = vld [vmem:[%s3925_s5 + $0x8] ss:$12 sps:$4 sm:$0xff]  }
0x166f   :  { %v1924_v27 = vpop.f32.mrb[34].mxu1 }
0x1670   :  { %v1930_v0 = vadd.f32 %v1928_v57, %v3272_v5  ;;  %v1929_v4 = vmul.f32 %v1924_v27, %v3274_v38  ;;  %v1926_v28 = vpop.f32.mrb[35].mxu1  ;;  %v2886_v38 = vld [vmem:[%s3925_s5 + $0x20] ss:$12 sps:$4 sm:$0xff]  }
0x1672   :  { %v1932_v8 = vadd.f32 %v1930_v0, %v3623_v31  ;;  %v1931_v30 = vadd.f32 %v1929_v4, %v3279_v46  ;;  %v2887_v46 = vld [vmem:[%s3925_s5 + $0x38] ss:$12 sps:$4 sm:$0xff]   ;;  %v2888_v31 = vld [vmem:[%s3925_s5 + $0x50] ss:$12 sps:$4 sm:$0xff]  }
0x1674   :  { %v1936_v10 = vmul.f32 0.3, %v1932_v8  ;;  %v1933_v7 = vadd.f32 %v1931_v30, %v3625_v44  ;;  %vm1934_vm9 = vcmp.ge.f32.partialorder %v1932_v8, 0.0  ;;  %v2889_v44 = vld [vmem:[%s3925_s5 + $0x68] ss:$12 sps:$4 sm:$0xff]  }
0x1676   :  { %vm1935_vm7 = vcmp.ge.f32.partialorder %v1933_v7, 0.0  ;;  %v1937_v19 = vmul.f32 0.3, %v1933_v7  ;;  %v1938_v60 = vsel %vm1934_vm9, %v1932_v8, %v1936_v10 }
0x1678   :  { %v1939_v63 = vsel %vm1935_vm7, %v1933_v7, %v1937_v19 }
0x1679   :  { %v1940_v5 = vpack.c.bf16 %v1939_v63, %v1938_v60 }
0x167b   :  { %2671 = vmatmul.mubr.msk.bf16.vlgmr.msra.gmra.mrb[36].mxu0 %vm3944_vm0, %v1940_v5 }
0x167c   :  { %2738 = vmatpush3.bf16.msra.mxu0 %v2885_v33  ;;  %2747 = vmatprep.mubr.msk.bf16.mxu0 %vm3938_vm12, %v2912_v62  ;;  %vm3945_vm12 = vmmov %vm3944_vm0 }
0x167d   :  { %2739 = vmatprep.subr.bf16.mxu0 %v2912_v62 }
0x1680   :  { %2740 = vmatpush3.bf16.msra.mxu0 %v2886_v38 }
0x1681   :  { %2741 = vmatprep.subr.bf16.mxu0 %v2912_v62 }
0x1684   :  { %2742 = vmatpush3.bf16.msra.mxu0 %v2887_v46  ;;  %v2892_v46 = vld [vmem:[%s3922_s1 + $0x50] ss:$8 sps:$4 sm:$0xff]  }
0x1685   :  { %2743 = vmatprep.subr.bf16.mxu0 %v2912_v62 }
0x1688   :  { %2744 = vmatpush3.bf16.msra.mxu0 %v2888_v31 }
0x1689   :  { %2745 = vmatprep.subr.bf16.mxu0 %v2912_v62 }
0x168c   :  { %2746 = vmatpush3.bf16.msra.mxu0 %v2889_v44 }
0x168d   :  { %2279 = vmatprep.subr.bf16.mxu0 %v2899_v1 }
0x168f   :  { %2748 = vmatmul.mubr.msk.bf16.vlgmr.msra.gmra.mrb[40].mxu0 %vm3945_vm12, %v1940_v5 }
0x1690   :  { %2678 = vmatprep.mubr.msk.bf16.mxu0 %vm83_vm2, %v2890_v6 }
0x174e   :  { %v2078_v39 = vpop.f32.mrb[36].mxu0 }
0x174f   :  { %v2080_v9 = vpop.f32.mrb[37].mxu0 }
0x1750   :  { %v2082_v11 = vpop.f32.mrb[38].mxu0 }
0x1751   :  { %v2128_v22 = vpack.c.bf16 %v2082_v11, %v2078_v39  ;;  %v2084_v2 = vpop.f32.mrb[39].mxu0 }
0x1752   :  { %v2129_v12 = vpack.c.bf16 %v2084_v2, %v2080_v9 }
0x1753   :  { %2145 = vrot.lane.b32.xlu0 %v2128_v22, %s2901_s28  ;;  %2134 = vrot.lane.b32.xlu1 %v2128_v22, %s2902_s29 }
0x1754   :  { %2236 = vmatprep.subr.bf16.mxu1 %v2129_v12 }
0x1755   :  { %2237 = vmatpush1.bf16.msra.mxu1 %v2128_v22 }
0x1757   :  { %2156 = vrot.lane.b32.xlu1 %v2128_v22, %s2926_s22  ;;  %2147 = vrot.lane.b32.xlu0 %v2129_v12, %s2901_s28 }
0x175b   :  { %2169 = vrot.lane.b32.xlu0 %v2129_v12, %s2927_s23  ;;  %2136 = vrot.lane.b32.xlu1 %v2129_v12, %s2902_s29 }
0x175f   :  { %2158 = vrot.lane.b32.xlu1 %v2129_v12, %s2926_s22 }
0x1762   :  { %v2121_v62 = vpop.f32.mrb[40].mxu0 }
0x1763   :  { %v2749_v29 = vpop.f32.mrb[41].mxu0  ;;  %2180 = vrot.lane.b32.xlu1 %v2129_v12, %s2916_s15 }
0x1764   :  { %v2124_v34 = vpop.f32.mrb[42].mxu0 }
0x1765   :  { %v2130_v13 = vpack.c.bf16 %v2124_v34, %v2121_v62  ;;  %v2750_v35 = vpop.f32.mrb[43].mxu0 }
0x1767   :  { %2138 = vrot.lane.b32.xlu0 %v2130_v13, %s2902_s29  ;;  %2280 = vmatpush1.bf16.msra.mxu0 %v2130_v13 }
0x1768   :  { %2149 = vrot.lane.b32.xlu1 %v2130_v13, %s2901_s28  ;;  %2281 = vmatprep.subr.bf16.mxu0 %v2899_v1 }
0x176b   :  { %2167 = vrot.lane.b32.xlu0 %v2128_v22, %s2927_s23 }
0x176c   :  { %2178 = vrot.lane.b32.xlu1 %v2128_v22, %s2916_s15 }
0x176f   :  { %2160 = vrot.lane.b32.xlu0 %v2130_v13, %s2926_s22 }
0x1770   :  { %2171 = vrot.lane.b32.xlu1 %v2130_v13, %s2927_s23 }
0x1773   :  { %2191 = vrot.lane.b32.xlu0 %v2129_v12, %s2928_s24 }
0x1774   :  { %2202 = vrot.lane.b32.xlu1 %v2129_v12, %s2929_s25 }
0x1777   :  { %2182 = vrot.lane.b32.xlu0 %v2130_v13, %s2916_s15 }
0x1778   :  { %2193 = vrot.lane.b32.xlu1 %v2130_v13, %s2928_s24 }
0x177b   :  { %2189 = vrot.lane.b32.xlu0 %v2128_v22, %s2928_s24 }
0x177c   :  { %2200 = vrot.lane.b32.xlu1 %v2128_v22, %s2929_s25 }
0x177f   :  { %2204 = vrot.lane.b32.xlu0 %v2130_v13, %s2929_s25 }
0x1780   :  { %2215 = vrot.lane.b32.xlu1 %v2130_v13, %s2931_s18 }
0x1783   :  { %2213 = vrot.lane.b32.xlu0 %v2129_v12, %s2931_s18 }
0x1787   :  { %2211 = vrot.lane.b32.xlu0 %v2128_v22, %s2931_s18 }
0x17c5   :  { %v2135_v61 = vpop.permute.xlu1 %2134  ;;  %v2146_v43 = vpop.permute.xlu0 %2145 }
0x17c9   :  { %v2157_v3 = vpop.permute.xlu1 %2156  ;;  %v2148_v17 = vpop.permute.xlu0 %2147 }
0x17ca   :  { %v2151_v49 = vsel %vm900_vm10, %v2146_v43, %v2148_v17 }
0x17cd   :  { %v2137_v14 = vpop.permute.xlu1 %2136  ;;  %v2170_v21 = vpop.permute.xlu0 %2169 }
0x17ce   :  { %v2140_v48 = vsel %vm888_vm8, %v2135_v61, %v2137_v14 }
0x17d1   :  { %v2159_v16 = vpop.permute.xlu1 %2158 }
0x17d2   :  { %v2162_v55 = vsel %vm912_vm11, %v2157_v3, %v2159_v16 }
0x17d5   :  { %v2181_v24 = vpop.permute.xlu1 %2180 }
0x17d9   :  { %v2139_v25 = vpop.permute.xlu0 %2138 }
0x17da   :  { %v2150_v26 = vpop.permute.xlu1 %2149  ;;  %2282 = vmatpush1.bf16.msra.mxu0 %v2139_v25  ;;  %v2141_v41 = vsel %vm888_vm8, %v2137_v14, %v2139_v25 }
0x17db   :  { %2238 = vmatprep.subr.bf16.mxu1 %v2141_v41  ;;  %v2152_v45 = vsel %vm900_vm10, %v2148_v17, %v2150_v26  ;;  %2283 = vmatprep.subr.bf16.mxu0 %v2899_v1 }
0x17dc   :  { %2239 = vmatpush1.bf16.msra.mxu1 %v2140_v48 }
0x17dd   :  { %2240 = vmatprep.subr.bf16.mxu1 %v2152_v45  ;;  %v2168_v50 = vpop.permute.xlu0 %2167 }
0x17de   :  { %v2179_v47 = vpop.permute.xlu1 %2178  ;;  %2284 = vmatpush1.bf16.msra.mxu0 %v2150_v26  ;;  %v2173_v27 = vsel %vm924_vm14, %v2168_v50, %v2170_v21 }
0x17df   :  { %2285 = vmatprep.subr.bf16.mxu0 %v2899_v1  ;;  %v2184_v8 = vsel %vm936_vm15, %v2179_v47, %v2181_v24 }
0x17e0   :  { %2241 = vmatpush1.bf16.msra.mxu1 %v2151_v49 }
0x17e1   :  { %v2161_v54 = vpop.permute.xlu0 %2160 }
0x17e2   :  { %v2172_v51 = vpop.permute.xlu1 %2171  ;;  %2286 = vmatpush1.bf16.msra.mxu0 %v2161_v54  ;;  %v2163_v53 = vsel %vm912_vm11, %v2159_v16, %v2161_v54 }
0x17e3   :  { %2242 = vmatprep.subr.bf16.mxu1 %v2163_v53  ;;  %v2174_v56 = vsel %vm924_vm14, %v2170_v21, %v2172_v51  ;;  %2287 = vmatprep.subr.bf16.mxu0 %v2899_v1 }
0x17e4   :  { %2243 = vmatpush1.bf16.msra.mxu1 %v2162_v55 }
0x17e5   :  { %2244 = vmatprep.subr.bf16.mxu1 %v2174_v56  ;;  %v2192_v57 = vpop.permute.xlu0 %2191 }
0x17e6   :  { %v2203_v59 = vpop.permute.xlu1 %2202  ;;  %2288 = vmatpush1.bf16.msra.mxu0 %v2172_v51 }
0x17e7   :  { %2289 = vmatprep.subr.bf16.mxu0 %v2899_v1 }
0x17e8   :  { %2245 = vmatpush1.bf16.msra.mxu1 %v2173_v27 }
0x17e9   :  { %v2183_v0 = vpop.permute.xlu0 %2182 }
0x17ea   :  { %v2194_v4 = vpop.permute.xlu1 %2193  ;;  %2290 = vmatpush1.bf16.msra.mxu0 %v2183_v0  ;;  %v2185_v28 = vsel %vm936_vm15, %v2181_v24, %v2183_v0 }
0x17eb   :  { %2246 = vmatprep.subr.bf16.mxu1 %v2185_v28  ;;  %v2196_v30 = vsel %vm948_vm3, %v2192_v57, %v2194_v4  ;;  %2291 = vmatprep.subr.bf16.mxu0 %v2899_v1  ;;  %v2935_v28 = vmov 13  }
0x17ec   :  { %2247 = vmatpush1.bf16.msra.mxu1 %v2184_v8  ;;  %2809 = vset.pattern.permute.xlu1 %v2935_v28 }
0x17ed   :  { %2248 = vmatprep.subr.bf16.mxu1 %v2196_v30  ;;  %v2190_v10 = vpop.permute.xlu0 %2189 }
0x17ee   :  { %v2195_v7 = vsel %vm948_vm3, %v2190_v10, %v2192_v57  ;;  %2292 = vmatpush1.bf16.msra.mxu0 %v2194_v4  ;;  %v2201_v19 = vpop.permute.xlu1 %2200  ;;  %v2934_v4 = vmov 12  }
0x17ef   :  { %2293 = vmatprep.subr.bf16.mxu0 %v2899_v1  ;;  %v2206_v33 = vsel %vm458_vm13, %v2201_v19, %v2203_v59  ;;  %2808 = vset.pattern.permute.xlu0 %v2934_v4 }
0x17f0   :  { %2249 = vmatpush1.bf16.msra.mxu1 %v2195_v7 }
0x17f1   :  { %v2205_v60 = vpop.permute.xlu0 %2204 }
0x17f2   :  { %2294 = vmatpush1.bf16.msra.mxu0 %v2205_v60  ;;  %v2207_v63 = vsel %vm458_vm13, %v2203_v59, %v2205_v60  ;;  %v2216_v5 = vpop.permute.xlu1 %2215  ;;  %v2681_v60 = vcombine.high %v3855_v18, %v3855_v18 }
0x17f3   :  { %2250 = vmatprep.subr.bf16.mxu1 %v2207_v63  ;;  %2295 = vmatprep.subr.bf16.mxu0 %v2899_v1  ;;  %v2898_v63 = vld [vmem:[%s3923_s2] sm:$0xff] }
0x17f4   :  { %2251 = vmatpush1.bf16.msra.mxu1 %v2206_v33 }
0x17f5   :  { %v2214_v38 = vpop.permute.xlu0 %2213 }
0x17f6   :  { %2296 = vmatpush1.bf16.msra.mxu0 %v2216_v5  ;;  %v2218_v31 = vsel %vm972_vm4, %v2214_v38, %v2216_v5 }
0x17f7   :  { %2252 = vmatprep.subr.bf16.mxu1 %v2218_v31  ;;  %2518 = vmatprep.subr.bf16.mxu0 %v2899_v1 }
0x17f9   :  { %v2212_v44 = vpop.permute.xlu0 %2211  ;;  %2312 = vmatmul.mubr.bf16.vlgmr.msra.gmra.mrb[44].mxu0 %v2892_v46 }
0x17fa   :  { %v2217_v39 = vsel %vm972_vm4, %v2212_v44, %v2214_v38  ;;  %2685 = vmatprep.mubr.msk.bf16.mxu0 %vm83_vm2, %v2681_v60 }
0x17fb   :  { %2253 = vmatpush1.bf16.msra.mxu1 %v2217_v39 }
0x17fe   :  { %2269 = vmatmul.mubr.bf16.vlgmr.msra.gmra.mrb[36].mxu1 %v2892_v46 }
0x17ff   :  { %2684 = vmatprep.mubr.msk.bf16.mxu1 %vm83_vm2, %v2681_v60  ;;  %vm1380_vm2 = vcmask 261120  }
0x18cc   :  { %v2313_v9 = vpop.f32.mrb[44].mxu0 }
0x18cd   :  { %v2322_v11 = vmul.f32 %v2313_v9, %v3373_v36  ;;  %v2315_v22 = vpop.f32.mrb[45].mxu0 }
0x18ce   :  { %v2316_v2 = vpop.f32.mrb[46].mxu0 }
0x18cf   :  { %v2328_v12 = vadd.f32 %v2322_v11, %v3379_v42  ;;  %v2325_v62 = vmul.f32 %v2316_v2, %v3371_v32  ;;  %v2318_v29 = vpop.f32.mrb[47].mxu0 }
0x18d1   :  { %vm2334_vm1 = vcmp.ge.f32.partialorder %v2328_v12, 0.0  ;;  %v2340_v34 = vmul.f32 0.3, %v2328_v12  ;;  %v2331_v13 = vadd.f32 %v2325_v62, %v3382_v52  ;;  %v2270_v35 = vpop.f32.mrb[36].mxu1 }
0x18d2   :  { %v2320_v6 = vmul.f32 %v2270_v35, %v3373_v36  ;;  %v2272_v61 = vpop.f32.mrb[37].mxu1 }
0x18d3   :  { %v2346_v43 = vsel %vm2334_vm1, %v2328_v12, %v2340_v34  ;;  %vm2337_vm9 = vcmp.ge.f32.partialorder %v2331_v13, 0.0  ;;  %v2343_v3 = vmul.f32 0.3, %v2331_v13  ;;  %v2321_v14 = vmul.f32 %v2272_v61, %v3373_v36  ;;  %v2274_v17 = vpop.f32.mrb[38].mxu1 }
0x18d4   :  { %v2326_v16 = vadd.f32 %v2320_v6, %v3379_v42  ;;  %v2323_v21 = vmul.f32 %v2274_v17, %v3371_v32  ;;  %v2276_v24 = vpop.f32.mrb[39].mxu1  ;;  %v2352_v25 = vmul.f32 %v2346_v43, %v3387_v58 }
0x18d5   :  { %v2349_v26 = vsel %vm2337_vm9, %v2331_v13, %v2343_v3  ;;  %v2327_v41 = vadd.f32 %v2321_v14, %v3379_v42  ;;  %v2324_v48 = vmul.f32 %v2276_v24, %v3371_v32  ;;  %vm3946_vm9 = vcmask 416768  }
0x18d6   :  { %v2355_v45 = vmul.f32 %v2349_v26, %v3387_v58  ;;  %vm2332_vm7 = vcmp.ge.f32.partialorder %v2326_v16, 0.0  ;;  %v2338_v50 = vmul.f32 0.3, %v2326_v16  ;;  %v2329_v47 = vadd.f32 %v2323_v21, %v3382_v52 }
0x18d7   :  { %vm2333_vm0 = vcmp.ge.f32.partialorder %v2327_v41, 0.0  ;;  %v2339_v36 = vmul.f32 0.3, %v2327_v41  ;;  %v2330_v49 = vadd.f32 %v2324_v48, %v3382_v52 }
0x18d8   :  { %v2344_v54 = vsel %vm2332_vm7, %v2326_v16, %v2338_v50  ;;  %vm2335_vm12 = vcmp.ge.f32.partialorder %v2329_v47, 0.0  ;;  %v2341_v51 = vmul.f32 0.3, %v2329_v47  ;;  %v2358_v53 = vpack.c.bf16 %v2355_v45, %v2352_v25 }
0x18d9   :  { %v2345_v55 = vsel %vm2333_vm0, %v2327_v41, %v2339_v36  ;;  %vm2336_vm1 = vcmp.ge.f32.partialorder %v2330_v49, 0.0  ;;  %v2342_v56 = vmul.f32 0.3, %v2330_v49  ;;  %v2350_v32 = vmul.f32 %v2344_v54, %v3400_v23 }
0x18da   :  { %v2347_v42 = vsel %vm2335_vm12, %v2329_v47, %v2341_v51  ;;  %2366 = vrot.lane.b32.xlu0 %v2358_v53, %s2933_s26  ;;  %v2351_v59 = vmul.f32 %v2345_v55, %v3404_v40 }
0x18db   :  { %v2353_v58 = vmul.f32 %v2347_v42, %v3400_v23  ;;  %v2348_v57 = vsel %vm2336_vm1, %v2330_v49, %v2342_v56  ;;  %v2680_v56 = vcombine.low %v3855_v18, %v3855_v18 }
0x18dc   :  { %v2354_v27 = vmul.f32 %v2348_v57, %v3404_v40 }
0x18dd   :  { %v2356_v52 = vpack.c.bf16 %v2353_v58, %v2350_v32 }
0x18de   :  { %v2357_v0 = vpack.c.bf16 %v2354_v27, %v2351_v59 }
0x18e0   :  { %2364 = vrot.lane.b32.xlu1 %v2357_v0, %s2933_s26 }
0x18e4   :  { %2362 = vrot.lane.b32.xlu1 %v2356_v52, %s2933_s26 }
0x194c   :  { %v2367_v8 = vpop.permute.xlu0 %2366 }
0x1952   :  { %v2365_v30 = vpop.permute.xlu1 %2364 }
0x1953   :  { %v2369_v10 = vsel %vm1170_vm5, %v2365_v30, %v2367_v8 }
0x1954   :  { %v2375_v23 = vsel %vm3946_vm9, %v2369_v10, 0 }
0x1955   :  { %2519 = vmatpush1.bf16.msra.mxu0 %v2375_v23 }
0x1956   :  { %v2363_v7 = vpop.permute.xlu1 %2362  ;;  %2520 = vmatprep.subr.bf16.mxu0 %v2899_v1 }
0x1957   :  { %v2368_v40 = vsel %vm1170_vm5, %v2363_v7, %v2365_v30  ;;  %v2372_v19 = vsel %vm1170_vm5, 0, %v2363_v7 }
0x1958   :  { %2390 = vrot.lane.b32.xlu1 %v2372_v19, %s2901_s28  ;;  %2477 = vmatprep.subr.bf16.mxu1 %v2368_v40 }
0x1959   :  { %2379 = vrot.lane.b32.xlu0 %v2372_v19, %s2902_s29  ;;  %2683 = vmatpush1.bf16.msk.msra.mxu1 %vm3431_vm6, %v2363_v7 }
0x195c   :  { %2392 = vrot.lane.b32.xlu1 %v2368_v40, %s2901_s28 }
0x195d   :  { %2401 = vrot.lane.b32.xlu0 %v2372_v19, %s2926_s22 }
0x1960   :  { %2414 = vrot.lane.b32.xlu1 %v2368_v40, %s2927_s23 }
0x1961   :  { %2381 = vrot.lane.b32.xlu0 %v2368_v40, %s2902_s29 }
0x1964   :  { %2383 = vrot.lane.b32.xlu1 %v2375_v23, %s2902_s29 }
0x1965   :  { %2403 = vrot.lane.b32.xlu0 %v2368_v40, %s2926_s22 }
0x1968   :  { %2412 = vrot.lane.b32.xlu1 %v2372_v19, %s2927_s23 }
0x1969   :  { %2425 = vrot.lane.b32.xlu0 %v2368_v40, %s2916_s15 }
0x196c   :  { %2405 = vrot.lane.b32.xlu1 %v2375_v23, %s2926_s22 }
0x196d   :  { %2394 = vrot.lane.b32.xlu0 %v2375_v23, %s2901_s28 }
0x1970   :  { %2436 = vrot.lane.b32.xlu1 %v2368_v40, %s2928_s24 }
0x1971   :  { %2423 = vrot.lane.b32.xlu0 %v2372_v19, %s2916_s15 }
0x1974   :  { %2427 = vrot.lane.b32.xlu1 %v2375_v23, %s2916_s15 }
0x1975   :  { %2416 = vrot.lane.b32.xlu0 %v2375_v23, %s2927_s23 }
0x1978   :  { %2434 = vrot.lane.b32.xlu1 %v2372_v19, %s2928_s24 }
0x1979   :  { %2447 = vrot.lane.b32.xlu0 %v2368_v40, %s2929_s25 }
0x197c   :  { %2449 = vrot.lane.b32.xlu1 %v2375_v23, %s2929_s25 }
0x197d   :  { %2438 = vrot.lane.b32.xlu0 %v2375_v23, %s2928_s24 }
0x1980   :  { %2458 = vrot.lane.b32.xlu1 %v2368_v40, %s2931_s18 }
0x1981   :  { %2445 = vrot.lane.b32.xlu0 %v2372_v19, %s2929_s25 }
0x1984   :  { %2456 = vrot.lane.b32.xlu1 %v2372_v19, %s2931_s18 }
0x1985   :  { %2460 = vrot.lane.b32.xlu0 %v2375_v23, %s2931_s18 }
0x1988   :  { %1372 = vperm.xlu1 %2809, %v2898_v63  }
0x1989   :  { %1365 = vperm.xlu0 %2808, %v2898_v63  }
0x198d   :  { %2810 = vset.pattern.permute.xlu0 %v2935_v28 }
0x19ca   :  { %v2391_v33 = vpop.permute.xlu1 %2390 }
0x19cb   :  { %v2380_v5 = vpop.permute.xlu0 %2379 }
0x19ce   :  { %v2393_v38 = vpop.permute.xlu1 %2392 }
0x19cf   :  { %v2402_v46 = vpop.permute.xlu0 %2401  ;;  %v2396_v13 = vsel %vm900_vm10, %v2391_v33, %v2393_v38 }
0x19d2   :  { %v2415_v31 = vpop.permute.xlu1 %2414 }
0x19d3   :  { %v2382_v44 = vpop.permute.xlu0 %2381 }
0x19d4   :  { %v2385_v22 = vsel %vm888_vm8, %v2380_v5, %v2382_v44 }
0x19d6   :  { %v2384_v39 = vpop.permute.xlu1 %2383 }
0x19d7   :  { %v2404_v9 = vpop.permute.xlu0 %2403  ;;  %2521 = vmatpush1.bf16.msra.mxu0 %v2384_v39  ;;  %v2386_v11 = vsel %vm888_vm8, %v2382_v44, %v2384_v39 }
0x19d8   :  { %2479 = vmatprep.subr.bf16.mxu1 %v2386_v11  ;;  %2522 = vmatprep.subr.bf16.mxu0 %v2899_v1  ;;  %v2407_v43 = vsel %vm912_vm11, %v2402_v46, %v2404_v9 }
0x19d9   :  { %2480 = vmatpush1.bf16.msra.mxu1 %v2385_v22 }
0x19da   :  { %v2413_v2 = vpop.permute.xlu1 %2412 }
0x19db   :  { %v2426_v12 = vpop.permute.xlu0 %2425  ;;  %v2418_v16 = vsel %vm924_vm14, %v2413_v2, %v2415_v31 }
0x19de   :  { %v2406_v62 = vpop.permute.xlu1 %2405 }
0x19df   :  { %v2395_v29 = vpop.permute.xlu0 %2394  ;;  %v2408_v6 = vsel %vm912_vm11, %v2404_v9, %v2406_v62 }
0x19e0   :  { %2523 = vmatpush1.bf16.msra.mxu0 %v2395_v29  ;;  %v2397_v34 = vsel %vm900_vm10, %v2393_v38, %v2395_v29 }
0x19e1   :  { %2481 = vmatprep.subr.bf16.mxu1 %v2397_v34  ;;  %2524 = vmatprep.subr.bf16.mxu0 %v2899_v1 }
0x19e2   :  { %2482 = vmatpush1.bf16.msra.mxu1 %v2396_v13  ;;  %v2437_v35 = vpop.permute.xlu1 %2436 }
0x19e3   :  { %2483 = vmatprep.subr.bf16.mxu1 %v2408_v6  ;;  %v2424_v61 = vpop.permute.xlu0 %2423 }
0x19e4   :  { %2525 = vmatpush1.bf16.msra.mxu0 %v2406_v62  ;;  %v2429_v26 = vsel %vm936_vm15, %v2424_v61, %v2426_v12 }
0x19e5   :  { %2526 = vmatprep.subr.bf16.mxu0 %v2899_v1 }
0x19e6   :  { %2484 = vmatpush1.bf16.msra.mxu1 %v2407_v43  ;;  %v2428_v3 = vpop.permute.xlu1 %2427 }
0x19e7   :  { %v2417_v14 = vpop.permute.xlu0 %2416  ;;  %v2430_v24 = vsel %vm936_vm15, %v2426_v12, %v2428_v3 }
0x19e8   :  { %2527 = vmatpush1.bf16.msra.mxu0 %v2417_v14  ;;  %v2419_v17 = vsel %vm924_vm14, %v2415_v31, %v2417_v14 }
0x19e9   :  { %2485 = vmatprep.subr.bf16.mxu1 %v2419_v17  ;;  %2528 = vmatprep.subr.bf16.mxu0 %v2899_v1 }
0x19ea   :  { %2486 = vmatpush1.bf16.msra.mxu1 %v2418_v16  ;;  %v2435_v21 = vpop.permute.xlu1 %2434 }
0x19eb   :  { %2487 = vmatprep.subr.bf16.mxu1 %v2430_v24  ;;  %v2448_v25 = vpop.permute.xlu0 %2447  ;;  %v2440_v50 = vsel %vm948_vm3, %v2435_v21, %v2437_v35 }
0x19ec   :  { %2529 = vmatpush1.bf16.msra.mxu0 %v2428_v3 }
0x19ed   :  { %2530 = vmatprep.subr.bf16.mxu0 %v2899_v1 }
0x19ee   :  { %2488 = vmatpush1.bf16.msra.mxu1 %v2429_v26  ;;  %v2450_v41 = vpop.permute.xlu1 %2449 }
0x19ef   :  { %v2439_v48 = vpop.permute.xlu0 %2438  ;;  %v2452_v36 = vsel %vm458_vm13, %v2448_v25, %v2450_v41 }
0x19f0   :  { %2531 = vmatpush1.bf16.msra.mxu0 %v2439_v48  ;;  %v2441_v45 = vsel %vm948_vm3, %v2437_v35, %v2439_v48 }
0x19f1   :  { %2489 = vmatprep.subr.bf16.mxu1 %v2441_v45  ;;  %2532 = vmatprep.subr.bf16.mxu0 %v2899_v1 }
0x19f2   :  { %2490 = vmatpush1.bf16.msra.mxu1 %v2440_v50  ;;  %v2459_v47 = vpop.permute.xlu1 %2458 }
0x19f3   :  { %2491 = vmatprep.subr.bf16.mxu1 %v2452_v36  ;;  %v2446_v49 = vpop.permute.xlu0 %2445 }
0x19f4   :  { %v2451_v54 = vsel %vm458_vm13, %v2446_v49, %v2448_v25  ;;  %2533 = vmatpush1.bf16.msra.mxu0 %v2450_v41 }
0x19f5   :  { %2534 = vmatprep.subr.bf16.mxu0 %v2899_v1 }
0x19f6   :  { %2492 = vmatpush1.bf16.msra.mxu1 %v2451_v54  ;;  %v2457_v51 = vpop.permute.xlu1 %2456 }
0x19f7   :  { %v2462_v53 = vsel %vm972_vm4, %v2457_v51, %v2459_v47  ;;  %v2461_v55 = vpop.permute.xlu0 %2460 }
0x19f8   :  { %2535 = vmatpush1.bf16.msra.mxu0 %v2461_v55  ;;  %v2463_v42 = vsel %vm972_vm4, %v2459_v47, %v2461_v55 }
0x19f9   :  { %2493 = vmatprep.subr.bf16.mxu1 %v2463_v42 }
0x19fa   :  { %2494 = vmatpush1.bf16.msra.mxu1 %v2462_v53 }
0x19fb   :  { %2551 = vmatmul.mubr.bf16.vlgmr.msra.gmra.mrb[48].mxu0 %v2680_v56 }
0x19fd   :  { %2510 = vmatmul.mubr.bf16.vlgmr.msra.gmra.mrb[40].mxu1 %v2680_v56 }
0x1a07   :  { %v1373_v58 = vpop.permute.xlu1 %1372 }
0x1a08   :  { %v1366_v32 = vpop.permute.xlu0 %1365 }
0x1a09   :  { %v1368_v57 = vmul.f32 %v1366_v32, %v3540_v20  ;;  %v1369_v1 = vmul.f32 %v1366_v32, %v3542_v15  ;;  %v1370_v59 = vmul.f32 %v1366_v32, %v3566_v37 }
0x1a0b   :  { %v1375_v27 = vadd.f32 %v1373_v58, %v1368_v57  ;;  %v1376_v52 = vadd.f32 %v1373_v58, %v1369_v1  ;;  %v1377_v0 = vadd.f32 %v1373_v58, %v1370_v59 }
0x1a0d   :  { %1378 = vst [vmem:[%s3926_s6] sm:$0xff] %v1375_v27  ;;  %1379 = vst [vmem:[%s3926_s6 + $0x8] sm:$0xff] %v1376_v52 }
0x1a0e   :  { %1381 = vst.msk [vmem:[%s3926_s6 + $0x10] sm:$0xff] %vm1380_vm2, %v1377_v0 }
0x1ace   :  { %v2552_v20 = vpop.f32.mrb[48].mxu0 }
0x1acf   :  { %v2560_v15 = vmul.f32 %v2552_v20, %v1366_v32  ;;  %v2554_v37 = vpop.f32.mrb[49].mxu0 }
0x1ad0   :  { %v2511_v4 = vpop.f32.mrb[40].mxu1  ;;  %v2555_v28 = vpop.f32.mrb[50].mxu0 }
0x1ad1   :  { %v2563_v8 = vadd.f32 %v2560_v15, %v1373_v58  ;;  %v2558_v30 = vmul.f32 %v2511_v4, %v1366_v32  ;;  %v2513_v10 = vpop.f32.mrb[41].mxu1  ;;  %v2556_v23 = vpop.f32.mrb[51].mxu0 }
0x1ad2   :  { %v2559_v7 = vmul.f32 %v2513_v10, %v1366_v32  ;;  %v2515_v40 = vpop.f32.mrb[42].mxu1 }
0x1ad3   :  { %2688 = vst.msk [vmem:[%s3926_s6 + $0x28] sm:$0xff] %vm1380_vm2, %v2563_v8  ;;  %v2561_v19 = vadd.f32 %v2558_v30, %v1373_v58  ;;  %v2516_v18 = vpop.f32.mrb[43].mxu1 }
0x1ad4   :  { %v2562_v60 = vadd.f32 %v2559_v7, %v1373_v58 }
0x1ad5   :  { %2686 = vst [vmem:[%s3926_s6 + $0x18] sm:$0xff] %v2561_v19 }
0x1ad6   :  { %2687 = vst [vmem:[%s3926_s6 + $0x20] sm:$0xff] %v2562_v60 }

</bundles_post_ra>
